<compile_context>
chip_gen: v5e
topology: v5e:2x2
jax: 0.10.0
libtpu: 0.0.40
codegen_flags: <defaults>
</compile_context>

<pallas_src>
import jax
import jax.numpy as jnp
from jax import lax
from jax.experimental import pallas as pl
from jax.experimental.pallas import tpu as pltpu

EPS = 1e-5


def _make_fused_kernel(p_valid: int):
    inv_p = 1.0 / float(p_valid)

    def kernel(x_ref, w_ref, p1_ref, p2_ref, o_ref):
        # x_ref : (Cin, Pp)   channel-major activations, f32; lanes >= p_valid are zero
        # w_ref : (Cout, Cin) 1x1-conv weight, bf16
        # p1_ref: (Cin, 2)    [gamma1 | beta1], f32
        # p2_ref: (Cout, 2)   [gamma2 | beta2], f32
        x = x_ref[...]                                           # (Cin, Pp)
        pp = x.shape[-1]
        ones_col = jnp.ones((pp, 1), dtype=jnp.float32)

        # --- BN1 (training mode) stats: plain sum on the idle MXU, sq-sum on XLU.
        # Zero-padded lanes contribute nothing to either sum; divide by p_valid.
        s1 = jnp.dot(x, ones_col, preferred_element_type=jnp.float32)   # (Cin, 1)
        s2 = jnp.sum(x * x, axis=-1, keepdims=True)                     # (Cin, 1)
        mean1 = s1 * inv_p
        var1 = jnp.maximum(s2 * inv_p - mean1 * mean1, 0.0)             # biased var
        scale1 = p1_ref[:, 0:1] * lax.rsqrt(var1 + EPS)
        shift1 = p1_ref[:, 1:2] - mean1 * scale1

        # --- folded BN affine + ReLU + padded-lane mask + bf16 pack, one pass.
        # Masking is REQUIRED: ReLU(shift1) on padded lanes would otherwise leak
        # into BN2's statistics through the matmul.
        lane = lax.broadcasted_iota(jnp.int32, x.shape, 1)
        xn = jnp.where(lane < p_valid,
                       jnp.maximum(x * scale1 + shift1, 0.0),
                       0.0).astype(jnp.bfloat16)                        # (Cin, Pp)

        # --- Conv2d 1x1 (no bias) == channel matmul on the MXU, bf16 in / f32 acc.
        y = jnp.dot(w_ref[...], xn, preferred_element_type=jnp.float32)  # (Cout, Pp)

        # --- BN2 stats (padded columns of y are exactly zero) + folded affine + ReLU.
        t1 = jnp.dot(y, ones_col, preferred_element_type=jnp.float32)    # (Cout, 1)
        t2 = jnp.sum(y * y, axis=-1, keepdims=True)
        mean2 = t1 * inv_p
        var2 = jnp.maximum(t2 * inv_p - mean2 * mean2, 0.0)
        scale2 = p2_ref[:, 0:1] * lax.rsqrt(var2 + EPS)
        shift2 = p2_ref[:, 1:2] - mean2 * scale2

        o_ref[...] = jnp.maximum(y * scale2 + shift2, 0.0).astype(o_ref.dtype)

    return kernel


@jax.jit
def bn_relu_conv1x1_bn_relu(x_nchw, w_oi, gamma1, beta1, gamma2, beta2):
    """x_nchw: (N, Cin, H, W); w_oi: (Cout, Cin) 1x1 conv weight (kernel dims squeezed).

    Pass w_oi pre-cast to bf16 to keep the cast out of the per-call hot path.
    """
    N, Cin, H, W = x_nchw.shape
    Cout = w_oi.shape[0]
    P = N * H * W
    Pp = max(128, ((P + 127) // 128) * 128)          # lane-dense padded length

    # Channel-major (Cin, P). For N == 1 (the module's case) this is a pure reshape.
    if N == 1:
        x2d = x_nchw.reshape(Cin, P)
    else:
        x2d = jnp.transpose(x_nchw, (1, 0, 2, 3)).reshape(Cin, P)
    if Pp != P:
        x2d = jnp.pad(x2d, ((0, 0), (0, Pp - P)))    # zero pad -> BN1 sums unaffected

    w = w_oi if w_oi.dtype == jnp.bfloat16 else w_oi.astype(jnp.bfloat16)

    p1 = jnp.stack([gamma1, beta1], axis=1).astype(jnp.float32)   # (Cin, 2)
    p2 = jnp.stack([gamma2, beta2], axis=1).astype(jnp.float32)   # (Cout, 2)

    grid_spec = pltpu.PrefetchScalarGridSpec(
        num_scalar_prefetch=0,
        grid=(1,),
        in_specs=[
            pl.BlockSpec((Cin, Pp), lambda i: (0, 0)),
            pl.BlockSpec((Cout, Cin), lambda i: (0, 0)),
            pl.BlockSpec((Cin, 2), lambda i: (0, 0)),
            pl.BlockSpec((Cout, 2), lambda i: (0, 0)),
        ],
        out_specs=pl.BlockSpec((Cout, Pp), lambda i: (0, 0)),
    )

    out2d = pl.pallas_call(
        _make_fused_kernel(P),
        out_shape=jax.ShapeDtypeStruct((Cout, Pp), jnp.float32),
        grid_spec=grid_spec,
    )(x2d, w, p1, p2)

    out2d = out2d[:, :P]
    # (Cout, N*H*W) -> NCHW; pure reshape for N == 1.
    if N == 1:
        return out2d.reshape(1, Cout, H, W)
    return jnp.transpose(out2d.reshape(Cout, N, H, W), (1, 0, 2, 3))


def _reference(x, w, g1, b1, g2, b2):
    """Pure-JAX f32 reference matching the PyTorch module's forward (training mode)."""
    def bn_relu(t, g, b):
        mean = jnp.mean(t, axis=(0, 2, 3), keepdims=True)
        var = jnp.mean((t - mean) ** 2, axis=(0, 2, 3), keepdims=True)  # biased
        out = (t - mean) * lax.rsqrt(var + EPS) * g.reshape(1, -1, 1, 1) + b.reshape(1, -1, 1, 1)
        return jnp.maximum(out, 0.0)

    h = bn_relu(x, g1, b1)
    y = jnp.einsum("oc,nchw->nohw", w, h)
    return bn_relu(y, g2, b2)


if __name__ == "__main__":
    # Shapes implied by the module: x155 = randn([1, 320, 14, 14])
    N, Cin, H, W = 1, 320, 14, 14
    Cout = 128

    key = jax.random.PRNGKey(0)
    kx, kw, kg1, kb1, kg2, kb2 = jax.random.split(key, 6)

    x = jax.random.normal(kx, (N, Cin, H, W), dtype=jnp.float32)
    # Deterministic synthetic parameters (shapes from module __init__).
    conv_w = jax.random.normal(kw, (Cout, Cin), dtype=jnp.float32) * 0.05  # 1x1 kernel squeezed
    gamma1 = 1.0 + 0.1 * jax.random.normal(kg1, (Cin,), dtype=jnp.float32)
    beta1 = 0.1 * jax.random.normal(kb1, (Cin,), dtype=jnp.float32)
    gamma2 = 1.0 + 0.1 * jax.random.normal(kg2, (Cout,), dtype=jnp.float32)
    beta2 = 0.1 * jax.random.normal(kb2, (Cout,), dtype=jnp.float32)

    # Cache the bf16 weight once (perf feedback: hoist the cast out of the hot path).
    conv_w_bf16 = conv_w.astype(jnp.bfloat16)

    out = bn_relu_conv1x1_bn_relu(x, conv_w_bf16, gamma1, beta1, gamma2, beta2)
    jax.block_until_ready(out)
    assert out.shape == (N, Cout, H, W), out.shape

    # Correctness vs pure-JAX f32 reference (bf16 MXU matmul -> loose tolerance).
    ref = _reference(x, conv_w, gamma1, beta1, gamma2, beta2)
    err = float(jnp.max(jnp.abs(out - ref)))
    assert err < 5e-2, f"max abs err {err}"

    print("KERNEL_OK")
</pallas_src>

<mosaic_0001>
module attributes {stable_mosaic.version = 11 : i64} {
  func.func @kernel(%arg0: i32, %arg1: memref<320x256xf32, #tpu.memory_space<vmem>>, %arg2: memref<128x320xbf16, #tpu.memory_space<vmem>>, %arg3: memref<320x2xf32, #tpu.memory_space<vmem>>, %arg4: memref<128x2xf32, #tpu.memory_space<vmem>>, %arg5: memref<128x256xf32, #tpu.memory_space<vmem>>) attributes {dimension_semantics = [#tpu.dimension_semantics<arbitrary>], iteration_bounds = array<i64: 1>, scalar_prefetch = 0 : i64, scratch_operands = 0 : i64, tpu.core_type = #tpu.core_type<tc>, window_params = [{pipeline_mode = #tpu.pipeline_mode<synchronous>, transform_indices = @transform_0, window_bounds = array<i64: 320, 256>}, {pipeline_mode = #tpu.pipeline_mode<synchronous>, transform_indices = @transform_1, window_bounds = array<i64: 128, 320>}, {pipeline_mode = #tpu.pipeline_mode<synchronous>, transform_indices = @transform_2, window_bounds = array<i64: 320, 2>}, {pipeline_mode = #tpu.pipeline_mode<synchronous>, transform_indices = @transform_3, window_bounds = array<i64: 128, 2>}, {pipeline_mode = #tpu.pipeline_mode<synchronous>, transform_indices = @transform_4, window_bounds = array<i64: 128, 256>}]} {
    %c0 = arith.constant 0 : index
    %c0_0 = arith.constant 0 : index
    %0 = vector.load %arg1[%c0, %c0_0] : memref<320x256xf32, #tpu.memory_space<vmem>>, vector<320x256xf32>
    %cst = arith.constant 1.000000e+00 : f32
    %1 = vector.broadcast %cst : f32 to vector<256x1xf32>
    %cst_1 = arith.constant dense<0.000000e+00> : vector<320x1xf32>
    %2 = tpu.matmul %0, %1, %cst_1 {dimension_numbers = #tpu.dot_dimension_numbers<[1], [0], [0], [1], [0, 0, 1, 1], [], []>} : vector<320x256xf32>, vector<256x1xf32>, vector<320x1xf32> -> vector<320x1xf32>
    %3 = arith.mulf %0, %0 : vector<320x256xf32>
    %cst_2 = arith.constant dense<0.000000e+00> : vector<320xf32>
    %4 = vector.multi_reduction <add>, %3, %cst_2 [1] : vector<320x256xf32> to vector<320xf32>
    %5 = vector.shape_cast %4 : vector<320xf32> to vector<320x1xf32>
    %cst_3 = arith.constant 0.00510204071 : f32
    %6 = vector.broadcast %cst_3 : f32 to vector<320x1xf32>
    %7 = arith.mulf %2, %6 : vector<320x1xf32>
    %cst_4 = arith.constant 0.00510204071 : f32
    %8 = vector.broadcast %cst_4 : f32 to vector<320x1xf32>
    %9 = arith.mulf %5, %8 : vector<320x1xf32>
    %10 = arith.mulf %7, %7 : vector<320x1xf32>
    %11 = arith.subf %9, %10 : vector<320x1xf32>
    %cst_5 = arith.constant 0.000000e+00 : f32
    %12 = vector.broadcast %cst_5 : f32 to vector<320x1xf32>
    %13 = arith.maximumf %11, %12 : vector<320x1xf32>
    %c0_6 = arith.constant 0 : index
    %c0_7 = arith.constant 0 : index
    %14 = vector.load %arg3[%c0_6, %c0_7] : memref<320x2xf32, #tpu.memory_space<vmem>>, vector<320x1xf32>
    %cst_8 = arith.constant 9.99999974E-6 : f32
    %15 = vector.broadcast %cst_8 : f32 to vector<320x1xf32>
    %16 = arith.addf %13, %15 : vector<320x1xf32>
    %17 = math.rsqrt %16 : vector<320x1xf32>
    %18 = arith.mulf %14, %17 : vector<320x1xf32>
    %c0_9 = arith.constant 0 : index
    %c1 = arith.constant 1 : index
    %19 = vector.load %arg3[%c0_9, %c1] : memref<320x2xf32, #tpu.memory_space<vmem>>, vector<320x1xf32>
    %20 = arith.mulf %7, %18 : vector<320x1xf32>
    %21 = arith.subf %19, %20 : vector<320x1xf32>
    %22 = tpu.iota {dimensions = array<i32: 1>} : vector<320x256xi32>
    %c196_i32 = arith.constant 196 : i32
    %23 = vector.broadcast %c196_i32 : i32 to vector<320x256xi32>
    %24 = arith.cmpi slt, %22, %23 : vector<320x256xi32>
    %25 = vector.broadcast %18 : vector<320x1xf32> to vector<320x256xf32>
    %26 = arith.mulf %0, %25 : vector<320x256xf32>
    %27 = vector.broadcast %21 : vector<320x1xf32> to vector<320x256xf32>
    %28 = arith.addf %26, %27 : vector<320x256xf32>
    %cst_10 = arith.constant 0.000000e+00 : f32
    %29 = vector.broadcast %cst_10 : f32 to vector<320x256xf32>
    %30 = arith.maximumf %28, %29 : vector<320x256xf32>
    %cst_11 = arith.constant 0.000000e+00 : f32
    %31 = vector.broadcast %cst_11 : f32 to vector<320x256xf32>
    %32 = arith.select %24, %30, %31 : vector<320x256xi1>, vector<320x256xf32>
    %33 = arith.truncf %32 : vector<320x256xf32> to vector<320x256xbf16>
    %c0_12 = arith.constant 0 : index
    %c0_13 = arith.constant 0 : index
    %34 = vector.load %arg2[%c0_12, %c0_13] : memref<128x320xbf16, #tpu.memory_space<vmem>>, vector<128x320xbf16>
    %cst_14 = arith.constant dense<0.000000e+00> : vector<128x256xf32>
    %35 = tpu.matmul %34, %33, %cst_14 {dimension_numbers = #tpu.dot_dimension_numbers<[1], [0], [0], [1], [0, 0, 1, 1], [], []>} : vector<128x320xbf16>, vector<320x256xbf16>, vector<128x256xf32> -> vector<128x256xf32>
    %cst_15 = arith.constant dense<0.000000e+00> : vector<128x1xf32>
    %36 = tpu.matmul %35, %1, %cst_15 {dimension_numbers = #tpu.dot_dimension_numbers<[1], [0], [0], [1], [0, 0, 1, 1], [], []>} : vector<128x256xf32>, vector<256x1xf32>, vector<128x1xf32> -> vector<128x1xf32>
    %37 = arith.mulf %35, %35 : vector<128x256xf32>
    %cst_16 = arith.constant dense<0.000000e+00> : vector<128xf32>
    %38 = vector.multi_reduction <add>, %37, %cst_16 [1] : vector<128x256xf32> to vector<128xf32>
    %39 = vector.shape_cast %38 : vector<128xf32> to vector<128x1xf32>
    %cst_17 = arith.constant 0.00510204071 : f32
    %40 = vector.broadcast %cst_17 : f32 to vector<128x1xf32>
    %41 = arith.mulf %36, %40 : vector<128x1xf32>
    %cst_18 = arith.constant 0.00510204071 : f32
    %42 = vector.broadcast %cst_18 : f32 to vector<128x1xf32>
    %43 = arith.mulf %39, %42 : vector<128x1xf32>
    %44 = arith.mulf %41, %41 : vector<128x1xf32>
    %45 = arith.subf %43, %44 : vector<128x1xf32>
    %cst_19 = arith.constant 0.000000e+00 : f32
    %46 = vector.broadcast %cst_19 : f32 to vector<128x1xf32>
    %47 = arith.maximumf %45, %46 : vector<128x1xf32>
    %c0_20 = arith.constant 0 : index
    %c0_21 = arith.constant 0 : index
    %48 = vector.load %arg4[%c0_20, %c0_21] : memref<128x2xf32, #tpu.memory_space<vmem>>, vector<128x1xf32>
    %cst_22 = arith.constant 9.99999974E-6 : f32
    %49 = vector.broadcast %cst_22 : f32 to vector<128x1xf32>
    %50 = arith.addf %47, %49 : vector<128x1xf32>
    %51 = math.rsqrt %50 : vector<128x1xf32>
    %52 = arith.mulf %48, %51 : vector<128x1xf32>
    %c0_23 = arith.constant 0 : index
    %c1_24 = arith.constant 1 : index
    %53 = vector.load %arg4[%c0_23, %c1_24] : memref<128x2xf32, #tpu.memory_space<vmem>>, vector<128x1xf32>
    %54 = arith.mulf %41, %52 : vector<128x1xf32>
    %55 = arith.subf %53, %54 : vector<128x1xf32>
    %56 = vector.broadcast %52 : vector<128x1xf32> to vector<128x256xf32>
    %57 = arith.mulf %35, %56 : vector<128x256xf32>
    %58 = vector.broadcast %55 : vector<128x1xf32> to vector<128x256xf32>
    %59 = arith.addf %57, %58 : vector<128x256xf32>
    %cst_25 = arith.constant 0.000000e+00 : f32
    %60 = vector.broadcast %cst_25 : f32 to vector<128x256xf32>
    %61 = arith.maximumf %59, %60 : vector<128x256xf32>
    %c0_26 = arith.constant 0 : index
    %c0_27 = arith.constant 0 : index
    %62 = vector.load %arg5[%c0_26, %c0_27] : memref<128x256xf32, #tpu.memory_space<vmem>>, vector<128x256xf32>
    tpu.vector_store %arg5[%c0_26, %c0_27], %61 {strides = array<i32>} : memref<128x256xf32, #tpu.memory_space<vmem>>, vector<128x256xf32>,
    return
  }
  func.func @transform_0(%arg0: i32) -> (i32, i32) {
    %c0_i32 = arith.constant 0 : i32
    %c0_i32_0 = arith.constant 0 : i32
    %c0_i32_1 = arith.constant 0 : i32
    return %c0_i32, %c0_i32_0 : i32, i32
  }
  func.func @transform_1(%arg0: i32) -> (i32, i32) {
    %c0_i32 = arith.constant 0 : i32
    %c0_i32_0 = arith.constant 0 : i32
    %c0_i32_1 = arith.constant 0 : i32
    return %c0_i32, %c0_i32_0 : i32, i32
  }
  func.func @transform_2(%arg0: i32) -> (i32, i32) {
    %c0_i32 = arith.constant 0 : i32
    %c0_i32_0 = arith.constant 0 : i32
    %c0_i32_1 = arith.constant 0 : i32
    return %c0_i32, %c0_i32_0 : i32, i32
  }
  func.func @transform_3(%arg0: i32) -> (i32, i32) {
    %c0_i32 = arith.constant 0 : i32
    %c0_i32_0 = arith.constant 0 : i32
    %c0_i32_1 = arith.constant 0 : i32
    return %c0_i32, %c0_i32_0 : i32, i32
  }
  func.func @transform_4(%arg0: i32) -> (i32, i32) {
    %c0_i32 = arith.constant 0 : i32
    %c0_i32_0 = arith.constant 0 : i32
    %c0_i32_1 = arith.constant 0 : i32
    return %c0_i32, %c0_i32_0 : i32, i32
  }
}

</mosaic_0001>

<bundles_post_ra>
// kernel: bn_relu_conv1x1_bn_relu.1
= control target key start
LH: loop header
LB: loop body
LE: loop exit
PB: predicated region body
PF: predicated region fallthrough
CT: control target
= control target key end

     0   :  { %v4129_v0 = vmov 1.0   ;;  %s4131_s21 = smov 1   ;;  %s7267_s0 = inlined_call_operand.vmem [shape: f32[320,256], index: 0, kind: input, shape index: {}]   ;;  %s7268_s2 = inlined_call_operand.vmem [shape: f32[320,2], index: 2, kind: input, shape index: {}]   ;;  %s7269_s1 = inlined_call_operand.vmem [shape: bf16[128,320], index: 1, kind: input, shape index: {}]   ;;  %s7270_s3 = inlined_call_operand.vmem [shape: f32[128,2], index: 3, kind: input, shape index: {}]   ;;  %s7271_s4 = inlined_call_operand.vmem [shape: f32[128,256], index: 4, kind: output, shape index: {}]  }
   0x1   :  { %98 = vmatpush.msra.mxu0 %v4129_v0  ;;  %235 = vmatpush.msra.mxu1 %v4129_v0  ;;  %v4175_v1 = vld [vmem:[%s7267_s0] sm:$0xff]  ;;  %v4180_v2 = vld [vmem:[%s7267_s0 + $0x8] sm:$0xff]  ;;  %v4204_v6 = vld [vmem:[%s7267_s0 + $0x10] sm:$0xff] }
   0x2   :  { %3850 = vmatpush.msra.mxu2 %v4129_v0  ;;  %3866 = vmatpush.msra.mxu3 %v4129_v0  ;;  %v372_v3 = vmul.f32 %v4175_v1, %v4175_v1  ;;  %v373_v4 = vmul.f32 %v4180_v2, %v4180_v2  ;;  %v4209_v7 = vld [vmem:[%s7267_s0 + $0x18] sm:$0xff]  ;;  %v374_v8 = vmul.f32 %v4204_v6, %v4204_v6  ;;  %v22_v11 = vld [vmem:[%s7267_s0 + $0x20] sm:$0xff]  ;;  %v23_v12 = vld [vmem:[%s7267_s0 + $0x28] sm:$0xff] }
   0x3   :  { %99 = vmatpush.msra.mxu0 %v4129_v0  ;;  %236 = vmatpush.msra.mxu1 %v4129_v0  ;;  %v375_v9 = vmul.f32 %v4209_v7, %v4209_v7  ;;  %v376_v13 = vmul.f32 %v22_v11, %v22_v11  ;;  %v377_v14 = vmul.f32 %v23_v12, %v23_v12  ;;  %v24_v16 = vld [vmem:[%s7267_s0 + $0x30] sm:$0xff]  ;;  %v25_v17 = vld [vmem:[%s7267_s0 + $0x38] sm:$0xff]  ;;  %v4260_v18 = vld [vmem:[%s7267_s0 + $0x40] sm:$0xff] }
   0x4   :  { %3851 = vmatpush.msra.mxu2 %v4129_v0  ;;  %3867 = vmatpush.msra.mxu3 %v4129_v0  ;;  %v452_v5 = vadd.f32 %v373_v4, %v372_v3  ;;  %v4267_v19 = vld [vmem:[%s7267_s0 + $0x48] sm:$0xff]  ;;  %v378_v20 = vmul.f32 %v24_v16, %v24_v16  ;;  %v379_v21 = vmul.f32 %v25_v17, %v25_v17  ;;  %v4286_v26 = vld [vmem:[%s7267_s0 + $0x50] sm:$0xff]  ;;  %v4291_v27 = vld [vmem:[%s7267_s0 + $0x58] sm:$0xff] }
   0x5   :  { %100 = vmatpush.msra.mxu0 %v4129_v0  ;;  %237 = vmatpush.msra.mxu1 %v4129_v0  ;;  %v455_v10 = vadd.f32 %v375_v9, %v374_v8  ;;  %v458_v15 = vadd.f32 %v377_v14, %v376_v13  ;;  %v380_v22 = vmul.f32 %v4260_v18, %v4260_v18  ;;  %v4309_v31 = vld [vmem:[%s7267_s0 + $0x80] sm:$0xff]  ;;  %v4314_v32 = vld [vmem:[%s7267_s0 + $0x88] sm:$0xff]  ;;  %v4319_v33 = vld [vmem:[%s7267_s0 + $0x70] sm:$0xff] }
   0x6   :  { %3852 = vmatpush.msra.mxu2 %v4129_v0  ;;  %3868 = vmatpush.msra.mxu3 %v4129_v0  ;;  %v381_v23 = vmul.f32 %v4267_v19, %v4267_v19  ;;  %v461_v24 = vadd.f32 %v379_v21, %v378_v20  ;;  %v382_v28 = vmul.f32 %v4286_v26, %v4286_v26  ;;  %v4328_v36 = vld [vmem:[%s7267_s0 + $0x78] sm:$0xff]  ;;  %v4343_v41 = vld [vmem:[%s7267_s0 + $0x60] sm:$0xff]  ;;  %v4348_v42 = vld [vmem:[%s7267_s0 + $0x68] sm:$0xff] }
   0x7   :  { %101 = vmatpush.msra.mxu0 %v4129_v0  ;;  %238 = vmatpush.msra.mxu1 %v4129_v0  ;;  %v383_v29 = vmul.f32 %v4291_v27, %v4291_v27  ;;  %v388_v34 = vmul.f32 %v4309_v31, %v4309_v31  ;;  %v389_v35 = vmul.f32 %v4314_v32, %v4314_v32  ;;  %v4358_v45 = vld [vmem:[%s7267_s0 + $0xb0] sm:$0xff]  ;;  %v4363_v46 = vld [vmem:[%s7267_s0 + $0xb8] sm:$0xff]  ;;  %v4368_v47 = vld [vmem:[%s7267_s0 + $0xa0] sm:$0xff] }
   0x8   :  { %3853 = vmatpush.msra.mxu2 %v4129_v0  ;;  %3869 = vmatpush.msra.mxu3 %v4129_v0  ;;  %v464_v25 = vadd.f32 %v381_v23, %v380_v22  ;;  %v386_v37 = vmul.f32 %v4319_v33, %v4319_v33  ;;  %v387_v38 = vmul.f32 %v4328_v36, %v4328_v36  ;;  %v4377_v50 = vld [vmem:[%s7267_s0 + $0xa8] sm:$0xff]  ;;  %v4395_v56 = vld [vmem:[%s7267_s0 + $0xe0] sm:$0xff]  ;;  %v4405_v58 = vld [vmem:[%s7267_s0 + $0xd0] sm:$0xff] }
   0x9   :  { %102 = vmatpush.msra.mxu0 %v4129_v0  ;;  %239 = vmatpush.msra.mxu1 %v4129_v0  ;;  %v467_v30 = vadd.f32 %v383_v29, %v382_v28  ;;  %v476_v39 = vadd.f32 %v389_v35, %v388_v34  ;;  %v384_v43 = vmul.f32 %v4343_v41, %v4343_v41  ;;  %v4400_v57 = vld [vmem:[%s7267_s0 + $0xe8] sm:$0xff]  ;;  %v4414_v61 = vld [vmem:[%s7267_s0 + $0xd8] sm:$0xff]  ;;  %v4426_v3 = vld [vmem:[%s7267_s0 + $0x90] sm:$0xff] }
   0xa   :  { %3854 = vmatpush.msra.mxu2 %v4129_v0  ;;  %3870 = vmatpush.msra.mxu3 %v4129_v0  ;;  %v473_v40 = vadd.f32 %v387_v38, %v386_v37  ;;  %v385_v44 = vmul.f32 %v4348_v42, %v4348_v42  ;;  %v394_v48 = vmul.f32 %v4358_v45, %v4358_v45  ;;  %v4432_v4 = vld [vmem:[%s7267_s0 + $0x98] sm:$0xff]  ;;  %v4454_v9 = vld [vmem:[%s7267_s0 + $0x100] sm:$0xff]  ;;  %v4494_v22 = vld [vmem:[%s7267_s0 + $0x148] sm:$0xff] }
   0xb   :  { %103 = vmatpush.msra.mxu0 %v4129_v0  ;;  %240 = vmatpush.msra.mxu1 %v4129_v0  ;;  %v395_v49 = vmul.f32 %v4363_v46, %v4363_v46  ;;  %v392_v51 = vmul.f32 %v4368_v47, %v4368_v47  ;;  %v393_v53 = vmul.f32 %v4377_v50, %v4377_v50  ;;  %v4449_v8 = vld [vmem:[%s7267_s0 + $0x118] sm:$0xff]  ;;  %v4489_v21 = vld [vmem:[%s7267_s0 + $0x140] sm:$0xff]  ;;  %v4499_v23 = vld [vmem:[%s7267_s0 + $0x130] sm:$0xff] }
   0xc   :  { %453 = vadd.xlane.f32.xlu0 %v452_v5  ;;  %3855 = vmatpush.msra.mxu2 %v4129_v0  ;;  %v470_v52 = vadd.f32 %v385_v44, %v384_v43  ;;  %v400_v59 = vmul.f32 %v4395_v56, %v4395_v56  ;;  %v401_v60 = vmul.f32 %v4400_v57, %v4400_v57  ;;  %v4517_v35 = vld [vmem:[%s7267_s0 + $0xf0] sm:$0xff]  ;;  %v4522_v37 = vld [vmem:[%s7267_s0 + $0xf8] sm:$0xff]  ;;  %v4552_v43 = vld [vmem:[%s7267_s0 + $0x168] sm:$0xff] }
   0xd   :  { %104 = vmatpush.msra.mxu0 %v4129_v0  ;;  %241 = vmatpush.msra.mxu1 %v4129_v0  ;;  %v485_v54 = vadd.f32 %v395_v49, %v394_v48  ;;  %v482_v55 = vadd.f32 %v393_v53, %v392_v51  ;;  %v398_v62 = vmul.f32 %v4405_v58, %v4405_v58  ;;  %v4561_v53 = vld [vmem:[%s7267_s0 + $0x120] sm:$0xff] }
   0xe   :  { %3871 = vmatpush.msra.mxu3 %v4129_v0  ;;  %3856 = vmatpush.msra.mxu2 %v4129_v0  ;;  %v399_v63 = vmul.f32 %v4414_v61, %v4414_v61  ;;  %v390_v5 = vmul.f32 %v4426_v3, %v4426_v3  ;;  %v404_v13 = vmul.f32 %v4454_v9, %v4454_v9 }
   0xf   :  { %105 = vmatpush.msra.mxu0 %v4129_v0  ;;  %242 = vmatpush.msra.mxu1 %v4129_v0  ;;  %v402_v38 = vmul.f32 %v4517_v35, %v4517_v35  ;;  %v417_v49 = vmul.f32 %v4552_v43, %v4552_v43 }
  0x10   :  { %3872 = vmatpush.msra.mxu3 %v4129_v0  ;;  %3857 = vmatpush.msra.mxu2 %v4129_v0 }
  0x11   :  { %106 = vmatpush.msra.mxu0 %v4129_v0  ;;  %243 = vmatpush.msra.mxu1 %v4129_v0 }
  0x12   :  { %3873 = vmatpush.msra.mxu3 %v4129_v0  ;;  %3858 = vmatpush.msra.mxu2 %v4129_v0 }
  0x13   :  { %107 = vmatpush.msra.mxu0 %v4129_v0  ;;  %244 = vmatpush.msra.mxu1 %v4129_v0 }
  0x14   :  { %456 = vadd.xlane.f32.xlu0 %v455_v10  ;;  %3874 = vmatpush.msra.mxu3 %v4129_v0 }
  0x15   :  { %108 = vmatpush.msra.mxu0 %v4129_v0  ;;  %245 = vmatpush.msra.mxu1 %v4129_v0 }
  0x16   :  { %3859 = vmatpush.msra.mxu2 %v4129_v0  ;;  %3875 = vmatpush.msra.mxu3 %v4129_v0 }
  0x17   :  { %109 = vmatpush.msra.mxu0 %v4129_v0  ;;  %246 = vmatpush.msra.mxu1 %v4129_v0 }
  0x18   :  { %3860 = vmatpush.msra.mxu2 %v4129_v0  ;;  %3876 = vmatpush.msra.mxu3 %v4129_v0 }
  0x19   :  { %110 = vmatpush.msra.mxu0 %v4129_v0  ;;  %247 = vmatpush.msra.mxu1 %v4129_v0 }
  0x1a   :  { %3861 = vmatpush.msra.mxu2 %v4129_v0  ;;  %3877 = vmatpush.msra.mxu3 %v4129_v0 }
  0x1b   :  { %111 = vmatpush.msra.mxu0 %v4129_v0  ;;  %248 = vmatpush.msra.mxu1 %v4129_v0 }
  0x1c   :  { %459 = vadd.xlane.f32.xlu1 %v458_v15  ;;  %3862 = vmatpush.msra.mxu2 %v4129_v0 }
  0x1d   :  { %112 = vmatpush.msra.mxu0 %v4129_v0  ;;  %249 = vmatpush.msra.mxu1 %v4129_v0 }
  0x1e   :  { %3878 = vmatpush.msra.mxu3 %v4129_v0  ;;  %3863 = vmatpush.msra.mxu2 %v4129_v0 }
  0x1f   :  { %113 = vmatpush.msra.mxu0 %v4129_v0  ;;  %250 = vmatpush.msra.mxu1 %v4129_v0 }
  0x20   :  { %114 = vmatmul.f32.vlgmr.msra.gmra.mxu0 %v4175_v1  ;;  %251 = vmatmul.f32.vlgmr.msra.gmra.mxu1 %v4180_v2  ;;  %v494_v1 = vadd.f32 %v401_v60, %v400_v59  ;;  %v491_v2 = vadd.f32 %v399_v63, %v398_v62  ;;  %v4577_v60 = vld [vmem:[%s7267_s0 + $0x1a0] sm:$0xff]  ;;  %v4582_v62 = vld [vmem:[%s7267_s0 + $0x1a8] sm:$0xff] }
  0x21   :  { %3879 = vmatpush.msra.mxu3 %v4129_v0  ;;  %3864 = vmatpush.msra.mxu2 %v4129_v0  ;;  %v425_v63 = vmul.f32 %v4582_v62, %v4582_v62 }
  0x22   :  { %2768 = vmatpush.msrb.mxu0 %v4129_v0  ;;  %2833 = vmatpush.msrb.mxu1 %v4129_v0 }
  0x23   :  { %3880 = vmatpush.msra.mxu3 %v4129_v0  ;;  %3865 = vmatpush.msra.mxu2 %v4129_v0 }
  0x24   :  { %462 = vadd.xlane.f32.xlu1 %v461_v24  ;;  %2769 = vmatpush.msrb.mxu0 %v4129_v0  ;;  %v412_v24 = vmul.f32 %v4489_v21, %v4489_v21 }
  0x25   :  { %465 = vadd.xlane.f32.xlu2 %v464_v25  ;;  %3881 = vmatpush.msra.mxu3 %v4129_v0  ;;  %v413_v25 = vmul.f32 %v4494_v22, %v4494_v22 }
  0x26   :  { %2834 = vmatpush.msrb.mxu1 %v4129_v0  ;;  %2770 = vmatpush.msrb.mxu0 %v4129_v0 }
  0x27   :  { %471 = vadd.xlane.f32.xlu0 %v470_v52 }
  0x28   :  { %117 = vmatmul.f32.gmra.mxu0 %v4204_v6  ;;  %254 = vmatmul.f32.gmra.mxu1 %v4209_v7  ;;  %v391_v6 = vmul.f32 %v4432_v4, %v4432_v4  ;;  %v4444_v7 = vld [vmem:[%s7267_s0 + $0x110] sm:$0xff] }
  0x29   :  { %2835 = vmatpush.msrb.mxu1 %v4129_v0  ;;  %2771 = vmatpush.msrb.mxu0 %v4129_v0  ;;  %v406_v10 = vmul.f32 %v4444_v7, %v4444_v7 }
  0x2a   :  { %v479_v14 = vadd.f32 %v391_v6, %v390_v5 }
  0x2b   :  { %2836 = vmatpush.msrb.mxu1 %v4129_v0  ;;  %2772 = vmatpush.msrb.mxu0 %v4129_v0 }
  0x2c   :  { %474 = vadd.xlane.f32.xlu1 %v473_v40  ;;  %v4533_v40 = vld [vmem:[%s7267_s0 + $0x170] sm:$0xff] }
  0x2d   :  { %468 = vadd.xlane.f32.xlu2 %v467_v30  ;;  %2773 = vmatpush.msrb.mxu0 %v4129_v0  ;;  %v512_v30 = vadd.f32 %v413_v25, %v412_v24  ;;  %v4640_v24 = vld [vmem:[%s7267_s0 + $0x1c8] sm:$0xff] }
  0x2e   :  { %2837 = vmatpush.msrb.mxu1 %v4129_v0 }
  0x2f   :  { %2774 = vmatpush.msrb.mxu0 %v4129_v0  ;;  %480 = vadd.xlane.f32.xlu0 %v479_v14  ;;  %v4610_v14 = vld [vmem:[%s7267_s0 + $0x158] sm:$0xff] }
  0x30   :  { %120 = vmatmul.f32.gmra.mxu0 %v22_v11  ;;  %257 = vmatmul.f32.gmra.mxu1 %v23_v12  ;;  %v407_v11 = vmul.f32 %v4449_v8, %v4449_v8  ;;  %v4463_v12 = vld [vmem:[%s7267_s0 + $0x108] sm:$0xff] }
  0x31   :  { %2775 = vmatpush.msrb.mxu0 %v4129_v0  ;;  %2838 = vmatpush.msrb.mxu1 %v4129_v0  ;;  %v405_v15 = vmul.f32 %v4463_v12, %v4463_v12 }
  0x33   :  { %2776 = vmatpush.msrb.mxu0 %v4129_v0  ;;  %2839 = vmatpush.msrb.mxu1 %v4129_v0 }
  0x34   :  { %483 = vadd.xlane.f32.xlu1 %v482_v55  ;;  %v408_v55 = vmul.f32 %v4561_v53, %v4561_v53 }
  0x35   :  { %477 = vadd.xlane.f32.xlu2 %v476_v39  ;;  %2777 = vmatpush.msrb.mxu0 %v4129_v0  ;;  %v403_v39 = vmul.f32 %v4522_v37, %v4522_v37 }
  0x36   :  { %2840 = vmatpush.msrb.mxu1 %v4129_v0 }
  0x37   :  { %2778 = vmatpush.msrb.mxu0 %v4129_v0  ;;  %v497_v48 = vadd.f32 %v403_v39, %v402_v38  ;;  %v4654_v38 = vld [vmem:[%s7267_s0 + $0x188] sm:$0xff] }
  0x38   :  { %123 = vmatmul.f32.gmra.mxu0 %v24_v16  ;;  %260 = vmatmul.f32.gmra.mxu1 %v25_v17  ;;  %v503_v16 = vadd.f32 %v407_v11, %v406_v10  ;;  %v500_v17 = vadd.f32 %v405_v15, %v404_v13  ;;  %v4605_v13 = vld [vmem:[%s7267_s0 + $0x150] sm:$0xff] }
  0x39   :  { %2779 = vmatpush.msrb.mxu0 %v4129_v0  ;;  %2841 = vmatpush.msrb.mxu1 %v4129_v0  ;;  %v414_v15 = vmul.f32 %v4605_v13, %v4605_v13 }
  0x3b   :  { %2780 = vmatpush.msrb.mxu0 %v4129_v0  ;;  %2842 = vmatpush.msrb.mxu1 %v4129_v0 }
  0x3c   :  { %492 = vadd.xlane.f32.xlu1 %v491_v2 }
  0x3d   :  { %486 = vadd.xlane.f32.xlu2 %v485_v54  ;;  %2781 = vmatpush.msrb.mxu0 %v4129_v0  ;;  %v4566_v54 = vld [vmem:[%s7267_s0 + $0x128] sm:$0xff] }
  0x3e   :  { %2843 = vmatpush.msrb.mxu1 %v4129_v0  ;;  %v409_v59 = vmul.f32 %v4566_v54, %v4566_v54 }
  0x3f   :  { %2782 = vmatpush.msrb.mxu0 %v4129_v0 }
  0x40   :  { %126 = vmatmul.f32.gmra.mxu0 %v4260_v18  ;;  %263 = vmatmul.f32.gmra.mxu1 %v4267_v19  ;;  %v4473_v18 = vld [vmem:[%s7267_s0 + $0xc0] sm:$0xff]  ;;  %v4478_v19 = vld [vmem:[%s7267_s0 + $0xc8] sm:$0xff]  ;;  %v506_v5 = vadd.f32 %v409_v59, %v408_v55 }
  0x41   :  { %2783 = vmatpush.msrb.mxu0 %v4129_v0  ;;  %2844 = vmatpush.msrb.mxu1 %v4129_v0  ;;  %v397_v20 = vmul.f32 %v4478_v19, %v4478_v19 }
  0x43   :  { %2845 = vmatpush.msrb.mxu1 %v4129_v0 }
  0x44   :  { %501 = vadd.xlane.f32.xlu1 %v500_v17  ;;  %v4621_v17 = vld [vmem:[%s7267_s0 + $0x1e0] sm:$0xff] }
  0x45   :  { %495 = vadd.xlane.f32.xlu2 %v494_v1  ;;  %2846 = vmatpush.msrb.mxu1 %v4129_v0  ;;  %v4596_v1 = vld [vmem:[%s7267_s0 + $0x198] sm:$0xff] }
  0x46   :  { %v423_v6 = vmul.f32 %v4596_v1, %v4596_v1 }
  0x47   :  { %2847 = vmatpush.msrb.mxu1 %v4129_v0 }
  0x48   :  { %129 = vmatmul.f32.gmra.mxu0 %v4286_v26  ;;  %266 = vmatmul.f32.gmra.mxu1 %v4291_v27  ;;  %v4508_v26 = vld [vmem:[%s7267_s0 + $0x138] sm:$0xff]  ;;  %v410_v27 = vmul.f32 %v4499_v23, %v4499_v23 }
  0x49   :  { %2848 = vmatpush.msrb.mxu1 %v4129_v0  ;;  %v396_v0 = vmul.f32 %v4473_v18, %v4473_v18  ;;  %v411_v29 = vmul.f32 %v4508_v26, %v4508_v26 }
  0x4b   :  { %v488_v28 = vadd.f32 %v397_v20, %v396_v0  ;;  %v509_v34 = vadd.f32 %v411_v29, %v410_v27  ;;  %v4626_v0 = vld [vmem:[%s7267_s0 + $0x1e8] sm:$0xff] }
  0x4c   :  { %v433_v20 = vmul.f32 %v4626_v0, %v4626_v0 }
  0x4d   :  { %504 = vadd.xlane.f32.xlu2 %v503_v16  ;;  %489 = vadd.xlane.f32.xlu0 %v488_v28  ;;  %v415_v16 = vmul.f32 %v4610_v14, %v4610_v14  ;;  %v429_v28 = vmul.f32 %v4640_v24, %v4640_v24 }
  0x4e   :  { %510 = vadd.xlane.f32.xlu1 %v509_v34  ;;  %v4649_v34 = vld [vmem:[%s7267_s0 + $0x180] sm:$0xff] }
  0x4f   :  { %v515_v27 = vadd.f32 %v415_v16, %v414_v15  ;;  %v420_v39 = vmul.f32 %v4649_v34, %v4649_v34  ;;  %v86_v16 = vld [vmem:[%s7267_s0 + $0x220] sm:$0xff] }
  0x50   :  { %132 = vmatmul.f32.gmra.mxu0 %v4343_v41  ;;  %269 = vmatmul.f32.gmra.mxu1 %v4348_v42  ;;  %v4538_v41 = vld [vmem:[%s7267_s0 + $0x178] sm:$0xff] }
  0x51   :  { %v419_v42 = vmul.f32 %v4538_v41, %v4538_v41 }
  0x55   :  { %513 = vadd.xlane.f32.xlu2 %v512_v30  ;;  %498 = vadd.xlane.f32.xlu0 %v497_v48 }
  0x58   :  { %135 = vmatmul.f32.gmra.mxu0 %v4319_v33  ;;  %272 = vmatmul.f32.gmra.mxu1 %v4328_v36  ;;  %v4543_v33 = vld [vmem:[%s7267_s0 + $0x160] sm:$0xff]  ;;  %v418_v36 = vmul.f32 %v4533_v40, %v4533_v40 }
  0x59   :  { %v416_v44 = vmul.f32 %v4543_v33, %v4543_v33 }
  0x5a   :  { %v521_v51 = vadd.f32 %v419_v42, %v418_v36  ;;  %v421_v36 = vmul.f32 %v4654_v38, %v4654_v38  ;;  %v82_v42 = vld [vmem:[%s7267_s0 + $0x200] sm:$0xff] }
  0x5b   :  { %v518_v52 = vadd.f32 %v417_v49, %v416_v44  ;;  %v83_v44 = vld [vmem:[%s7267_s0 + $0x208] sm:$0xff]  ;;  %v4676_v49 = vld [vmem:[%s7267_s0 + $0x1d8] sm:$0xff] }
  0x5c   :  { %v437_v48 = vmul.f32 %v83_v44, %v83_v44  ;;  %v431_v55 = vmul.f32 %v4676_v49, %v4676_v49 }
  0x5d   :  { %522 = vadd.xlane.f32.xlu2 %v521_v51  ;;  %519 = vadd.xlane.f32.xlu1 %v518_v52  ;;  %v524_v52 = vadd.f32 %v421_v36, %v420_v39  ;;  %v4719_v39 = vld [vmem:[%s7267_s0 + $0x1f0] sm:$0xff]  ;;  %v4724_v36 = vld [vmem:[%s7267_s0 + $0x1f8] sm:$0xff] }
  0x5e   :  { %507 = vadd.xlane.f32.xlu0 %v506_v5  ;;  %v90_v5 = vld [vmem:[%s7267_s0 + $0x240] sm:$0xff]  ;;  %v435_v44 = vmul.f32 %v4724_v36, %v4724_v36 }
  0x5f   :  { %222 = vmatmul.f32.vlgmr.msra.gmra.mxu2 %v90_v5 }
  0x60   :  { %138 = vmatmul.f32.gmra.mxu0 %v4309_v31  ;;  %275 = vmatmul.f32.gmra.mxu1 %v4314_v32  ;;  %v4587_v31 = vld [vmem:[%s7267_s0 + $0x190] sm:$0xff]  ;;  %v424_v32 = vmul.f32 %v4577_v60, %v4577_v60 }
  0x61   :  { %v422_v2 = vmul.f32 %v4587_v31, %v4587_v31 }
  0x62   :  { %v530_v10 = vadd.f32 %v425_v63, %v424_v32  ;;  %v4685_v63 = vld [vmem:[%s7267_s0 + $0x1b0] sm:$0xff] }
  0x63   :  { %v527_v11 = vadd.f32 %v423_v6, %v422_v2  ;;  %v4690_v2 = vld [vmem:[%s7267_s0 + $0x1b8] sm:$0xff]  ;;  %v91_v6 = vld [vmem:[%s7267_s0 + $0x248] sm:$0xff] }
  0x64   :  { %359 = vmatmul.f32.vlgmr.msra.gmra.mxu3 %v91_v6 }
  0x65   :  { %531 = vadd.xlane.f32.xlu2 %v530_v10  ;;  %528 = vadd.xlane.f32.xlu1 %v527_v11  ;;  %v426_v10 = vmul.f32 %v4685_v63, %v4685_v63  ;;  %v427_v11 = vmul.f32 %v4690_v2, %v4690_v2 }
  0x66   :  { %516 = vadd.xlane.f32.xlu0 %v515_v27  ;;  %v440_v27 = vmul.f32 %v86_v16, %v86_v16 }
  0x67   :  { %v533_v15 = vadd.f32 %v427_v11, %v426_v10 }
  0x68   :  { %141 = vmatmul.f32.gmra.mxu0 %v4426_v3  ;;  %278 = vmatmul.f32.gmra.mxu1 %v4432_v4  ;;  %v4631_v3 = vld [vmem:[%s7267_s0 + $0x1c0] sm:$0xff]  ;;  %v432_v4 = vmul.f32 %v4621_v17, %v4621_v17 }
  0x69   :  { %v428_v25 = vmul.f32 %v4631_v3, %v4631_v3 }
  0x6a   :  { %v542_v29 = vadd.f32 %v433_v20, %v432_v4 }
  0x6b   :  { %v536_v30 = vadd.f32 %v429_v28, %v428_v25  ;;  %v87_v25 = vld [vmem:[%s7267_s0 + $0x228] sm:$0xff] }
  0x6c   :  { %v441_v28 = vmul.f32 %v87_v25, %v87_v25 }
  0x6d   :  { %543 = vadd.xlane.f32.xlu2 %v542_v29  ;;  %537 = vadd.xlane.f32.xlu1 %v536_v30 }
  0x6e   :  { %525 = vadd.xlane.f32.xlu0 %v524_v52  ;;  %v554_v30 = vadd.f32 %v441_v28, %v440_v27  ;;  %v97_v27 = vld [vmem:[%s7267_s0 + $0x278] sm:$0xff] }
  0x70   :  { %144 = vmatmul.f32.gmra.mxu0 %v4368_v47  ;;  %281 = vmatmul.f32.gmra.mxu1 %v4377_v50  ;;  %v4671_v47 = vld [vmem:[%s7267_s0 + $0x1d0] sm:$0xff]  ;;  %v436_v50 = vmul.f32 %v82_v42, %v82_v42  ;;  %v434_v42 = vmul.f32 %v4719_v39, %v4719_v39 }
  0x71   :  { %v430_v51 = vmul.f32 %v4671_v47, %v4671_v47 }
  0x72   :  { %v548_v59 = vadd.f32 %v437_v48, %v436_v50  ;;  %v92_v50 = vld [vmem:[%s7267_s0 + $0x250] sm:$0xff]  ;;  %v93_v48 = vld [vmem:[%s7267_s0 + $0x258] sm:$0xff] }
  0x73   :  { %v539_v32 = vadd.f32 %v431_v55, %v430_v51  ;;  %v545_v51 = vadd.f32 %v435_v44, %v434_v42  ;;  %225 = vmatmul.f32.gmra.mxu2 %v92_v50  ;;  %362 = vmatmul.f32.gmra.mxu3 %v93_v48  ;;  %v446_v55 = vmul.f32 %v92_v50, %v92_v50 }
  0x75   :  { %549 = vadd.xlane.f32.xlu2 %v548_v59  ;;  %540 = vadd.xlane.f32.xlu1 %v539_v32  ;;  %v447_v59 = vmul.f32 %v93_v48, %v93_v48 }
  0x76   :  { %534 = vadd.xlane.f32.xlu0 %v533_v15  ;;  %v4747_v15 = vld [vmem:[%s7267_s0 + $0x210] sm:$0xff] }
  0x77   :  { %v563_v10 = vadd.f32 %v447_v59, %v446_v55 }
  0x78   :  { %147 = vmatmul.f32.gmra.mxu0 %v4358_v45  ;;  %284 = vmatmul.f32.gmra.mxu1 %v4363_v46  ;;  %v88_v45 = vld [vmem:[%s7267_s0 + $0x230] sm:$0xff]  ;;  %v89_v46 = vld [vmem:[%s7267_s0 + $0x238] sm:$0xff] }
  0x79   :  { %v442_v4 = vmul.f32 %v88_v45, %v88_v45  ;;  %v443_v20 = vmul.f32 %v89_v46, %v89_v46  ;;  %v4752_v45 = vld [vmem:[%s7267_s0 + $0x218] sm:$0xff]  ;;  %v438_v46 = vmul.f32 %v4747_v15, %v4747_v15 }
  0x7a   :  { %v439_v16 = vmul.f32 %v4752_v45, %v4752_v45 }
  0x7b   :  { %v557_v29 = vadd.f32 %v443_v20, %v442_v4  ;;  %v444_v20 = vmul.f32 %v90_v5, %v90_v5 }
  0x7c   :  { %v551_v4 = vadd.f32 %v439_v16, %v438_v46 }
  0x7d   :  { %558 = vadd.xlane.f32.xlu2 %v557_v29  ;;  %555 = vadd.xlane.f32.xlu1 %v554_v30 }
  0x7e   :  { %546 = vadd.xlane.f32.xlu0 %v545_v51 }
  0x7f   :  { %v454_v5 = vpop.xlane.xlu0 %453 }
  0x80   :  { %150 = vmatmul.f32.gmra.mxu0 %v4473_v18  ;;  %287 = vmatmul.f32.gmra.mxu1 %v4478_v19  ;;  %v94_v18 = vld [vmem:[%s7267_s0 + $0x260] sm:$0xff]  ;;  %v95_v19 = vld [vmem:[%s7267_s0 + $0x268] sm:$0xff]  ;;  %v612_v44 = vmul.f32 0.0051020407, %v454_v5 }
  0x81   :  { %v448_v52 = vmul.f32 %v94_v18, %v94_v18  ;;  %v449_v32 = vmul.f32 %v95_v19, %v95_v19  ;;  %228 = vmatmul.f32.gmra.mxu2 %v94_v18  ;;  %365 = vmatmul.f32.gmra.mxu3 %v95_v19 }
  0x83   :  { %v566_v11 = vadd.f32 %v449_v32, %v448_v52 }
  0x85   :  { %567 = vadd.xlane.f32.xlu2 %v566_v11  ;;  %564 = vadd.xlane.f32.xlu1 %v563_v10 }
  0x86   :  { %552 = vadd.xlane.f32.xlu0 %v551_v4  ;;  %v7274_v4 = vmov 0  }
  0x87   :  { %3886 = vset.pattern.permute.xlu1 %v7274_v4  ;;  %3887 = vset.pattern.permute.xlu2 %v7274_v4 }
  0x88   :  { %153 = vmatmul.f32.gmra.mxu0 %v4405_v58  ;;  %290 = vmatmul.f32.gmra.mxu1 %v4414_v61  ;;  %v445_v58 = vmul.f32 %v91_v6, %v91_v6  ;;  %v96_v61 = vld [vmem:[%s7267_s0 + $0x270] sm:$0xff] }
  0x89   :  { %231 = vmatmul.f32.gmra.mxu2 %v96_v61  ;;  %368 = vmatmul.f32.gmra.mxu3 %v97_v27 }
  0x8a   :  { %v560_v25 = vadd.f32 %v445_v58, %v444_v20  ;;  %3888 = vset.pattern.permute.xlu0 %v7274_v4 }
  0x8e   :  { %561 = vadd.xlane.f32.xlu0 %v560_v25 }
  0x8f   :  { %v460_v59 = vpop.xlane.xlu1 %459 }
  0x90   :  { %156 = vmatmul.f32.gmra.mxu0 %v4395_v56  ;;  %293 = vmatmul.f32.gmra.mxu1 %v4400_v57  ;;  %v450_v56 = vmul.f32 %v96_v61, %v96_v61  ;;  %v451_v57 = vmul.f32 %v97_v27, %v97_v27  ;;  %v614_v58 = vmul.f32 0.0051020407, %v460_v59 }
  0x92   :  { %v569_v6 = vadd.f32 %v451_v57, %v450_v56 }
  0x96   :  { %570 = vadd.xlane.f32.xlu0 %v569_v6 }
  0x97   :  { %v463_v57 = vpop.xlane.xlu1 %462 }
  0x98   :  { %159 = vmatmul.f32.gmra.mxu0 %v4517_v35  ;;  %296 = vmatmul.f32.gmra.mxu1 %v4522_v37  ;;  %v457_v37 = vpop.xlane.xlu0 %456 }
  0x9d   :  { %v115_v28 = vpop.f32.mrf.mxu0  ;;  %v252_v29 = vpop.f32.mrf.mxu1 }
  0x9e   :  { %v253_v30 = vadd.f32 %v252_v29, %v115_v28 }
  0xa0   :  { %v4770_v42 = vmul.f32 0.0051020407, %v253_v30  ;;  %162 = vmatmul.f32.gmra.mxu0 %v4454_v9  ;;  %299 = vmatmul.f32.gmra.mxu1 %v4463_v12  ;;  %v613_v9 = vmul.f32 0.0051020407, %v457_v37 }
  0xa2   :  { %v652_v35 = vmul.f32 %v4770_v42, %v4770_v42 }
  0xa4   :  { %v692_v50 = vsub.f32 %v612_v44, %v652_v35 }
  0xa5   :  { %v118_v48 = vpop.f32.mrf.mxu0  ;;  %v255_v51 = vpop.f32.mrf.mxu1 }
  0xa6   :  { %v732_v18 = vmax.f32 %v692_v50, 0.0  ;;  %v256_v19 = vadd.f32 %v255_v51, %v118_v48  ;;  %v615_v50 = vmul.f32 0.0051020407, %v463_v57  ;;  %v772_v48 = vld [vmem:[%s7268_s2] sm:$0xff] }
  0xa8   :  { %v812_v52 = vadd.f32 1e-05, %v732_v18  ;;  %v4776_v55 = vmul.f32 0.0051020407, %v256_v19  ;;  %165 = vmatmul.f32.gmra.mxu0 %v4444_v7  ;;  %302 = vmatmul.f32.gmra.mxu1 %v4449_v8 }
  0xaa   :  { %3922 = vrsqrt.f32 %v812_v52  ;;  %v653_v12 = vmul.f32 %v4776_v55, %v4776_v55  ;;  %vm858_vm1 = vweird.f32 %v812_v52 }
  0xac   :  { %v693_v32 = vsub.f32 %v613_v9, %v653_v12 }
  0xad   :  { %v121_v10 = vpop.f32.mrf.mxu0  ;;  %v258_v11 = vpop.f32.mrf.mxu1 }
  0xae   :  { %v733_v46 = vmax.f32 %v693_v32, 0.0  ;;  %v259_v16 = vadd.f32 %v258_v11, %v121_v10 }
  0xb0   :  { %v3923_v7 = vpop.eup %3922  ;;  %v813_v8 = vadd.f32 1e-05, %v733_v46  ;;  %v4785_v20 = vmul.f32 0.0051020407, %v259_v16  ;;  %168 = vmatmul.f32.gmra.mxu0 %v4561_v53  ;;  %305 = vmatmul.f32.gmra.mxu1 %v4566_v54 }
  0xb1   :  { %v853_v25 = vmul.f32 %v3923_v7, %v812_v52  ;;  %vm859_vm0 = vweird.f32 %v3923_v7 }
  0xb2   :  { %3924 = vrsqrt.f32 %v813_v8  ;;  %v654_v61 = vmul.f32 %v4785_v20, %v4785_v20  ;;  %vm860_vm2 = vmor %vm858_vm1, %vm859_vm0  ;;  %vm868_vm4 = vweird.f32 %v813_v8 }
  0xb3   :  { %v854_v27 = vmul.f32 %v3923_v7, %v853_v25 }
  0xb4   :  { %v694_v56 = vsub.f32 %v614_v58, %v654_v61 }
  0xb5   :  { %v855_v5 = vmul.f32 0.5, %v854_v27  ;;  %v124_v6 = vpop.f32.mrf.mxu0  ;;  %v261_v28 = vpop.f32.mrf.mxu1 }
  0xb6   :  { %v734_v29 = vmax.f32 %v694_v56, 0.0  ;;  %v262_v30 = vadd.f32 %v261_v28, %v124_v6 }
  0xb7   :  { %v856_v44 = vsub.f32 1.5, %v855_v5 }
  0xb8   :  { %v3925_v35 = vpop.eup %3924  ;;  %v4791_v53 = vadd.f32 1e-05, %v734_v29  ;;  %v4793_v54 = vmul.f32 0.0051020407, %v262_v30  ;;  %171 = vmatmul.f32.gmra.mxu0 %v4499_v23  ;;  %308 = vmatmul.f32.gmra.mxu1 %v4508_v26  ;;  %v466_v23 = vpop.xlane.xlu2 %465 }
  0xb9   :  { %v863_v37 = vmul.f32 %v3925_v35, %v813_v8  ;;  %v857_v51 = vmul.f32 %v3923_v7, %v856_v44  ;;  %vm869_vm3 = vweird.f32 %v3925_v35  ;;  %v616_v61 = vmul.f32 0.0051020407, %v466_v23 }
  0xba   :  { %3926 = vrsqrt.f32 %v4791_v53  ;;  %v655_v18 = vmul.f32 %v4793_v54, %v4793_v54  ;;  %vm870_vm5 = vmor %vm868_vm4, %vm869_vm3  ;;  %vm878_vm7 = vweird.f32 %v4791_v53 }
  0xbb   :  { %v864_v19 = vmul.f32 %v3925_v35, %v863_v37  ;;  %v861_v9 = vsel %vm860_vm2, %v3923_v7, %v857_v51 }
  0xbc   :  { %v695_v12 = vsub.f32 %v615_v50, %v655_v18  ;;  %v4803_v59 = vmul.f32 %v861_v9, %v772_v48 }
  0xbd   :  { %v865_v26 = vmul.f32 0.5, %v864_v19  ;;  %v127_v52 = vpop.f32.mrf.mxu0  ;;  %v264_v32 = vpop.f32.mrf.mxu1 }
  0xbe   :  { %v735_v10 = vmax.f32 %v695_v12, 0.0  ;;  %v265_v11 = vadd.f32 %v264_v32, %v127_v52  ;;  %v1292_v46 = vmul.f32 %v4803_v59, %v4770_v42  ;;  %v773_v42 = vld [vmem:[%s7268_s2 + $0x8] sm:$0xff]  ;;  %v472_v32 = vpop.xlane.xlu0 %471 }
  0xbf   :  { %v866_v16 = vsub.f32 1.5, %v865_v26 }
  0xc0   :  { %v3927_v58 = vpop.eup %3926  ;;  %v4807_v25 = vadd.f32 1e-05, %v735_v10  ;;  %v4809_v27 = vmul.f32 0.0051020407, %v265_v11  ;;  %174 = vmatmul.f32.gmra.mxu0 %v4489_v21  ;;  %311 = vmatmul.f32.gmra.mxu1 %v4494_v22  ;;  %v469_v37 = vpop.xlane.xlu2 %468 }
  0xc1   :  { %v873_v7 = vmul.f32 %v3927_v58, %v4791_v53  ;;  %1372 = vrot.lane.b32.xlu1 %v1292_v46, %s4131_s21  ;;  %v867_v56 = vmul.f32 %v3925_v35, %v866_v16  ;;  %vm879_vm6 = vweird.f32 %v3927_v58  ;;  %v617_v19 = vmul.f32 0.0051020407, %v469_v37 }
  0xc2   :  { %3928 = vrsqrt.f32 %v4807_v25  ;;  %v656_v57 = vmul.f32 %v4809_v27, %v4809_v27  ;;  %vm880_vm8 = vmor %vm878_vm7, %vm879_vm6  ;;  %vm888_vm10 = vweird.f32 %v4807_v25 }
  0xc3   :  { %v874_v21 = vmul.f32 %v3927_v58, %v873_v7  ;;  %v871_v22 = vsel %vm870_vm5, %v3925_v35, %v867_v56 }
  0xc4   :  { %v696_v8 = vsub.f32 %v616_v61, %v656_v57  ;;  %v4822_v5 = vmul.f32 %v871_v22, %v773_v42 }
  0xc5   :  { %v875_v6 = vmul.f32 0.5, %v874_v21  ;;  %v130_v28 = vpop.f32.mrf.mxu0  ;;  %v267_v29 = vpop.f32.mrf.mxu1 }
  0xc6   :  { %7308 = vst [vmem:[#allocation2_spill] sm:$0xff] %v4822_v5  ;;  %v736_v30 = vmax.f32 %v696_v8, 0.0  ;;  %v268_v44 = vadd.f32 %v267_v29, %v130_v28  ;;  %v1293_v50 = vmul.f32 %v4822_v5, %v4776_v55  ;;  %v774_v55 = vld [vmem:[%s7268_s2 + $0x10] sm:$0xff] }
  0xc7   :  { %v876_v48 = vsub.f32 1.5, %v875_v6 }
  0xc8   :  { %v3929_v51 = vpop.eup %3928  ;;  %v4826_v18 = vadd.f32 1e-05, %v736_v30  ;;  %v4828_v9 = vmul.f32 0.0051020407, %v268_v44  ;;  %177 = vmatmul.f32.gmra.mxu0 %v4605_v13  ;;  %314 = vmatmul.f32.gmra.mxu1 %v4610_v14  ;;  %v478_v8 = vpop.xlane.xlu2 %477 }
  0xc9   :  { %v883_v35 = vmul.f32 %v3929_v51, %v4807_v25  ;;  %1374 = vrot.lane.b32.xlu2 %v1293_v50, %s4131_s21  ;;  %v877_v12 = vmul.f32 %v3927_v58, %v876_v48  ;;  %vm889_vm9 = vweird.f32 %v3929_v51 }
  0xca   :  { %3930 = vrsqrt.f32 %v4826_v18  ;;  %v657_v23 = vmul.f32 %v4828_v9, %v4828_v9  ;;  %vm890_vm11 = vmor %vm888_vm10, %vm889_vm9  ;;  %vm898_vm13 = vweird.f32 %v4826_v18 }
  0xcb   :  { %v884_v13 = vmul.f32 %v3929_v51, %v883_v35  ;;  %v881_v26 = vsel %vm880_vm8, %v3927_v58, %v877_v12  ;;  %v618_v58 = vmul.f32 0.0051020407, %v472_v32 }
  0xcc   :  { %v697_v14 = vsub.f32 %v617_v19, %v657_v23  ;;  %v1254_v52 = vmul.f32 %v881_v26, %v774_v55 }
  0xcd   :  { %v885_v10 = vmul.f32 0.5, %v884_v13  ;;  %v133_v11 = vpop.f32.mrf.mxu0  ;;  %v270_v46 = vpop.f32.mrf.mxu1 }
  0xce   :  { %v737_v16 = vmax.f32 %v697_v14, 0.0  ;;  %v271_v61 = vadd.f32 %v270_v46, %v133_v11  ;;  %1549 = vperm.xlu1 %3886, %v1254_v52   ;;  %v1294_v7 = vmul.f32 %v1254_v52, %v4785_v20  ;;  %v775_v20 = vld [vmem:[%s7268_s2 + $0x18] sm:$0xff] }
  0xcf   :  { %v886_v53 = vsub.f32 1.5, %v885_v10 }
  0xd0   :  { %v3931_v42 = vpop.eup %3930  ;;  %v4842_v56 = vadd.f32 1e-05, %v737_v16  ;;  %v4844_v57 = vmul.f32 0.0051020407, %v271_v61  ;;  %180 = vmatmul.f32.gmra.mxu0 %v4543_v33  ;;  %317 = vmatmul.f32.gmra.mxu1 %v4552_v43  ;;  %v475_v43 = vpop.xlane.xlu1 %474 }
  0xd1   :  { %v893_v21 = vmul.f32 %v3931_v42, %v4826_v18  ;;  %1376 = vrot.lane.b32.xlu0 %v1294_v7, %s4131_s21  ;;  %v887_v22 = vmul.f32 %v3929_v51, %v886_v53  ;;  %vm899_vm12 = vweird.f32 %v3931_v42  ;;  %v4879_v52 = vpop.xlane.xlu2 %486 }
  0xd2   :  { %3932 = vrsqrt.f32 %v4842_v56  ;;  %v658_v33 = vmul.f32 %v4844_v57, %v4844_v57  ;;  %vm900_vm14 = vmor %vm898_vm13, %vm899_vm12  ;;  %vm908_vm0 = vweird.f32 %v4842_v56 }
  0xd3   :  { %v891_v6 = vsel %vm890_vm11, %v3929_v51, %v887_v22  ;;  %v894_v25 = vmul.f32 %v3931_v42, %v893_v21  ;;  %v619_v51 = vmul.f32 0.0051020407, %v475_v43 }
  0xd4   :  { %v698_v28 = vsub.f32 %v618_v58, %v658_v33  ;;  %v4858_v29 = vmul.f32 %v891_v6, %v775_v20  ;;  %v620_v20 = vmul.f32 0.0051020407, %v478_v8 }
  0xd5   :  { %v136_v30 = vpop.f32.mrf.mxu0  ;;  %v273_v44 = vpop.f32.mrf.mxu1  ;;  %v895_v50 = vmul.f32 0.5, %v894_v25 }
  0xd6   :  { %v738_v37 = vmax.f32 %v698_v28, 0.0  ;;  %v274_v48 = vadd.f32 %v273_v44, %v136_v30  ;;  %v1295_v19 = vmul.f32 %v4858_v29, %v4793_v54  ;;  %v4873_v54 = vld [vmem:[%s7268_s2 + $0x20] sm:$0xff]  ;;  %v481_v28 = vpop.xlane.xlu0 %480 }
  0xd7   :  { %v896_v35 = vsub.f32 1.5, %v895_v50 }
  0xd8   :  { %v3933_v55 = vpop.eup %3932  ;;  %v4862_v12 = vadd.f32 1e-05, %v738_v37  ;;  %v4864_v23 = vmul.f32 0.0051020407, %v274_v48  ;;  %183 = vmatmul.f32.gmra.mxu0 %v4533_v40  ;;  %320 = vmatmul.f32.gmra.mxu1 %v4538_v41  ;;  %v4882_v11 = vpop.xlane.xlu1 %483 }
  0xd9   :  { %v903_v13 = vmul.f32 %v3933_v55, %v4842_v56  ;;  %1378 = vrot.lane.b32.xlu2 %v1295_v19, %s4131_s21  ;;  %v897_v26 = vmul.f32 %v3931_v42, %v896_v35  ;;  %vm909_vm15 = vweird.f32 %v3933_v55  ;;  %v4904_v37 = vpop.xlane.xlu2 %495 }
  0xda   :  { %3934 = vrsqrt.f32 %v4862_v12  ;;  %v659_v40 = vmul.f32 %v4864_v23, %v4864_v23  ;;  %vm910_vm1 = vmor %vm908_vm0, %vm909_vm15  ;;  %vm918_vm3 = vweird.f32 %v4862_v12 }
  0xdb   :  { %v901_v41 = vsel %vm900_vm14, %v3931_v42, %v897_v26  ;;  %v904_v14 = vmul.f32 %v3933_v55, %v903_v13 }
  0xdc   :  { %v699_v32 = vsub.f32 %v619_v51, %v659_v40  ;;  %v1256_v10 = vmul.f32 %v901_v41, %v4873_v54  ;;  %v621_v40 = vmul.f32 0.0051020407, %v481_v28 }
  0xdd   :  { %v139_v46 = vpop.f32.mrf.mxu0  ;;  %v276_v16 = vpop.f32.mrf.mxu1  ;;  %v905_v61 = vmul.f32 0.5, %v904_v14 }
  0xde   :  { %v739_v7 = vmax.f32 %v699_v32, 0.0  ;;  %v277_v18 = vadd.f32 %v276_v16, %v139_v46  ;;  %v1296_v53 = vmul.f32 %v1256_v10, %v4809_v27  ;;  %v4896_v27 = vld [vmem:[%s7268_s2 + $0x28] sm:$0xff] }
  0xdf   :  { %v906_v58 = vsub.f32 1.5, %v905_v61 }
  0xe0   :  { %v3935_v21 = vpop.eup %3934  ;;  %v4885_v42 = vadd.f32 1e-05, %v739_v7  ;;  %v4887_v22 = vmul.f32 0.0051020407, %v277_v18  ;;  %186 = vmatmul.f32.gmra.mxu0 %v4649_v34  ;;  %323 = vmatmul.f32.gmra.mxu1 %v4654_v38  ;;  %v4907_v35 = vpop.xlane.xlu1 %492 }
  0xe1   :  { %v913_v33 = vmul.f32 %v3935_v21, %v4862_v12  ;;  %1559 = vperm.xlu2 %3887, %v1256_v10   ;;  %1380 = vrot.lane.b32.xlu1 %v1296_v53, %s4131_s21  ;;  %v907_v43 = vmul.f32 %v3933_v55, %v906_v58  ;;  %vm919_vm2 = vweird.f32 %v3935_v21  ;;  %v4929_v12 = vpop.xlane.xlu0 %489 }
  0xe2   :  { %3936 = vrsqrt.f32 %v4885_v42  ;;  %v660_v34 = vmul.f32 %v4887_v22, %v4887_v22  ;;  %vm920_vm4 = vmor %vm918_vm3, %vm919_vm2  ;;  %vm928_vm6 = vweird.f32 %v4885_v42 }
  0xe3   :  { %v914_v38 = vmul.f32 %v3935_v21, %v913_v33  ;;  %v911_v8 = vsel %vm910_vm1, %v3933_v55, %v907_v43  ;;  %v4931_v43 = vpop.xlane.xlu2 %504 }
  0xe4   :  { %v700_v6 = vsub.f32 %v620_v20, %v660_v34  ;;  %v1257_v25 = vmul.f32 %v911_v8, %v4896_v27  ;;  %v622_v34 = vmul.f32 0.0051020407, %v4882_v11 }
  0xe5   :  { %v915_v30 = vmul.f32 0.5, %v914_v38  ;;  %v142_v44 = vpop.f32.mrf.mxu0  ;;  %v279_v50 = vpop.f32.mrf.mxu1 }
  0xe6   :  { %v740_v48 = vmax.f32 %v700_v6, 0.0  ;;  %v280_v56 = vadd.f32 %v279_v50, %v142_v44  ;;  %v1297_v19 = vmul.f32 %v1257_v25, %v4828_v9  ;;  %v4920_v9 = vld [vmem:[%s7268_s2 + $0x30] sm:$0xff]  ;;  %v779_v6 = vld [vmem:[%s7268_s2 + $0x38] sm:$0xff] }
  0xe7   :  { %v916_v51 = vsub.f32 1.5, %v915_v30 }
  0xe8   :  { %v3937_v13 = vpop.eup %3936  ;;  %v4909_v26 = vadd.f32 1e-05, %v740_v48  ;;  %v4911_v55 = vmul.f32 0.0051020407, %v280_v56  ;;  %189 = vmatmul.f32.gmra.mxu0 %v4587_v31  ;;  %326 = vmatmul.f32.gmra.mxu1 %v4596_v1  ;;  %v4940_v8 = vpop.xlane.xlu1 %501 }
  0xe9   :  { %v923_v41 = vmul.f32 %v3937_v13, %v4885_v42  ;;  %1564 = vperm.xlu1 %3886, %v1257_v25   ;;  %1382 = vrot.lane.b32.xlu0 %v1297_v19, %s4131_s21  ;;  %v917_v14 = vmul.f32 %v3935_v21, %v916_v51  ;;  %vm929_vm5 = vweird.f32 %v3937_v13 }
  0xea   :  { %3938 = vrsqrt.f32 %v4909_v26  ;;  %v661_v31 = vmul.f32 %v4911_v55, %v4911_v55  ;;  %vm930_vm7 = vmor %vm928_vm6, %vm929_vm5  ;;  %vm938_vm9 = vweird.f32 %v4909_v26 }
  0xeb   :  { %v924_v1 = vmul.f32 %v3937_v13, %v923_v41  ;;  %v921_v32 = vsel %vm920_vm4, %v3935_v21, %v917_v14  ;;  %v623_v41 = vmul.f32 0.0051020407, %v4879_v52 }
  0xec   :  { %v701_v10 = vsub.f32 %v621_v40, %v661_v31  ;;  %v1258_v46 = vmul.f32 %v921_v32, %v4920_v9  ;;  %v4970_v32 = vpop.xlane.xlu2 %513 }
  0xed   :  { %v925_v16 = vmul.f32 0.5, %v924_v1  ;;  %v145_v61 = vpop.f32.mrf.mxu0  ;;  %v282_v7 = vpop.f32.mrf.mxu1 }
  0xee   :  { %v741_v18 = vmax.f32 %v701_v10, 0.0  ;;  %v283_v53 = vadd.f32 %v282_v7, %v145_v61  ;;  %v1298_v58 = vmul.f32 %v1258_v46, %v4844_v57 }
  0xef   :  { %v926_v20 = vsub.f32 1.5, %v925_v16 }
  0xf0   :  { %v3939_v33 = vpop.eup %3938  ;;  %v4934_v21 = vadd.f32 1e-05, %v741_v18  ;;  %v4936_v38 = vmul.f32 0.0051020407, %v283_v53  ;;  %192 = vmatmul.f32.gmra.mxu0 %v4577_v60  ;;  %329 = vmatmul.f32.gmra.mxu1 %v4582_v62 }
  0xf1   :  { %v933_v57 = vmul.f32 %v3939_v33, %v4909_v26  ;;  %1569 = vperm.xlu1 %3886, %v1258_v46   ;;  %1384 = vrot.lane.b32.xlu2 %v1298_v58, %s4131_s21  ;;  %v927_v11 = vmul.f32 %v3937_v13, %v926_v20  ;;  %vm939_vm8 = vweird.f32 %v3939_v33 }
  0xf2   :  { %3940 = vrsqrt.f32 %v4934_v21  ;;  %v662_v60 = vmul.f32 %v4936_v38, %v4936_v38  ;;  %vm940_vm10 = vmor %vm938_vm9, %vm939_vm8  ;;  %vm948_vm12 = vweird.f32 %v4934_v21 }
  0xf3   :  { %v931_v62 = vsel %vm930_vm7, %v3937_v13, %v927_v11  ;;  %v934_v25 = vmul.f32 %v3939_v33, %v933_v57  ;;  %v4960_v13 = vpop.xlane.xlu0 %498 }
  0xf4   :  { %v702_v28 = vsub.f32 %v622_v34, %v662_v60  ;;  %v1259_v30 = vmul.f32 %v931_v62, %v779_v6  ;;  %v624_v6 = vmul.f32 0.0051020407, %v4929_v12 }
  0xf5   :  { %v148_v44 = vpop.f32.mrf.mxu0  ;;  %v285_v50 = vpop.f32.mrf.mxu1  ;;  %v935_v48 = vmul.f32 0.5, %v934_v25 }
  0xf6   :  { %v742_v56 = vmax.f32 %v702_v28, 0.0  ;;  %v286_v19 = vadd.f32 %v285_v50, %v148_v44  ;;  %1574 = vperm.xlu0 %3888, %v1259_v30   ;;  %v1299_v51 = vmul.f32 %v1259_v30, %v4864_v23  ;;  %v4967_v23 = vld [vmem:[%s7268_s2 + $0x40] sm:$0xff]  ;;  %v5001_v28 = vpop.xlane.xlu2 %522 }
  0xf7   :  { %v936_v42 = vsub.f32 1.5, %v935_v48 }
  0xf8   :  { %v3941_v40 = vpop.eup %3940  ;;  %v4954_v14 = vadd.f32 1e-05, %v742_v56  ;;  %v4956_v31 = vmul.f32 0.0051020407, %v286_v19  ;;  %195 = vmatmul.f32.gmra.mxu0 %v4685_v63  ;;  %332 = vmatmul.f32.gmra.mxu1 %v4690_v2  ;;  %v4975_v2 = vpop.xlane.xlu1 %510 }
  0xf9   :  { %v943_v1 = vmul.f32 %v3941_v40, %v4934_v21  ;;  %1386 = vrot.lane.b32.xlu1 %v1299_v51, %s4131_s21  ;;  %v937_v52 = vmul.f32 %v3939_v33, %v936_v42  ;;  %vm949_vm11 = vweird.f32 %v3941_v40 }
  0xfa   :  { %3942 = vrsqrt.f32 %v4954_v14  ;;  %v663_v63 = vmul.f32 %v4956_v31, %v4956_v31  ;;  %vm950_vm13 = vmor %vm948_vm12, %vm949_vm11  ;;  %vm958_vm15 = vweird.f32 %v4954_v14 }
  0xfb   :  { %v944_v10 = vmul.f32 %v3941_v40, %v943_v1  ;;  %v941_v46 = vsel %vm940_vm10, %v3939_v33, %v937_v52 }
  0xfc   :  { %v703_v16 = vsub.f32 %v623_v41, %v663_v63  ;;  %v1260_v61 = vmul.f32 %v941_v46, %v4967_v23  ;;  %v625_v46 = vmul.f32 0.0051020407, %v4907_v35 }
  0xfd   :  { %v945_v7 = vmul.f32 0.5, %v944_v10  ;;  %v151_v18 = vpop.f32.mrf.mxu0  ;;  %v288_v53 = vpop.f32.mrf.mxu1  ;;  %v5018_v10 = vld [vmem:[%s7268_s2 + $0x50] sm:$0xff] }
  0xfe   :  { %v743_v26 = vmax.f32 %v703_v16, 0.0  ;;  %v289_v58 = vadd.f32 %v288_v53, %v151_v18  ;;  %1579 = vperm.xlu2 %3887, %v1260_v61   ;;  %v1300_v20 = vmul.f32 %v1260_v61, %v4887_v22  ;;  %v4992_v22 = vld [vmem:[%s7268_s2 + $0x48] sm:$0xff] }
  0xff   :  { %v946_v34 = vsub.f32 1.5, %v945_v7 }
 0x100   :  { %v3943_v57 = vpop.eup %3942  ;;  %v4981_v11 = vadd.f32 1e-05, %v743_v26  ;;  %v4983_v60 = vmul.f32 0.0051020407, %v289_v58  ;;  %198 = vmatmul.f32.gmra.mxu0 %v4631_v3  ;;  %335 = vmatmul.f32.gmra.mxu1 %v4640_v24  ;;  %v4998_v3 = vpop.xlane.xlu0 %507 }
 0x101   :  { %v953_v33 = vmul.f32 %v3943_v57, %v4954_v14  ;;  %1388 = vrot.lane.b32.xlu0 %v1300_v20, %s4131_s21  ;;  %v947_v62 = vmul.f32 %v3941_v40, %v946_v34  ;;  %v5003_v44 = vpop.xlane.xlu1 %519  ;;  %vm959_vm14 = vweird.f32 %v3943_v57  ;;  %v5028_v20 = vpop.xlane.xlu2 %531 }
 0x102   :  { %3944 = vrsqrt.f32 %v4981_v11  ;;  %v664_v12 = vmul.f32 %v4983_v60, %v4983_v60  ;;  %vm960_vm0 = vmor %vm958_vm15, %vm959_vm14  ;;  %vm968_vm2 = vweird.f32 %v4981_v11 }
 0x103   :  { %v951_v24 = vsel %vm950_vm13, %v3941_v40, %v947_v62  ;;  %v954_v25 = vmul.f32 %v3943_v57, %v953_v33 }
 0x104   :  { %v704_v30 = vsub.f32 %v624_v6, %v664_v12  ;;  %v1261_v50 = vmul.f32 %v951_v24, %v4992_v22  ;;  %v223_v24 = vpop.f32.mrf.mxu2 }
 0x105   :  { %v154_v48 = vpop.f32.mrf.mxu0  ;;  %v291_v21 = vpop.f32.mrf.mxu1  ;;  %v955_v56 = vmul.f32 0.5, %v954_v25 }
 0x106   :  { %v744_v19 = vmax.f32 %v704_v30, 0.0  ;;  %v292_v51 = vadd.f32 %v291_v21, %v154_v48  ;;  %1584 = vperm.xlu1 %3886, %v1261_v50   ;;  %v1301_v42 = vmul.f32 %v1261_v50, %v4911_v55  ;;  %v360_v25 = vpop.f32.mrf.mxu3  ;;  %v626_v21 = vmul.f32 0.0051020407, %v4904_v37 }
 0x107   :  { %v956_v41 = vsub.f32 1.5, %v955_v56  ;;  %v5045_v48 = vadd.f32 %v360_v25, %v223_v24 }
 0x108   :  { %v3945_v1 = vpop.eup %3944  ;;  %v5007_v40 = vadd.f32 1e-05, %v744_v19  ;;  %v5009_v52 = vmul.f32 0.0051020407, %v292_v51  ;;  %201 = vmatmul.f32.gmra.mxu0 %v4671_v47  ;;  %338 = vmatmul.f32.gmra.mxu1 %v4676_v49  ;;  %v5025_v7 = vpop.xlane.xlu0 %516 }
 0x109   :  { %v963_v63 = vmul.f32 %v3945_v1, %v4981_v11  ;;  %1390 = vrot.lane.b32.xlu2 %v1301_v42, %s4131_s21  ;;  %v957_v55 = vmul.f32 %v3943_v57, %v956_v41  ;;  %v5031_v6 = vpop.xlane.xlu1 %528  ;;  %vm969_vm1 = vweird.f32 %v3945_v1 }
 0x10a   :  { %3946 = vrsqrt.f32 %v5007_v40  ;;  %v665_v47 = vmul.f32 %v5009_v52, %v5009_v52  ;;  %vm970_vm3 = vmor %vm968_vm2, %vm969_vm1  ;;  %vm978_vm5 = vweird.f32 %v5007_v40 }
 0x10b   :  { %v961_v49 = vsel %vm960_vm0, %v3943_v57, %v957_v55  ;;  %v964_v16 = vmul.f32 %v3945_v1, %v963_v63 }
 0x10c   :  { %v705_v61 = vsub.f32 %v625_v46, %v665_v47  ;;  %v1262_v18 = vmul.f32 %v961_v49, %v5018_v10 }
 0x10d   :  { %v157_v53 = vpop.f32.mrf.mxu0  ;;  %v294_v26 = vpop.f32.mrf.mxu1  ;;  %v965_v58 = vmul.f32 0.5, %v964_v16 }
 0x10e   :  { %v745_v14 = vmax.f32 %v705_v61, 0.0  ;;  %v295_v35 = vadd.f32 %v294_v26, %v157_v53  ;;  %1589 = vperm.xlu1 %3886, %v1262_v18   ;;  %v1302_v34 = vmul.f32 %v1262_v18, %v4936_v38  ;;  %v783_v38 = vld [vmem:[%s7268_s2 + $0x58] sm:$0xff]  ;;  %v5055_v16 = vpop.xlane.xlu2 %543  ;;  %v627_v26 = vmul.f32 0.0051020407, %v4960_v13 }
 0x10f   :  { %v966_v33 = vsub.f32 1.5, %v965_v58 }
 0x110   :  { %v3947_v57 = vpop.eup %3946  ;;  %v5033_v62 = vadd.f32 1e-05, %v745_v14  ;;  %v5035_v12 = vmul.f32 0.0051020407, %v295_v35  ;;  %204 = vmatmul.f32.gmra.mxu0 %v4621_v17  ;;  %341 = vmatmul.f32.gmra.mxu1 %v4626_v0  ;;  %v5052_v11 = vpop.xlane.xlu0 %525 }
 0x111   :  { %v973_v30 = vmul.f32 %v3947_v57, %v5007_v40  ;;  %1392 = vrot.lane.b32.xlu2 %v1302_v34, %s4131_s21  ;;  %v967_v50 = vmul.f32 %v3945_v1, %v966_v33  ;;  %vm979_vm4 = vweird.f32 %v3947_v57  ;;  %v5073_v58 = vpop.xlane.xlu1 %537 }
 0x112   :  { %3948 = vrsqrt.f32 %v5033_v62  ;;  %v666_v17 = vmul.f32 %v5035_v12, %v5035_v12  ;;  %vm980_vm6 = vmor %vm978_vm5, %vm979_vm4  ;;  %vm988_vm8 = vweird.f32 %v5033_v62 }
 0x113   :  { %v971_v0 = vsel %vm970_vm3, %v3945_v1, %v967_v50  ;;  %v974_v56 = vmul.f32 %v3947_v57, %v973_v30 }
 0x114   :  { %v706_v19 = vsub.f32 %v626_v21, %v666_v17  ;;  %v1263_v51 = vmul.f32 %v971_v0, %v783_v38  ;;  %v4034_v0 = vld [vmem:[%s7267_s0 + $0x200] sm:$0xff] }
 0x115   :  { %v160_v42 = vpop.f32.mrf.mxu0  ;;  %v297_v41 = vpop.f32.mrf.mxu1  ;;  %v975_v63 = vmul.f32 0.5, %v974_v56  ;;  %v4035_v56 = vld [vmem:[%s7267_s0 + $0x208] sm:$0xff] }
 0x116   :  { %v746_v55 = vmax.f32 %v706_v19, 0.0  ;;  %v298_v46 = vadd.f32 %v297_v41, %v160_v42  ;;  %1594 = vperm.xlu0 %3888, %v1263_v51   ;;  %v1303_v37 = vmul.f32 %v1263_v51, %v4956_v31  ;;  %v5068_v31 = vld [vmem:[%s7268_s2 + $0x60] sm:$0xff]  ;;  %v5097_v19 = vld [vmem:[%s7268_s2 + $0x68] sm:$0xff]  ;;  %v628_v42 = vmul.f32 0.0051020407, %v4940_v8  ;;  %v5101_v41 = vpop.xlane.xlu2 %549 }
 0x117   :  { %v976_v47 = vsub.f32 1.5, %v975_v63 }
 0x118   :  { %v3949_v49 = vpop.eup %3948  ;;  %v5057_v61 = vadd.f32 1e-05, %v746_v55  ;;  %v5059_v1 = vmul.f32 0.0051020407, %v298_v46  ;;  %207 = vmatmul.f32.gmra.mxu0 %v4719_v39  ;;  %344 = vmatmul.f32.gmra.mxu1 %v4724_v36  ;;  %v5082_v17 = vpop.xlane.xlu0 %534 }
 0x119   :  { %v983_v18 = vmul.f32 %v3949_v49, %v5033_v62  ;;  %1394 = vrot.lane.b32.xlu1 %v1303_v37, %s4131_s21  ;;  %v977_v53 = vmul.f32 %v3947_v57, %v976_v47  ;;  %vm989_vm7 = vweird.f32 %v3949_v49  ;;  %v5107_v37 = vpop.xlane.xlu1 %540 }
 0x11a   :  { %3950 = vrsqrt.f32 %v5057_v61  ;;  %v667_v39 = vmul.f32 %v5059_v1, %v5059_v1  ;;  %vm990_vm9 = vmor %vm988_vm8, %vm989_vm7  ;;  %vm998_vm11 = vweird.f32 %v5057_v61 }
 0x11b   :  { %v981_v36 = vsel %vm980_vm6, %v3947_v57, %v977_v53  ;;  %v984_v14 = vmul.f32 %v3949_v49, %v983_v18 }
 0x11c   :  { %v707_v35 = vsub.f32 %v627_v26, %v667_v39  ;;  %v1264_v34 = vmul.f32 %v981_v36, %v5068_v31 }
 0x11d   :  { %v163_v33 = vpop.f32.mrf.mxu0  ;;  %v300_v24 = vpop.f32.mrf.mxu1  ;;  %v985_v25 = vmul.f32 0.5, %v984_v14 }
 0x11e   :  { %v747_v40 = vmax.f32 %v707_v35, 0.0  ;;  %v301_v30 = vadd.f32 %v300_v24, %v163_v33  ;;  %1599 = vperm.xlu2 %3887, %v1264_v34   ;;  %v1304_v13 = vmul.f32 %v1264_v34, %v4983_v60  ;;  %v5122_v24 = vld [vmem:[%s7268_s2 + $0x70] sm:$0xff] }
 0x11f   :  { %v986_v38 = vsub.f32 1.5, %v985_v25  ;;  %v629_v25 = vmul.f32 0.0051020407, %v4931_v43 }
 0x120   :  { %v3951_v50 = vpop.eup %3950  ;;  %v5080_v21 = vadd.f32 1e-05, %v747_v40  ;;  %v5084_v57 = vmul.f32 0.0051020407, %v301_v30  ;;  %210 = vmatmul.f32.gmra.mxu0 %v4034_v0  ;;  %347 = vmatmul.f32.gmra.mxu1 %v4035_v56  ;;  %v5127_v40 = vpop.xlane.xlu0 %546 }
 0x121   :  { %v993_v60 = vmul.f32 %v3951_v50, %v5057_v61  ;;  %1396 = vrot.lane.b32.xlu0 %v1304_v13, %s4131_s21  ;;  %v987_v51 = vmul.f32 %v3949_v49, %v986_v38  ;;  %vm999_vm10 = vweird.f32 %v3951_v50  ;;  %v5132_v13 = vpop.xlane.xlu2 %558 }
 0x122   :  { %3952 = vrsqrt.f32 %v5080_v21  ;;  %v668_v63 = vmul.f32 %v5084_v57, %v5084_v57  ;;  %vm1000_vm12 = vmor %vm998_vm11, %vm999_vm10  ;;  %vm1008_vm14 = vweird.f32 %v5080_v21 }
 0x123   :  { %v991_v55 = vsel %vm990_vm9, %v3949_v49, %v987_v51  ;;  %v994_v46 = vmul.f32 %v3951_v50, %v993_v60 }
 0x124   :  { %v708_v47 = vsub.f32 %v628_v42, %v668_v63  ;;  %v1265_v18 = vmul.f32 %v991_v55, %v5097_v19  ;;  %v5136_v63 = vpop.xlane.xlu1 %555 }
 0x125   :  { %v166_v53 = vpop.f32.mrf.mxu0  ;;  %v303_v62 = vpop.f32.mrf.mxu1  ;;  %v995_v26 = vmul.f32 0.5, %v994_v46 }
 0x126   :  { %v748_v8 = vmax.f32 %v708_v47, 0.0  ;;  %v304_v39 = vadd.f32 %v303_v62, %v166_v53  ;;  %1604 = vperm.xlu1 %3886, %v1265_v18   ;;  %v1305_v36 = vmul.f32 %v1265_v18, %v5009_v52  ;;  %v4036_v18 = vld [vmem:[%s7267_s0 + $0x220] sm:$0xff]  ;;  %v4037_v53 = vld [vmem:[%s7267_s0 + $0x228] sm:$0xff]  ;;  %v5153_v62 = vld [vmem:[%s7268_s2 + $0x78] sm:$0xff] }
 0x127   :  { %v996_v14 = vsub.f32 1.5, %v995_v26 }
 0x128   :  { %v3953_v35 = vpop.eup %3952  ;;  %v5111_v34 = vadd.f32 1e-05, %v748_v8  ;;  %v5113_v49 = vmul.f32 0.0051020407, %v304_v39  ;;  %213 = vmatmul.f32.gmra.mxu0 %v4747_v15  ;;  %350 = vmatmul.f32.gmra.mxu1 %v4752_v45  ;;  %v630_v8 = vmul.f32 0.0051020407, %v4998_v3 }
 0x129   :  { %v1003_v33 = vmul.f32 %v3953_v35, %v5080_v21  ;;  %1398 = vrot.lane.b32.xlu2 %v1305_v36, %s4131_s21  ;;  %v997_v52 = vmul.f32 %v3951_v50, %v996_v14  ;;  %vm1009_vm13 = vweird.f32 %v3953_v35  ;;  %v5164_v21 = vpop.xlane.xlu2 %567 }
 0x12a   :  { %3954 = vrsqrt.f32 %v5111_v34  ;;  %v669_v15 = vmul.f32 %v5113_v49, %v5113_v49  ;;  %vm1010_vm15 = vmor %vm1008_vm14, %vm1009_vm13  ;;  %vm1018_vm1 = vweird.f32 %v5111_v34 }
 0x12b   :  { %v1001_v45 = vsel %vm1000_vm12, %v3951_v50, %v997_v52  ;;  %v1004_v30 = vmul.f32 %v3953_v35, %v1003_v33  ;;  %v5161_v33 = vpop.xlane.xlu0 %552 }
 0x12c   :  { %v709_v38 = vsub.f32 %v629_v25, %v669_v15  ;;  %v1266_v0 = vmul.f32 %v1001_v45, %v5122_v24 }
 0x12d   :  { %v169_v56 = vpop.f32.mrf.mxu0  ;;  %v306_v61 = vpop.f32.mrf.mxu1  ;;  %v1005_v60 = vmul.f32 0.5, %v1004_v30 }
 0x12e   :  { %v749_v43 = vmax.f32 %v709_v38, 0.0  ;;  %v307_v51 = vadd.f32 %v306_v61, %v169_v56  ;;  %1609 = vperm.xlu0 %3888, %v1266_v0   ;;  %v1306_v42 = vmul.f32 %v1266_v0, %v5035_v12 }
 0x12f   :  { %v1006_v55 = vsub.f32 1.5, %v1005_v60 }
 0x130   :  { %v3955_v46 = vpop.eup %3954  ;;  %v5138_v50 = vadd.f32 1e-05, %v749_v43  ;;  %v5140_v47 = vmul.f32 0.0051020407, %v307_v51  ;;  %216 = vmatmul.f32.gmra.mxu0 %v4036_v18  ;;  %353 = vmatmul.f32.gmra.mxu1 %v4037_v53  ;;  %v4038_v43 = vld [vmem:[%s7267_s0 + $0x230] sm:$0xff]  ;;  %v4039_v51 = vld [vmem:[%s7267_s0 + $0x238] sm:$0xff] }
 0x131   :  { %v1013_v12 = vmul.f32 %v3955_v46, %v5111_v34  ;;  %1400 = vrot.lane.b32.xlu1 %v1306_v42, %s4131_s21  ;;  %v1007_v26 = vmul.f32 %v3953_v35, %v1006_v55  ;;  %vm1019_vm0 = vweird.f32 %v3955_v46  ;;  %v7272_v18 = vmov 1  }
 0x132   :  { %3956 = vrsqrt.f32 %v5138_v50  ;;  %v670_v39 = vmul.f32 %v5140_v47, %v5140_v47  ;;  %3889 = vset.pattern.permute.xlu1 %v7272_v18  ;;  %v631_v53 = vmul.f32 0.0051020407, %v4975_v2  ;;  %vm1020_vm2 = vmor %vm1018_vm1, %vm1019_vm0  ;;  %vm1028_vm4 = vweird.f32 %v5138_v50 }
 0x133   :  { %v1014_v36 = vmul.f32 %v3955_v46, %v1013_v12  ;;  %v1011_v14 = vsel %vm1010_vm15, %v3953_v35, %v1007_v26  ;;  %v788_v26 = vld [vmem:[%s7268_s2 + $0x80] sm:$0xff] }
 0x134   :  { %v710_v52 = vsub.f32 %v630_v8, %v670_v39  ;;  %v1267_v25 = vmul.f32 %v1011_v14, %v5153_v62 }
 0x135   :  { %v172_v15 = vpop.f32.mrf.mxu0  ;;  %v309_v45 = vpop.f32.mrf.mxu1  ;;  %v1015_v30 = vmul.f32 0.5, %v1014_v36 }
 0x136   :  { %v750_v3 = vmax.f32 %v710_v52, 0.0  ;;  %v310_v38 = vadd.f32 %v309_v45, %v172_v15  ;;  %1614 = vperm.xlu2 %3887, %v1267_v25   ;;  %v1307_v0 = vmul.f32 %v1267_v25, %v5059_v1  ;;  %v5178_v1 = vpop.xlane.xlu1 %564  ;;  %v5194_v45 = vpop.xlane.xlu0 %561 }
 0x137   :  { %v1016_v56 = vsub.f32 1.5, %v1015_v30 }
 0x138   :  { %v3957_v61 = vpop.eup %3956  ;;  %v5167_v60 = vadd.f32 1e-05, %v750_v3  ;;  %v5169_v35 = vmul.f32 0.0051020407, %v310_v38  ;;  %219 = vmatmul.f32.gmra.mxu0 %v4038_v43  ;;  %356 = vmatmul.f32.gmra.mxu1 %v4039_v51  ;;  %v5209_v51 = vld [vmem:[%s7268_s2 + $0x88] sm:$0xff] }
 0x139   :  { %v1023_v42 = vmul.f32 %v3957_v61, %v5138_v50  ;;  %1402 = vrot.lane.b32.xlu0 %v1307_v0, %s4131_s21  ;;  %v1017_v55 = vmul.f32 %v3955_v46, %v1016_v56  ;;  %vm1029_vm3 = vweird.f32 %v3957_v61  ;;  %v5198_v0 = vpop.permute.xlu2 %1374 }
 0x13a   :  { %3958 = vrsqrt.f32 %v5167_v60  ;;  %v671_v12 = vmul.f32 %v5169_v35, %v5169_v35  ;;  %vm1030_vm5 = vmor %vm1028_vm4, %vm1029_vm3  ;;  %vm1038_vm7 = vweird.f32 %v5167_v60 }
 0x13b   :  { %v1024_v8 = vmul.f32 %v3957_v61, %v1023_v42  ;;  %v1021_v39 = vsel %vm1020_vm2, %v3955_v46, %v1017_v55 }
 0x13c   :  { %v711_v36 = vsub.f32 %v631_v53, %v671_v12  ;;  %v5191_v52 = vmul.f32 %v1021_v39, %v788_v26 }
 0x13d   :  { %v175_v34 = vpop.f32.mrf.mxu0  ;;  %v312_v14 = vpop.f32.mrf.mxu1  ;;  %v1025_v25 = vmul.f32 0.5, %v1024_v8 }
 0x13e   :  { %v751_v2 = vmax.f32 %v711_v36, 0.0  ;;  %v313_v15 = vadd.f32 %v312_v14, %v175_v34  ;;  %3890 = vset.pattern.permute.xlu2 %v7272_v18  ;;  %v1308_v30 = vmul.f32 %v5191_v52, %v5084_v57  ;;  %v632_v57 = vmul.f32 0.0051020407, %v4970_v32  ;;  %v5216_v12 = vpop.permute.xlu1 %1372 }
 0x13f   :  { %v1026_v3 = vsub.f32 1.5, %v1025_v25  ;;  %7309 = vst [vmem:[#allocation3_spill] sm:$0xff] %v5216_v12 }
 0x140   :  { %v3959_v38 = vpop.eup %3958  ;;  %v5200_v46 = vadd.f32 1e-05, %v751_v2  ;;  %v5202_v56 = vmul.f32 0.0051020407, %v313_v15  ;;  %1404 = vrot.lane.b32.xlu2 %v1308_v30, %s4131_s21 }
 0x141   :  { %v1033_v43 = vmul.f32 %v3959_v38, %v5167_v60  ;;  %v1027_v42 = vmul.f32 %v3957_v61, %v1026_v3  ;;  %vm1039_vm6 = vweird.f32 %v3959_v38  ;;  %v5223_v30 = vpop.permute.xlu2 %1378 }
 0x142   :  { %3960 = vrsqrt.f32 %v5200_v46  ;;  %v672_v55 = vmul.f32 %v5202_v56, %v5202_v56  ;;  %vm1040_vm8 = vmor %vm1038_vm7, %vm1039_vm6  ;;  %vm1048_vm10 = vweird.f32 %v5200_v46 }
 0x143   :  { %v1034_v53 = vmul.f32 %v3959_v38, %v1033_v43  ;;  %v1031_v26 = vsel %vm1030_vm5, %v3957_v61, %v1027_v42  ;;  %v5231_v42 = vpop.xlane.xlu0 %570 }
 0x144   :  { %v712_v8 = vsub.f32 %v632_v57, %v672_v55  ;;  %v5219_v39 = vmul.f32 %v1031_v26, %v5209_v51  ;;  %v790_v57 = vld [vmem:[%s7268_s2 + $0x90] sm:$0xff]  ;;  %v633_v55 = vmul.f32 0.0051020407, %v5025_v7 }
 0x145   :  { %v178_v36 = vpop.f32.mrf.mxu0  ;;  %v315_v34 = vpop.f32.mrf.mxu1  ;;  %v1035_v14 = vmul.f32 0.5, %v1034_v53 }
 0x146   :  { %7310 = vst [vmem:[#allocation4_spill] sm:$0xff] %v5219_v39  ;;  %v752_v50 = vmax.f32 %v712_v8, 0.0  ;;  %v316_v25 = vadd.f32 %v315_v34, %v178_v36  ;;  %v1309_v32 = vmul.f32 %v5219_v39, %v5113_v49  ;;  %v5241_v8 = vpop.permute.xlu1 %1549 }
 0x147   :  { %v1036_v2 = vsub.f32 1.5, %v1035_v14  ;;  %7311 = vst [vmem:[#allocation5_spill] sm:$0xff] %v5241_v8 }
 0x148   :  { %v3961_v15 = vpop.eup %3960  ;;  %v5225_v3 = vadd.f32 1e-05, %v752_v50  ;;  %v5227_v61 = vmul.f32 0.0051020407, %v316_v25  ;;  %1406 = vrot.lane.b32.xlu1 %v1309_v32, %s4131_s21 }
 0x149   :  { %v1043_v43 = vmul.f32 %v3961_v15, %v5200_v46  ;;  %v1037_v49 = vmul.f32 %v3959_v38, %v1036_v2  ;;  %vm1049_vm9 = vweird.f32 %v3961_v15 }
 0x14a   :  { %3962 = vrsqrt.f32 %v5225_v3  ;;  %v673_v53 = vmul.f32 %v5227_v61, %v5227_v61  ;;  %vm1050_vm11 = vmor %vm1048_vm10, %vm1049_vm9  ;;  %vm1058_vm13 = vweird.f32 %v5225_v3 }
 0x14b   :  { %v1044_v26 = vmul.f32 %v3961_v15, %v1043_v43  ;;  %v1041_v36 = vsel %vm1040_vm8, %v3959_v38, %v1037_v49 }
 0x14c   :  { %v713_v34 = vsub.f32 %v633_v55, %v673_v53  ;;  %v5243_v14 = vmul.f32 %v1041_v36, %v790_v57  ;;  %v791_v57 = vld [vmem:[%s7268_s2 + $0x98] sm:$0xff]  ;;  %v5258_v55 = vpop.permute.xlu2 %1559 }
 0x14d   :  { %v181_v50 = vpop.f32.mrf.mxu0  ;;  %v318_v25 = vpop.f32.mrf.mxu1  ;;  %v1045_v32 = vmul.f32 0.5, %v1044_v26  ;;  %7312 = vst [vmem:[#allocation6_spill] sm:$0xff] %v5258_v55 }
 0x14e   :  { %v753_v2 = vmax.f32 %v713_v34, 0.0  ;;  %v319_v60 = vadd.f32 %v318_v25, %v181_v50  ;;  %v1310_v7 = vmul.f32 %v5243_v14, %v5140_v47  ;;  %v634_v47 = vmul.f32 0.0051020407, %v5003_v44  ;;  %v5263_v26 = vpop.permute.xlu0 %1376 }
 0x14f   :  { %v1046_v18 = vsub.f32 1.5, %v1045_v32 }
 0x150   :  { %v3963_v4 = vpop.eup %3962  ;;  %v5247_v12 = vadd.f32 1e-05, %v753_v2  ;;  %v5249_v43 = vmul.f32 0.0051020407, %v319_v60  ;;  %1408 = vrot.lane.b32.xlu1 %v1310_v7, %s4131_s21 }
 0x151   :  { %v1053_v38 = vmul.f32 %v3963_v4, %v5225_v3  ;;  %v1047_v49 = vmul.f32 %v3961_v15, %v1046_v18  ;;  %vm1059_vm12 = vweird.f32 %v3963_v4 }
 0x152   :  { %3964 = vrsqrt.f32 %v5247_v12  ;;  %v674_v53 = vmul.f32 %v5249_v43, %v5249_v43  ;;  %vm1060_vm14 = vmor %vm1058_vm13, %vm1059_vm12  ;;  %vm1068_vm0 = vweird.f32 %v5247_v12 }
 0x153   :  { %v1381_v36 = vpop.permute.xlu1 %1380  ;;  %v1051_v34 = vsel %vm1050_vm11, %v3961_v15, %v1047_v49  ;;  %v1054_v50 = vmul.f32 %v3963_v4, %v1053_v38 }
 0x154   :  { %v714_v25 = vsub.f32 %v634_v47, %v674_v53  ;;  %v5265_v32 = vmul.f32 %v1051_v34, %v791_v57  ;;  %v1496_v60 = vsub.f32 %v4873_v54, %v1381_v36  ;;  %v635_v54 = vmul.f32 0.0051020407, %v5001_v28  ;;  %v1385_v49 = vpop.permute.xlu2 %1384  ;;  %v5284_v53 = vld [vmem:[%s7268_s2 + $0xa0] sm:$0xff] }
 0x155   :  { %v184_v18 = vpop.f32.mrf.mxu0  ;;  %v321_v46 = vpop.f32.mrf.mxu1  ;;  %v1055_v2 = vmul.f32 0.5, %v1054_v50 }
 0x156   :  { %v754_v44 = vmax.f32 %v714_v25, 0.0  ;;  %v322_v7 = vadd.f32 %v321_v46, %v184_v18  ;;  %v1311_v8 = vmul.f32 %v5265_v32, %v5169_v35  ;;  %v1498_v25 = vsub.f32 %v4920_v9, %v1385_v49 }
 0x157   :  { %v1056_v55 = vsub.f32 1.5, %v1055_v2  ;;  %v636_v9 = vmul.f32 0.0051020407, %v5052_v11 }
 0x158   :  { %v3965_v5 = vpop.eup %3964  ;;  %v5270_v39 = vadd.f32 1e-05, %v754_v44  ;;  %v5272_v15 = vmul.f32 0.0051020407, %v322_v7  ;;  %1839 = vperm.xlu1 %3889, %v1496_v60   ;;  %1410 = vrot.lane.b32.xlu0 %v1311_v8, %s4131_s21 }
 0x159   :  { %v1063_v38 = vmul.f32 %v3965_v5, %v5247_v12  ;;  %v1057_v57 = vmul.f32 %v3963_v4, %v1056_v55  ;;  %vm1069_vm15 = vweird.f32 %v3965_v5 }
 0x15a   :  { %3966 = vrsqrt.f32 %v5270_v39  ;;  %v675_v35 = vmul.f32 %v5272_v15, %v5272_v15  ;;  %vm1070_vm1 = vmor %vm1068_vm0, %vm1069_vm15  ;;  %vm1078_vm3 = vweird.f32 %v5270_v39 }
 0x15b   :  { %v1383_v47 = vpop.permute.xlu0 %1382  ;;  %v1061_v8 = vsel %vm1060_vm14, %v3963_v4, %v1057_v57  ;;  %v1064_v36 = vmul.f32 %v3965_v5, %v1063_v38 }
 0x15c   :  { %v715_v55 = vsub.f32 %v635_v54, %v675_v35  ;;  %v1497_v3 = vsub.f32 %v4896_v27, %v1383_v47  ;;  %v1272_v2 = vmul.f32 %v1061_v8, %v5284_v53  ;;  %v5302_v54 = vld [vmem:[%s7268_s2 + $0xa8] sm:$0xff]  ;;  %v5304_v47 = vpop.permute.xlu1 %1564 }
 0x15d   :  { %v324_v34 = vpop.f32.mrf.mxu1  ;;  %v187_v28 = vpop.f32.mrf.mxu0  ;;  %v1065_v50 = vmul.f32 0.5, %v1064_v36  ;;  %7313 = vst [vmem:[#allocation7_spill] sm:$0xff] %v5304_v47 }
 0x15e   :  { %v755_v18 = vmax.f32 %v715_v55, 0.0  ;;  %1844 = vperm.xlu2 %3890, %v1497_v3   ;;  %v325_v46 = vadd.f32 %v324_v34, %v187_v28  ;;  %v7314_v34 = vmov 0  }
 0x15f   :  { %v1066_v44 = vsub.f32 1.5, %v1065_v50  ;;  %v1312_v50 = vmul.f32 %v1272_v2, %v5202_v56 }
 0x160   :  { %v3967_v60 = vpop.eup %3966  ;;  %v5289_v7 = vadd.f32 1e-05, %v755_v18  ;;  %v5291_v4 = vmul.f32 0.0051020407, %v325_v46  ;;  %1849 = vperm.xlu1 %3889, %v1498_v25   ;;  %1639 = vperm.xlu0 %3888, %v1272_v2  }
 0x161   :  { %v1073_v27 = vmul.f32 %v3967_v60, %v5270_v39  ;;  %v1067_v38 = vmul.f32 %v3965_v5, %v1066_v44  ;;  %vm1079_vm2 = vweird.f32 %v3967_v60 }
 0x162   :  { %3968 = vrsqrt.f32 %v5289_v7  ;;  %v676_v57 = vmul.f32 %v5291_v4, %v5291_v4  ;;  %vm1080_vm4 = vmor %vm1078_vm3, %vm1079_vm2  ;;  %vm1088_vm6 = vweird.f32 %v5289_v7 }
 0x163   :  { %v1071_v35 = vsel %vm1070_vm1, %v3965_v5, %v1067_v38  ;;  %v1074_v49 = vmul.f32 %v3967_v60, %v1073_v27  ;;  %v637_v38 = vmul.f32 0.0051020407, %v5031_v6 }
 0x164   :  { %v716_v8 = vsub.f32 %v636_v9, %v676_v57  ;;  %v1273_v11 = vmul.f32 %v1071_v35, %v5302_v54  ;;  %v5325_v57 = vld [vmem:[%s7268_s2 + $0xb0] sm:$0xff] }
 0x165   :  { %v327_v36 = vpop.f32.mrf.mxu1  ;;  %v190_v12 = vpop.f32.mrf.mxu0  ;;  %v1075_v55 = vmul.f32 0.5, %v1074_v49 }
 0x166   :  { %v756_v3 = vmax.f32 %v716_v8, 0.0  ;;  %3891 = vset.pattern.permute.xlu2 %v7314_v34  ;;  %v328_v28 = vadd.f32 %v327_v36, %v190_v12  ;;  %v1313_v6 = vmul.f32 %v1273_v11, %v5227_v61  ;;  %v638_v61 = vmul.f32 0.0051020407, %v5028_v20 }
 0x167   :  { %1644 = vperm.xlu2 %3891, %v1273_v11   ;;  %v1076_v25 = vsub.f32 1.5, %v1075_v55 }
 0x168   :  { %v3969_v18 = vpop.eup %3968  ;;  %v5309_v5 = vadd.f32 1e-05, %v756_v3  ;;  %v5311_v46 = vmul.f32 0.0051020407, %v328_v28  ;;  %1412 = vrot.lane.b32.xlu0 %v1312_v50, %s4131_s21  ;;  %v5320_v9 = vpop.permute.xlu0 %1574 }
 0x169   :  { %v1083_v44 = vmul.f32 %v3969_v18, %v5289_v7  ;;  %v1077_v27 = vmul.f32 %v3967_v60, %v1076_v25  ;;  %7315 = vst [vmem:[#allocation8_spill] sm:$0xff] %v5320_v9  ;;  %v5329_v28 = vpop.permute.xlu1 %1569  ;;  %vm1089_vm5 = vweird.f32 %v3969_v18 }
 0x16a   :  { %3970 = vrsqrt.f32 %v5309_v5  ;;  %v677_v56 = vmul.f32 %v5311_v46, %v5311_v46  ;;  %7316 = vst [vmem:[#allocation9_spill] sm:$0xff] %v5329_v28  ;;  %vm5343_vm7 = vmor %vm1088_vm6, %vm1089_vm5  ;;  %vm1098_vm9 = vweird.f32 %v5309_v5 }
 0x16b   :  { %v1084_v2 = vmul.f32 %v3969_v18, %v1083_v44  ;;  %v1081_v35 = vsel %vm1080_vm4, %v3967_v60, %v1077_v27 }
 0x16c   :  { %v717_v49 = vsub.f32 %v637_v38, %v677_v56  ;;  %v1274_v3 = vmul.f32 %v1081_v35, %v5325_v57 }
 0x16d   :  { %v193_v8 = vpop.f32.mrf.mxu0  ;;  %v330_v39 = vpop.f32.mrf.mxu1  ;;  %v1085_v36 = vmul.f32 0.5, %v1084_v2 }
 0x16e   :  { %v757_v12 = vmax.f32 %v717_v49, 0.0  ;;  %v331_v55 = vadd.f32 %v330_v39, %v193_v8  ;;  %v1314_v20 = vmul.f32 %v1274_v3, %v5249_v43 }
 0x16f   :  { %1414 = vrot.lane.b32.xlu2 %v1313_v6, %s4131_s21  ;;  %v1086_v50 = vsub.f32 1.5, %v1085_v36  ;;  %v5351_v6 = vld [vmem:[%s7268_s2 + $0xb8] sm:$0xff] }
 0x170   :  { %v3971_v25 = vpop.eup %3970  ;;  %v5332_v44 = vadd.f32 1e-05, %v757_v12  ;;  %v5334_v47 = vmul.f32 0.0051020407, %v331_v55  ;;  %1649 = vperm.xlu0 %3888, %v1274_v3   ;;  %v5355_v55 = vpop.permute.xlu2 %1579 }
 0x171   :  { %v1093_v60 = vmul.f32 %v3971_v25, %v5309_v5  ;;  %v1087_v27 = vmul.f32 %v3969_v18, %v1086_v50  ;;  %7319 = vst [vmem:[#allocation10_spill] sm:$0xff] %v5355_v55  ;;  %vm1099_vm8 = vweird.f32 %v3971_v25 }
 0x172   :  { %3972 = vrsqrt.f32 %v5332_v44  ;;  %v678_v11 = vmul.f32 %v5334_v47, %v5334_v47  ;;  %vm1100_vm10 = vmor %vm1098_vm9, %vm1099_vm8  ;;  %vm1108_vm12 = vweird.f32 %v5332_v44 }
 0x173   :  { %v1389_v38 = vpop.permute.xlu0 %1388  ;;  %v1094_v56 = vmul.f32 %v3971_v25, %v1093_v60  ;;  %v1091_v7 = vsel %vm5343_vm7, %v3969_v18, %v1087_v27  ;;  %v5365_v27 = vpop.permute.xlu1 %1386 }
 0x174   :  { %v718_v2 = vsub.f32 %v638_v61, %v678_v11  ;;  %v1500_v35 = vsub.f32 %v4967_v23, %v1389_v38  ;;  %v1275_v3 = vmul.f32 %v1091_v7, %v5351_v6  ;;  %v639_v11 = vmul.f32 0.0051020407, %v5082_v17 }
 0x175   :  { %v333_v8 = vpop.f32.mrf.mxu1  ;;  %v196_v39 = vpop.f32.mrf.mxu0  ;;  %v1095_v36 = vmul.f32 0.5, %v1094_v56  ;;  %v5373_v56 = vld [vmem:[%s7268_s2 + $0xc0] sm:$0xff] }
 0x176   :  { %v758_v12 = vmax.f32 %v718_v2, 0.0  ;;  %1859 = vperm.xlu1 %3889, %v1500_v35   ;;  %v334_v23 = vadd.f32 %v333_v8, %v196_v39  ;;  %v1315_v49 = vmul.f32 %v1275_v3, %v5272_v15 }
 0x177   :  { %1416 = vrot.lane.b32.xlu2 %v1314_v20, %s4131_s21  ;;  %v1096_v50 = vsub.f32 1.5, %v1095_v36 }
 0x178   :  { %v3973_v60 = vpop.eup %3972  ;;  %v5358_v61 = vadd.f32 1e-05, %v758_v12  ;;  %v5360_v43 = vmul.f32 0.0051020407, %v334_v23  ;;  %v1391_v9 = vpop.permute.xlu2 %1390 }
 0x179   :  { %v1103_v18 = vmul.f32 %v3973_v60, %v5332_v44  ;;  %v1097_v2 = vmul.f32 %v3971_v25, %v1096_v50  ;;  %vm1109_vm11 = vweird.f32 %v3973_v60  ;;  %v1501_v44 = vsub.f32 %v4992_v22, %v1391_v9 }
 0x17a   :  { %3974 = vrsqrt.f32 %v5358_v61  ;;  %v679_v38 = vmul.f32 %v5360_v43, %v5360_v43  ;;  %vm1110_vm13 = vmor %vm1108_vm12, %vm1109_vm11  ;;  %vm1118_vm15 = vweird.f32 %v5358_v61 }
 0x17b   :  { %v1104_v35 = vmul.f32 %v3973_v60, %v1103_v18  ;;  %v1101_v8 = vsel %vm1100_vm10, %v3971_v25, %v1097_v2  ;;  %v5384_v25 = vpop.permute.xlu1 %1584 }
 0x17c   :  { %v719_v17 = vsub.f32 %v639_v11, %v679_v38  ;;  %v1276_v7 = vmul.f32 %v1101_v8, %v5373_v56  ;;  %7320 = vst [vmem:[#allocation11_spill] sm:$0xff] %v5384_v25  ;;  %v5389_v38 = vld [vmem:[%s7268_s2 + $0xc8] sm:$0xff]  ;;  %v7321_v25 = vmov 1  }
 0x17d   :  { %v336_v39 = vpop.f32.mrf.mxu1  ;;  %v199_v20 = vpop.f32.mrf.mxu0  ;;  %v1105_v36 = vmul.f32 0.5, %v1104_v35 }
 0x17e   :  { %v759_v12 = vmax.f32 %v719_v17, 0.0  ;;  %1418 = vrot.lane.b32.xlu1 %v1315_v49, %s4131_s21  ;;  %v337_v23 = vadd.f32 %v336_v39, %v199_v20  ;;  %1659 = vperm.xlu0 %3888, %v1276_v7   ;;  %v1316_v39 = vmul.f32 %v1276_v7, %v5291_v4 }
 0x17f   :  { %1654 = vperm.xlu2 %3891, %v1275_v3   ;;  %v1106_v50 = vsub.f32 1.5, %v1105_v36  ;;  %v640_v3 = vmul.f32 0.0051020407, %v5073_v58 }
 0x180   :  { %v3975_v5 = vpop.eup %3974  ;;  %v5379_v18 = vadd.f32 1e-05, %v759_v12  ;;  %v5381_v11 = vmul.f32 0.0051020407, %v337_v23  ;;  %v1393_v7 = vpop.permute.xlu2 %1392 }
 0x181   :  { %v1113_v15 = vmul.f32 %v3975_v5, %v5358_v61  ;;  %v1107_v2 = vmul.f32 %v3973_v60, %v1106_v50  ;;  %vm1119_vm14 = vweird.f32 %v3975_v5  ;;  %v1502_v61 = vsub.f32 %v5018_v10, %v1393_v7 }
 0x182   :  { %3976 = vrsqrt.f32 %v5379_v18  ;;  %v680_v35 = vmul.f32 %v5381_v11, %v5381_v11  ;;  %vm1120_vm0 = vmor %vm1118_vm15, %vm1119_vm14  ;;  %v642_v10 = vmul.f32 0.0051020407, %v5055_v16  ;;  %vm1128_vm2 = vweird.f32 %v5379_v18  ;;  %v5441_v16 = vld [vmem:[%s7268_s2 + $0xd8] sm:$0xff] }
 0x183   :  { %v1111_v17 = vsel %vm1110_vm13, %v3973_v60, %v1107_v2  ;;  %v1114_v49 = vmul.f32 %v3975_v5, %v1113_v15 }
 0x184   :  { %v720_v8 = vsub.f32 %v640_v3, %v680_v35  ;;  %v1277_v20 = vmul.f32 %v1111_v17, %v5389_v38  ;;  %v5413_v35 = vpop.permute.xlu1 %1589 }
 0x185   :  { %v339_v36 = vpop.f32.mrf.mxu1  ;;  %v202_v12 = vpop.f32.mrf.mxu0  ;;  %v1115_v23 = vmul.f32 0.5, %v1114_v49  ;;  %7322 = vst [vmem:[#allocation12_spill] sm:$0xff] %v5413_v35 }
 0x186   :  { %v760_v50 = vmax.f32 %v720_v8, 0.0  ;;  %1420 = vrot.lane.b32.xlu1 %v1316_v39, %s4131_s21  ;;  %v340_v58 = vadd.f32 %v339_v36, %v202_v12  ;;  %v1317_v28 = vmul.f32 %v1277_v20, %v5311_v46  ;;  %v641_v46 = vmul.f32 0.0051020407, %v5107_v37 }
 0x187   :  { %3892 = vset.pattern.permute.xlu2 %v7321_v25  ;;  %v1116_v60 = vsub.f32 1.5, %v1115_v23 }
 0x188   :  { %v3977_v15 = vpop.eup %3976  ;;  %v5402_v2 = vadd.f32 1e-05, %v760_v50  ;;  %v5404_v4 = vmul.f32 0.0051020407, %v340_v58  ;;  %1864 = vperm.xlu2 %3892, %v1501_v44   ;;  %1422 = vrot.lane.b32.xlu0 %v1317_v28, %s4131_s21  ;;  %v5415_v17 = vpop.permute.xlu0 %1594  ;;  %v5420_v28 = vld [vmem:[%s7268_s2 + $0xd0] sm:$0xff] }
 0x189   :  { %v1123_v22 = vmul.f32 %v3977_v15, %v5379_v18  ;;  %v1117_v9 = vmul.f32 %v3975_v5, %v1116_v60  ;;  %7323 = vst [vmem:[#allocation13_spill] sm:$0xff] %v5415_v17  ;;  %vm1129_vm1 = vweird.f32 %v3977_v15 }
 0x18a   :  { %3978 = vrsqrt.f32 %v5402_v2  ;;  %v681_v3 = vmul.f32 %v5404_v4, %v5404_v4  ;;  %vm1130_vm3 = vmor %vm1128_vm2, %vm1129_vm1  ;;  %vm1138_vm5 = vweird.f32 %v5402_v2 }
 0x18b   :  { %v1121_v49 = vsel %vm1120_vm0, %v3975_v5, %v1117_v9  ;;  %v1124_v8 = vmul.f32 %v3977_v15, %v1123_v22 }
 0x18c   :  { %v721_v37 = vsub.f32 %v641_v46, %v681_v3  ;;  %v1278_v50 = vmul.f32 %v1121_v49, %v5420_v28  ;;  %v5435_v46 = vpop.permute.xlu1 %1394 }
 0x18d   :  { %v342_v39 = vpop.f32.mrf.mxu1  ;;  %v205_v36 = vpop.f32.mrf.mxu0  ;;  %v1125_v12 = vmul.f32 0.5, %v1124_v8 }
 0x18e   :  { %v761_v23 = vmax.f32 %v721_v37, 0.0  ;;  %1869 = vperm.xlu1 %3889, %v1502_v61   ;;  %v343_v44 = vadd.f32 %v342_v39, %v205_v36 }
 0x18f   :  { %v1126_v58 = vsub.f32 1.5, %v1125_v12  ;;  %v1318_v12 = vmul.f32 %v1278_v50, %v5334_v47 }
 0x190   :  { %v3979_v60 = vpop.eup %3978  ;;  %v5424_v17 = vadd.f32 1e-05, %v761_v23  ;;  %v5426_v35 = vmul.f32 0.0051020407, %v343_v44  ;;  %3893 = vset.pattern.permute.xlu2 %v7314_v34  ;;  %1669 = vperm.xlu0 %3888, %v1278_v50   ;;  %v5444_v23 = vpop.permute.xlu2 %1599  ;;  %v643_v50 = vmul.f32 0.0051020407, %v5127_v40 }
 0x191   :  { %v1133_v5 = vmul.f32 %v3979_v60, %v5402_v2  ;;  %1664 = vperm.xlu2 %3893, %v1277_v20   ;;  %v1127_v22 = vmul.f32 %v3977_v15, %v1126_v58  ;;  %vm1139_vm4 = vweird.f32 %v3979_v60 }
 0x192   :  { %3980 = vrsqrt.f32 %v5424_v17  ;;  %v682_v7 = vmul.f32 %v5426_v35, %v5426_v35  ;;  %vm1140_vm6 = vmor %vm1138_vm5, %vm1139_vm4  ;;  %vm1148_vm8 = vweird.f32 %v5424_v17 }
 0x193   :  { %v1134_v9 = vmul.f32 %v3979_v60, %v1133_v5  ;;  %v1397_v3 = vpop.permute.xlu0 %1396  ;;  %v1131_v20 = vsel %vm1130_vm3, %v3977_v15, %v1127_v22  ;;  %v5455_v15 = vld [vmem:[%s7268_s2 + $0xe0] sm:$0xff] }
 0x194   :  { %v722_v49 = vsub.f32 %v642_v10, %v682_v7  ;;  %v1504_v8 = vsub.f32 %v5068_v31, %v1397_v3  ;;  %v1279_v31 = vmul.f32 %v1131_v20, %v5441_v16 }
 0x195   :  { %v1135_v61 = vmul.f32 0.5, %v1134_v9  ;;  %v345_v37 = vpop.f32.mrf.mxu1  ;;  %v208_v39 = vpop.f32.mrf.mxu0 }
 0x196   :  { %v762_v36 = vmax.f32 %v722_v49, 0.0  ;;  %1879 = vperm.xlu1 %3889, %v1504_v8   ;;  %v346_v18 = vadd.f32 %v345_v37, %v208_v39 }
 0x197   :  { %v1136_v44 = vsub.f32 1.5, %v1135_v61 }
 0x198   :  { %v3981_v58 = vpop.eup %3980  ;;  %v5447_v10 = vadd.f32 1e-05, %v762_v36  ;;  %v5449_v5 = vmul.f32 0.0051020407, %v346_v18  ;;  %1424 = vrot.lane.b32.xlu0 %v1318_v12, %s4131_s21  ;;  %v5463_v49 = vpop.permute.xlu1 %1604 }
 0x199   :  { %v1137_v7 = vmul.f32 %v3979_v60, %v1136_v44  ;;  %v1143_v47 = vmul.f32 %v3981_v58, %v5424_v17  ;;  %1674 = vperm.xlu2 %3893, %v1279_v31   ;;  %v1399_v18 = vpop.permute.xlu2 %1398  ;;  %vm1149_vm7 = vweird.f32 %v3981_v58  ;;  %v1319_v44 = vmul.f32 %v1279_v31, %v5360_v43 }
 0x19a   :  { %3982 = vrsqrt.f32 %v5447_v10  ;;  %v683_v22 = vmul.f32 %v5449_v5, %v5449_v5  ;;  %vm1150_vm9 = vmor %vm1148_vm8, %vm1149_vm7  ;;  %v1505_v17 = vsub.f32 %v5097_v19, %v1399_v18  ;;  %vm1158_vm11 = vweird.f32 %v5447_v10 }
 0x19b   :  { %v1141_v9 = vsel %vm1140_vm6, %v3979_v60, %v1137_v7  ;;  %v1144_v3 = vmul.f32 %v3981_v58, %v1143_v47  ;;  %v5474_v47 = vld [vmem:[%s7268_s2 + $0xe8] sm:$0xff] }
 0x19c   :  { %v1280_v8 = vmul.f32 %v1141_v9, %v5455_v15  ;;  %v723_v20 = vsub.f32 %v643_v50, %v683_v22 }
 0x19d   :  { %v1145_v61 = vmul.f32 0.5, %v1144_v3  ;;  %v211_v2 = vpop.f32.mrf.mxu0  ;;  %v348_v37 = vpop.f32.mrf.mxu1 }
 0x19e   :  { %v1320_v39 = vmul.f32 %v1280_v8, %v5381_v11  ;;  %v763_v36 = vmax.f32 %v723_v20, 0.0  ;;  %v5467_v40 = vadd.f32 %v348_v37, %v211_v2 }
 0x19f   :  { %v1146_v12 = vsub.f32 1.5, %v1145_v61 }
 0x1a0   :  { %v3983_v60 = vpop.eup %3982  ;;  %v843_v7 = vadd.f32 1e-05, %v763_v36  ;;  %1679 = vperm.xlu0 %3888, %v1280_v8   ;;  %1428 = vrot.lane.b32.xlu1 %v1320_v39, %s4131_s21 }
 0x1a1   :  { %v1147_v50 = vmul.f32 %v3981_v58, %v1146_v12  ;;  %v1153_v11 = vmul.f32 %v3983_v60, %v5447_v10  ;;  %1426 = vrot.lane.b32.xlu2 %v1319_v44, %s4131_s21  ;;  %v5484_v2 = vpop.permute.xlu2 %1614  ;;  %vm1159_vm10 = vweird.f32 %v3983_v60  ;;  %v5507_v10 = vld [vmem:[%s7268_s2 + $0xf8] sm:$0xff] }
 0x1a2   :  { %3984 = vrsqrt.f32 %v843_v7  ;;  %3894 = vset.pattern.permute.xlu2 %v7321_v25  ;;  %vm1160_vm12 = vmor %vm1158_vm11, %vm1159_vm10  ;;  %vm1168_vm14 = vweird.f32 %v843_v7 }
 0x1a3   :  { %v1151_v43 = vsel %vm1150_vm9, %v3981_v58, %v1147_v50  ;;  %v1401_v31 = vpop.permute.xlu1 %1400  ;;  %v1154_v9 = vmul.f32 %v3983_v60, %v1153_v11 }
 0x1a4   :  { %v1281_v22 = vmul.f32 %v1151_v43, %v5474_v47  ;;  %v1506_v8 = vsub.f32 %v5122_v24, %v1401_v31  ;;  %v4040_v24 = vld [vmem:[%s7268_s2 + $0x10] sm:$0xff] }
 0x1a5   :  { %v214_v20 = vpop.f32.mrf.mxu0  ;;  %v351_v61 = vpop.f32.mrf.mxu1  ;;  %v1155_v39 = vmul.f32 0.5, %v1154_v9 }
 0x1a6   :  { %v1321_v3 = vmul.f32 %v1281_v22, %v5404_v4  ;;  %v1494_v4 = vsub.f32 %v4040_v24, %v5263_v26  ;;  %v5499_v26 = vld [vmem:[%s7268_s2 + $0xf0] sm:$0xff] }
 0x1a7   :  { %v1156_v12 = vsub.f32 1.5, %v1155_v39  ;;  %v352_v39 = vadd.f32 %v351_v61, %v214_v20  ;;  %v645_v61 = vmul.f32 0.0051020407, %v5161_v33 }
 0x1a8   :  { %v3985_v37 = vpop.eup %3984  ;;  %1889 = vperm.xlu1 %3889, %v1506_v8   ;;  %1430 = vrot.lane.b32.xlu0 %v1321_v3, %s4131_s21 }
 0x1a9   :  { %v1163_v58 = vmul.f32 %v3985_v37, %v843_v7  ;;  %1884 = vperm.xlu2 %3894, %v1505_v17   ;;  %v5491_v50 = vpop.permute.xlu2 %1404  ;;  %v1157_v19 = vmul.f32 %v3983_v60, %v1156_v12  ;;  %vm1169_vm13 = vweird.f32 %v3985_v37  ;;  %v5521_v12 = vmul.f32 0.0051020407, %v352_v39  ;;  %v4041_v39 = vld [vmem:[%s7268_s2 + $0x58] sm:$0xff] }
 0x1aa   :  { %vm1170_vm15 = vmor %vm1168_vm14, %vm1169_vm13 }
 0x1ab   :  { %v1164_v36 = vmul.f32 %v3985_v37, %v1163_v58  ;;  %v1161_v9 = vsel %vm1160_vm12, %v3983_v60, %v1157_v19  ;;  %v5513_v60 = vpop.permute.xlu0 %1609 }
 0x1ac   :  { %v1282_v8 = vmul.f32 %v1161_v9, %v5499_v26 }
 0x1ad   :  { %v1165_v44 = vmul.f32 0.5, %v1164_v36  ;;  %v217_v11 = vpop.f32.mrf.mxu0  ;;  %v354_v43 = vpop.f32.mrf.mxu1  ;;  %v646_v36 = vmul.f32 0.0051020407, %v5136_v63  ;;  %v685_v63 = vmul.f32 %v5521_v12, %v5521_v12 }
 0x1ae   :  { %v355_v31 = vadd.f32 %v354_v43, %v217_v11 }
 0x1af   :  { %v1166_v18 = vsub.f32 1.5, %v1165_v44  ;;  %v725_v19 = vsub.f32 %v645_v61, %v685_v63  ;;  %v4042_v63 = vld [vmem:[%s7268_s2 + $0x38] sm:$0xff] }
 0x1b0   :  { %1829 = vperm.xlu1 %3889, %v1494_v4   ;;  %1554 = vperm.xlu0 %3888, %v4858_v29   ;;  %v5502_v29 = vmul.f32 0.0051020407, %v355_v31  ;;  %v363_v4 = vpop.f32.mrf.mxu3 }
 0x1b1   :  { %3895 = vset.pattern.permute.xlu2 %v7314_v34  ;;  %v1167_v3 = vmul.f32 %v3985_v37, %v1166_v18 }
 0x1b2   :  { %1684 = vperm.xlu2 %3895, %v1281_v22   ;;  %v686_v58 = vmul.f32 %v5502_v29, %v5502_v29 }
 0x1b3   :  { %v1171_v22 = vsel %vm1170_vm15, %v3985_v37, %v1167_v3 }
 0x1b4   :  { %v1283_v7 = vmul.f32 %v1171_v22, %v5507_v10  ;;  %v726_v44 = vsub.f32 %v646_v36, %v686_v58  ;;  %v649_v22 = vmul.f32 0.0051020407, %v5178_v1 }
 0x1b6   :  { %v1323_v37 = vmul.f32 %v1283_v7, %v5449_v5  ;;  %v766_v5 = vmax.f32 %v726_v44, 0.0 }
 0x1b8   :  { %v5509_v17 = vpop.permute.xlu2 %1844  ;;  %3896 = vset.pattern.permute.xlu1 %v7314_v34  ;;  %1629 = vperm.xlu0 %3888, %v5243_v14   ;;  %v1322_v14 = vmul.f32 %v1282_v8, %v5426_v35  ;;  %v226_v35 = vpop.f32.mrf.mxu2  ;;  %v846_v11 = vadd.f32 1e-05, %v766_v5 }
 0x1b9   :  { %1689 = vperm.xlu1 %3896, %v1282_v8   ;;  %v765_v8 = vmax.f32 %v725_v19, 0.0 }
 0x1ba   :  { %1634 = vperm.xlu2 %3895, %v5265_v32   ;;  %v1403_v32 = vpop.permute.xlu0 %1402  ;;  %v5528_v20 = vpop.permute.xlu1 %1406  ;;  %3986 = vrsqrt.f32 %v846_v11  ;;  %vm1198_vm1 = vweird.f32 %v846_v11 }
 0x1bb   :  { %v1507_v18 = vsub.f32 %v5153_v62, %v1403_v32 }
 0x1c0   :  { %1619 = vperm.xlu0 %3888, %v5191_v52   ;;  %v364_v52 = vadd.f32 %v363_v4, %v226_v35  ;;  %v3987_v58 = vpop.eup %3986 }
 0x1c1   :  { %v5525_v24 = vpop.permute.xlu2 %1644  ;;  %1434 = vrot.lane.b32.xlu1 %v1323_v37, %s4131_s21  ;;  %vm1199_vm0 = vweird.f32 %v3987_v58 }
 0x1c2   :  { %7324 = vst [vmem:[#allocation14_spill] sm:$0xff] %v5525_v24  ;;  %1432 = vrot.lane.b32.xlu2 %v1322_v14, %s4131_s21  ;;  %3898 = vset.pattern.permute.xlu1 %v7321_v25  ;;  %v5540_v3 = vmul.f32 0.0051020407, %v364_v52  ;;  %v5542_v33 = vpop.permute.xlu1 %1408  ;;  %v1193_v14 = vmul.f32 %v3987_v58, %v846_v11  ;;  %vm1200_vm2 = vmor %vm1198_vm1, %vm1199_vm0 }
 0x1c4   :  { %v689_v62 = vmul.f32 %v5540_v3, %v5540_v3  ;;  %v1194_v5 = vmul.f32 %v3987_v58, %v1193_v14 }
 0x1c6   :  { %v729_v44 = vsub.f32 %v649_v22, %v689_v62 }
 0x1c8   :  { %3903 = vset.pattern.permute.xlu0 %v7321_v25  ;;  %v769_v1 = vmax.f32 %v729_v44, 0.0 }
 0x1c9   :  { %v1415_v43 = vpop.permute.xlu2 %1414  ;;  %1894 = vperm.xlu0 %3903, %v1507_v18  }
 0x1ca   :  { %v1513_v31 = vsub.f32 %v5302_v54, %v1415_v43  ;;  %1694 = vperm.xlu2 %3895, %v1283_v7   ;;  %v5538_v9 = vpop.permute.xlu0 %1410  ;;  %v1503_v54 = vsub.f32 %v4041_v39, %v5435_v46  ;;  %v845_v7 = vadd.f32 1e-05, %v765_v8  ;;  %v5554_v32 = vpop.permute.xlu1 %1839  ;;  %v1499_v46 = vsub.f32 %v4042_v63, %v5365_v27 }
 0x1cb   :  { %v849_v52 = vadd.f32 1e-05, %v769_v1  ;;  %v1195_v43 = vmul.f32 0.5, %v1194_v5  ;;  %v1509_v1 = vsub.f32 %v5209_v51, %v5528_v20 }
 0x1cc   :  { %1924 = vperm.xlu1 %3898, %v1513_v31   ;;  %3988 = vrsqrt.f32 %v845_v7  ;;  %v4043_v31 = vld [vmem:[%s7268_s2 + $0x18] sm:$0xff]  ;;  %vm1188_vm4 = vweird.f32 %v845_v7 }
 0x1cd   :  { %3990 = vrsqrt.f32 %v849_v52  ;;  %v1495_v8 = vsub.f32 %v4043_v31, %v5223_v30  ;;  %v1196_v62 = vsub.f32 1.5, %v1195_v43  ;;  %vm1228_vm6 = vweird.f32 %v849_v52 }
 0x1cf   :  { %v1197_v44 = vmul.f32 %v3987_v58, %v1196_v62 }
 0x1d1   :  { %v1417_v36 = vpop.permute.xlu2 %1416  ;;  %1874 = vperm.xlu0 %3903, %v1503_v54   ;;  %v1201_v5 = vsel %vm1200_vm2, %v3987_v58, %v1197_v44  ;;  %v5593_v58 = vld [vmem:[%s7268_s2 + $0x108] sm:$0xff] }
 0x1d2   :  { %v5551_v37 = vpop.permute.xlu0 %1639  ;;  %3897 = vset.pattern.permute.xlu2 %v7321_v25  ;;  %v3989_v61 = vpop.eup %3988  ;;  %v1514_v54 = vsub.f32 %v5325_v57, %v1417_v36  ;;  %7327 = vst [vmem:[#allocation17_spill] sm:$0xff] %v5593_v58 }
 0x1d3   :  { %v1183_v18 = vmul.f32 %v3989_v61, %v845_v7  ;;  %v5567_v22 = vpop.permute.xlu1 %1849  ;;  %v3991_v14 = vpop.eup %3990  ;;  %vm1189_vm3 = vweird.f32 %v3989_v61 }
 0x1d4   :  { %v1223_v30 = vmul.f32 %v3991_v14, %v849_v52  ;;  %vm1190_vm5 = vmor %vm1188_vm4, %vm1189_vm3  ;;  %vm1229_vm7 = vweird.f32 %v3991_v14  ;;  %v5613_v52 = vld [vmem:[%s7268_s2 + $0x128] sm:$0xff] }
 0x1d5   :  { %v1184_v27 = vmul.f32 %v3989_v61, %v1183_v18  ;;  %vm1230_vm8 = vmor %vm1228_vm6, %vm1229_vm7  ;;  %7329 = vst [vmem:[#allocation19_spill] sm:$0xff] %v5613_v52 }
 0x1d9   :  { %v5560_v35 = vpop.permute.xlu2 %1654  ;;  %1854 = vperm.xlu0 %3903, %v1499_v46   ;;  %v5577_v46 = vld [vmem:[%s7268_s2 + $0x110] sm:$0xff] }
 0x1da   :  { %v1413_v4 = vpop.permute.xlu0 %1412  ;;  %7325 = vst [vmem:[#allocation15_spill] sm:$0xff] %v5577_v46  ;;  %v5584_v36 = vmul.f32 %v1201_v5, %v5577_v46 }
 0x1db   :  { %v1512_v19 = vsub.f32 %v5284_v53, %v1413_v4  ;;  %v1185_v53 = vmul.f32 0.5, %v1184_v27 }
 0x1dc   :  { %7326 = vst [vmem:[#allocation16_spill] sm:$0xff] %v5584_v36  ;;  %v1326_v20 = vmul.f32 %v5584_v36, %v5502_v29 }
 0x1dd   :  { %1919 = vperm.xlu2 %3897, %v1512_v19   ;;  %v1186_v63 = vsub.f32 1.5, %v1185_v53  ;;  %v1224_v19 = vmul.f32 %v3991_v14, %v1223_v30 }
 0x1df   :  { %v1187_v51 = vmul.f32 %v3989_v61, %v1186_v63  ;;  %v1225_v18 = vmul.f32 0.5, %v1224_v19 }
 0x1e1   :  { %1834 = vperm.xlu0 %3903, %v1495_v8   ;;  %v1191_v43 = vsel %vm1190_vm5, %v3989_v61, %v1187_v51  ;;  %v1226_v62 = vsub.f32 1.5, %v1225_v18  ;;  %v229_v51 = vpop.f32.mrf.mxu2 }
 0x1e2   :  { %v5569_v39 = vpop.permute.xlu2 %1864  ;;  %v5581_v57 = vpop.permute.xlu0 %1649  ;;  %v5601_v7 = vmul.f32 %v1191_v43, %v5593_v58 }
 0x1e4   :  { %7328 = vst [vmem:[#allocation18_spill] sm:$0xff] %v5601_v7  ;;  %v1325_v61 = vmul.f32 %v5601_v7, %v5521_v12 }
 0x1e5   :  { %1929 = vperm.xlu2 %3897, %v1514_v54  }
 0x1e8   :  { %v5579_v4 = vpop.permute.xlu1 %1859 }
 0x1e9   :  { %1904 = vperm.xlu0 %3903, %v1509_v1  }
 0x1eb   :  { %v5586_v11 = vpop.permute.xlu2 %1664 }
 0x1f0   :  { %v1419_v31 = vpop.permute.xlu1 %1418  ;;  %v5597_v27 = vpop.permute.xlu0 %1659 }
 0x1f1   :  { %v1515_v8 = vsub.f32 %v5351_v6, %v1419_v31  ;;  %1440 = vrot.lane.b32.xlu0 %v1326_v20, %s4131_s21  ;;  %v1227_v6 = vmul.f32 %v3991_v14, %v1226_v62  ;;  %v366_v20 = vpop.f32.mrf.mxu3  ;;  %v4045_v31 = vld [vmem:[%s7267_s0 + $0xc8] sm:$0xff] }
 0x1f2   :  { %3909 = vset.pattern.permute.xlu0 %v7314_v34  ;;  %v367_v18 = vadd.f32 %v366_v20, %v229_v51 }
 0x1f3   :  { %v5603_v29 = vpop.permute.xlu2 %1674  ;;  %1934 = vperm.xlu1 %3898, %v1515_v8   ;;  %v1231_v63 = vsel %vm1230_vm8, %v3991_v14, %v1227_v6  ;;  %v4044_v14 = vld [vmem:[%s7267_s0 + $0xd8] sm:$0xff]  ;;  %v1762_v8 = vmul.f32 %v4045_v31, %v5444_v23 }
 0x1f4   :  { %v5616_v12 = vmul.f32 %v1231_v63, %v5613_v52  ;;  %v1764_v43 = vmul.f32 %v4044_v14, %v5463_v49  ;;  %v648_v14 = vmul.f32 0.0051020407, %v5194_v45 }
 0x1f8   :  { %v1421_v54 = vpop.permute.xlu1 %1420 }
 0x1f9   :  { %v1516_v53 = vsub.f32 %v5373_v56, %v1421_v54  ;;  %1438 = vrot.lane.b32.xlu0 %v1325_v61, %s4131_s21  ;;  %v5637_v61 = vmul.f32 0.0051020407, %v367_v18 }
 0x1fa   :  { %v1423_v44 = vpop.permute.xlu0 %1422 }
 0x1fb   :  { %v1517_v1 = vsub.f32 %v5389_v38, %v1423_v44  ;;  %v1427_v30 = vpop.permute.xlu2 %1426  ;;  %1939 = vperm.xlu2 %3897, %v1516_v53   ;;  %v690_v51 = vmul.f32 %v5637_v61, %v5637_v61 }
 0x1fc   :  { %v1519_v38 = vsub.f32 %v5441_v16, %v1427_v30  ;;  %v5643_v30 = vmul.f32 0.0051020407, %v5045_v48 }
 0x1fd   :  { %1944 = vperm.xlu1 %3898, %v1517_v1  }
 0x1fe   :  { %v688_v18 = vmul.f32 %v5643_v30, %v5643_v30 }
 0x200   :  { %v5618_v5 = vpop.permute.xlu1 %1869 }
 0x201   :  { %1724 = vperm.xlu0 %3909, %v5616_v12  }
 0x202   :  { %v5621_v56 = vpop.permute.xlu0 %1669 }
 0x203   :  { %v5624_v19 = vpop.permute.xlu2 %1884 }
 0x204   :  { %v2044_v16 = vadd.f32 %v5624_v19, %v1764_v43 }
 0x205   :  { %1954 = vperm.xlu1 %3898, %v1519_v38   ;;  %v650_v38 = vmul.f32 0.0051020407, %v5164_v21 }
 0x206   :  { %v2124_v53 = vmax.f32 %v2044_v16, 0.0 }
 0x207   :  { %v730_v43 = vsub.f32 %v650_v38, %v690_v51 }
 0x208   :  { %v5635_v62 = vpop.permute.xlu1 %1879 }
 0x209   :  { %v2042_v54 = vadd.f32 %v5635_v62, %v1762_v8  ;;  %3910 = vset.pattern.permute.xlu0 %v7321_v25  ;;  %v728_v8 = vsub.f32 %v648_v14, %v688_v18  ;;  %v770_v21 = vmax.f32 %v730_v43, 0.0 }
 0x20a   :  { %v1425_v6 = vpop.permute.xlu0 %1424 }
 0x20b   :  { %v2122_v44 = vmax.f32 %v2042_v54, 0.0  ;;  %v1518_v1 = vsub.f32 %v5420_v28, %v1425_v6  ;;  %v768_v54 = vmax.f32 %v728_v8, 0.0  ;;  %v5660_v6 = vadd.f32 1e-05, %v770_v21  ;;  %v232_v8 = vpop.f32.mrf.mxu2  ;;  %v369_v21 = vpop.f32.mrf.mxu3 }
 0x20c   :  { %v5645_v63 = vpop.permute.xlu2 %1684 }
 0x20d   :  { %7330 = vst [vmem:[#allocation20_spill] sm:$0xff] %v5645_v63  ;;  %v5650_v20 = vpack.c.bf16 %v2124_v53, %v2122_v44  ;;  %1949 = vperm.xlu2 %3897, %v1518_v1   ;;  %v4046_v53 = vld [vmem:[%s7267_s0 + $0xe8] sm:$0xff]  ;;  %v220_v44 = vpop.f32.mrf.mxu0  ;;  %v357_v1 = vpop.f32.mrf.mxu1  ;;  %v5672_v14 = vadd.f32 1e-05, %v768_v54  ;;  %3992 = vrsqrt.f32 %v5660_v6  ;;  %vm1238_vm9 = vweird.f32 %v5660_v6 }
 0x20e   :  { %v1766_v45 = vmul.f32 %v4046_v53, %v5513_v60  ;;  %v358_v43 = vadd.f32 %v357_v1, %v220_v44 }
 0x20f   :  { %7331 = vst [vmem:[#allocation21_spill] sm:$0xff] %v5650_v20  ;;  %3994 = vrsqrt.f32 %v5672_v14  ;;  %vm1218_vm12 = vweird.f32 %v5672_v14 }
 0x210   :  { %v5677_v53 = vmul.f32 0.0051020407, %v358_v43 }
 0x212   :  { %v5655_v28 = vpop.permute.xlu0 %1679  ;;  %v1429_v48 = vpop.permute.xlu1 %1428  ;;  %v687_v44 = vmul.f32 %v5677_v53, %v5677_v53 }
 0x213   :  { %v1520_v31 = vsub.f32 %v5455_v15, %v1429_v48  ;;  %v5683_v54 = vpop.eup %3992 }
 0x214   :  { %v5658_v16 = vpop.permute.xlu2 %1634  ;;  %vm1239_vm10 = vweird.f32 %v5683_v54 }
 0x215   :  { %7332 = vst [vmem:[#allocation22_spill] sm:$0xff] %v5658_v16  ;;  %1959 = vperm.xlu2 %3897, %v1520_v31   ;;  %vm5743_vm11 = vmor %vm1238_vm9, %vm1239_vm10  ;;  %vm2449_vm10 = vcmask 523264  }
 0x21a   :  { %v5666_v38 = vpop.permute.xlu1 %1889  ;;  %v1431_v51 = vpop.permute.xlu0 %1430 }
 0x21b   :  { %v5669_v15 = vadd.f32 %v5666_v38, %v1766_v45  ;;  %v1521_v18 = vsub.f32 %v5474_v47, %v1431_v51  ;;  %v370_v45 = vadd.f32 %v369_v21, %v232_v8  ;;  %v647_v51 = vmul.f32 0.0051020407, %v5132_v13 }
 0x21c   :  { %v1433_v48 = vpop.permute.xlu2 %1432  ;;  %v651_v8 = vmul.f32 0.0051020407, %v5231_v42 }
 0x21d   :  { %v1522_v31 = vsub.f32 %v5499_v26, %v1433_v48  ;;  %1964 = vperm.xlu1 %3898, %v1521_v18   ;;  %v5687_v1 = vmul.f32 0.0051020407, %v370_v45  ;;  %v5689_v26 = vpop.eup %3994  ;;  %v1233_v18 = vmul.f32 %v5683_v54, %v5660_v6  ;;  %v727_v43 = vsub.f32 %v647_v51, %v687_v44  ;;  %v5760_v6 = vld [vmem:[%s7268_s2 + $0x8] sm:$0xff] }
 0x21e   :  { %v1213_v48 = vmul.f32 %v5689_v26, %v5672_v14  ;;  %vm1219_vm13 = vweird.f32 %v5689_v26 }
 0x21f   :  { %1969 = vperm.xlu2 %3897, %v1522_v31   ;;  %v691_v31 = vmul.f32 %v5687_v1, %v5687_v1  ;;  %v1234_v21 = vmul.f32 %v5683_v54, %v1233_v18  ;;  %v767_v36 = vmax.f32 %v727_v43, 0.0  ;;  %vm5882_vm14 = vmor %vm1218_vm12, %vm1219_vm13 }
 0x220   :  { %v1214_v52 = vmul.f32 %v5689_v26, %v1213_v48 }
 0x221   :  { %v731_v44 = vsub.f32 %v651_v8, %v691_v31  ;;  %v1235_v51 = vmul.f32 0.5, %v1234_v21  ;;  %v5713_v42 = vadd.f32 1e-05, %v767_v36  ;;  %v5721_v31 = vmul.f32 0.0051020407, %v5467_v40  ;;  %v4049_v40 = vld [vmem:[%s7267_s0 + $0x148] sm:$0xff] }
 0x222   :  { %v5679_v7 = vpop.permute.xlu1 %1829  ;;  %v5681_v47 = vpop.permute.xlu0 %1554  ;;  %v1215_v18 = vmul.f32 0.5, %v1214_v52 }
 0x223   :  { %v771_v58 = vmax.f32 %v731_v44, 0.0  ;;  %v1236_v43 = vsub.f32 1.5, %v1235_v51  ;;  %3996 = vrsqrt.f32 %v5713_v42  ;;  %v1778_v44 = vmul.f32 %v4049_v40, %v5551_v37 }
 0x224   :  { %v5711_v16 = vpop.permute.xlu2 %1694  ;;  %v1216_v36 = vsub.f32 1.5, %v1215_v18  ;;  %v4050_v18 = vld [vmem:[%s7267_s0 + $0xe0] sm:$0xff]  ;;  %vm1208_vm1 = vweird.f32 %v5713_v42 }
 0x225   :  { %7335 = vst [vmem:[#allocation25_spill] sm:$0xff] %v5711_v16  ;;  %v5725_v8 = vadd.f32 1e-05, %v771_v58  ;;  %v5728_v52 = vmul.f32 %v5683_v54, %v1236_v43  ;;  %v4056_v58 = vld [vmem:[%s7267_s0 + $0xa0] sm:$0xff] }
 0x227   :  { %3899 = vset.pattern.permute.xlu2 %v7314_v34  ;;  %3998 = vrsqrt.f32 %v5725_v8  ;;  %v1241_v40 = vsel %vm5743_vm11, %v5683_v54, %v5728_v52  ;;  %v4055_v54 = vld [vmem:[%s7267_s0 + $0x80] sm:$0xff]  ;;  %vm1248_vm0 = vweird.f32 %v5725_v8 }
 0x228   :  { %1539 = vperm.xlu2 %3899, %v4803_v59   ;;  %v4047_v59 = vld [vmem:[%s7268_s2 + $0x90] sm:$0xff]  ;;  %v1753_v52 = vmul.f32 %v4055_v54, %v5355_v55  ;;  %v4058_v54 = vld [vmem:[%s7267_s0 + $0x158] sm:$0xff] }
 0x229   :  { %v1510_v20 = vsub.f32 %v4047_v59, %v5542_v33  ;;  %v684_v59 = vmul.f32 %v5721_v31, %v5721_v31  ;;  %v1780_v55 = vmul.f32 %v4058_v54, %v5525_v24 }
 0x22a   :  { %v5702_v45 = vpop.permute.xlu0 %1629 }
 0x22b   :  { %7333 = vst [vmem:[#allocation23_spill] sm:$0xff] %v5702_v45  ;;  %v5704_v13 = vpop.permute.xlu1 %1689 }
 0x22c   :  { %7334 = vst [vmem:[#allocation24_spill] sm:$0xff] %v5704_v13 }
 0x230   :  { %3901 = vset.pattern.permute.xlu2 %v7321_v25 }
 0x231   :  { %1909 = vperm.xlu2 %3901, %v1510_v20   ;;  %v4048_v20 = vld [vmem:[%s7267_s0 + $0x140] sm:$0xff] }
 0x232   :  { %v5716_v46 = vpop.permute.xlu0 %1619  ;;  %v1777_v21 = vmul.f32 %v4048_v20, %v5551_v37  ;;  %v1765_v37 = vmul.f32 %v4050_v18, %v5513_v60  ;;  %v4052_v60 = vld [vmem:[%s7267_s0 + $0xc0] sm:$0xff] }
 0x233   :  { %7336 = vst [vmem:[#allocation26_spill] sm:$0xff] %v5716_v46  ;;  %v1435_v48 = vpop.permute.xlu1 %1434  ;;  %v1761_v20 = vmul.f32 %v4052_v60, %v5444_v23  ;;  %v7340_v60 = vld [vmem:[#allocation4_spill] sm:$0xff] }
 0x234   :  { %v1523_v33 = vsub.f32 %v5507_v10, %v1435_v48  ;;  %v5739_v10 = vmul.f32 0.0051020407, %v5101_v41  ;;  %v2045_v18 = vadd.f32 %v5666_v38, %v1765_v37  ;;  %v4057_v38 = vld [vmem:[%s7267_s0 + $0xd0] sm:$0xff] }
 0x235   :  { %v1763_v37 = vmul.f32 %v4057_v38, %v5463_v49  ;;  %v4059_v49 = vld [vmem:[%s7267_s0 + $0x160] sm:$0xff] }
 0x236   :  { %1974 = vperm.xlu1 %3898, %v1523_v33   ;;  %v5765_v33 = vmul.f32 %v5689_v26, %v1216_v36  ;;  %v4053_v36 = vld [vmem:[%s7267_s0 + $0xf0] sm:$0xff]  ;;  %v724_v48 = vsub.f32 %v5739_v10, %v684_v59  ;;  %v4060_v10 = vld [vmem:[%s7267_s0 + $0x168] sm:$0xff]  ;;  %v2125_v38 = vmax.f32 %v2045_v18, 0.0 }
 0x237   :  { %v1920_v51 = vpop.permute.xlu2 %1919  ;;  %v1782_v59 = vmul.f32 %v4060_v10, %v5581_v57  ;;  %v5839_v10 = vld [vmem:[%s7268_s2 + $0x130] sm:$0xff] }
 0x238   :  { %v5753_v43 = vadd.f32 %v1920_v51, %v1777_v21  ;;  %v5755_v41 = vadd.f32 %v1920_v51, %v1778_v44  ;;  %v5773_v21 = vpop.eup %3996  ;;  %v1767_v44 = vmul.f32 %v4053_v36, %v5484_v2  ;;  %v4054_v51 = vld [vmem:[%s7267_s0 + $0xf8] sm:$0xff]  ;;  %v7341_v36 = vld [vmem:[#allocation12_spill] sm:$0xff]  ;;  %v764_v13 = vmax.f32 %v724_v48, 0.0 }
 0x239   :  { %3904 = vset.pattern.permute.xlu2 %v7314_v34  ;;  %v1768_v23 = vmul.f32 %v4054_v51, %v5484_v2  ;;  %v1757_v2 = vmul.f32 %v4056_v58, %v7341_v36  ;;  %v2041_v51 = vadd.f32 %v5635_v62, %v1761_v20  ;;  %v1203_v58 = vmul.f32 %v5773_v21, %v5713_v42  ;;  %v5824_v24 = vpop.eup %3998  ;;  %v5961_v42 = vld [vmem:[%s7268_s2 + $0x118] sm:$0xff] }
 0x23a   :  { %7339 = vst [vmem:[#allocation27_spill] sm:$0xff] %v5753_v43  ;;  %1624 = vperm.xlu2 %3904, %v7340_v60   ;;  %v1781_v62 = vmul.f32 %v4059_v49, %v5581_v57  ;;  %v2043_v20 = vadd.f32 %v5624_v19, %v1763_v37  ;;  %v4061_v49 = vld [vmem:[%s7267_s0 + $0xa8] sm:$0xff]  ;;  %v4062_v57 = vld [vmem:[%s7267_s0 + $0xb0] sm:$0xff]  ;;  %v7343_v19 = vld [vmem:[#allocation13_spill] sm:$0xff]  ;;  %v5857_v48 = vmul.f32 %v1241_v40, %v5839_v10  ;;  %vm1209_vm15 = vweird.f32 %v5773_v21 }
 0x23b   :  { %v1895_v60 = vpop.permute.xlu0 %1894  ;;  %v1758_v16 = vmul.f32 %v4061_v49, %v7341_v36  ;;  %v7344_v37 = vld [vmem:[#allocation2_spill] sm:$0xff]  ;;  %vm1249_vm2 = vweird.f32 %v5824_v24  ;;  %vm5950_vm3 = vmor %vm1208_vm1, %vm1209_vm15 }
 0x23c   :  { %v2047_v46 = vadd.f32 %v1895_v60, %v1767_v44  ;;  %v2048_v43 = vadd.f32 %v1895_v60, %v1768_v23  ;;  %v2126_v44 = vmax.f32 %v5669_v15, 0.0  ;;  %v1759_v15 = vmul.f32 %v4062_v57, %v7343_v19  ;;  %vm5990_vm4 = vmor %vm1248_vm0, %vm1249_vm2 }
 0x23e   :  { %v2127_v23 = vmax.f32 %v2047_v46, 0.0  ;;  %v2128_v60 = vmax.f32 %v2048_v43, 0.0  ;;  %v5821_v54 = vpop.permute.xlu1 %1924  ;;  %3900 = vset.pattern.permute.xlu1 %v7314_v34  ;;  %v2121_v46 = vmax.f32 %v2041_v51, 0.0  ;;  %v1204_v51 = vmul.f32 %v5773_v21, %v1203_v58  ;;  %v4064_v58 = vld [vmem:[%s7267_s0 + $0x90] sm:$0xff] }
 0x23f   :  { %7342 = vst [vmem:[#allocation4_spill] sm:$0xff] %v5821_v54  ;;  %v2060_v43 = vadd.f32 %v5821_v54, %v1780_v55  ;;  %v1930_v18 = vpop.permute.xlu2 %1929  ;;  %1544 = vperm.xlu1 %3900, %v7344_v37   ;;  %v2138_v55 = vmax.f32 %v5755_v41, 0.0  ;;  %v4063_v37 = vld [vmem:[%s7267_s0 + $0xb8] sm:$0xff]  ;;  %v1243_v41 = vmul.f32 %v5824_v24, %v5725_v8 }
 0x240   :  { %v5841_v63 = vpack.c.bf16 %v2128_v60, %v2126_v44  ;;  %v5843_v36 = vadd.f32 %v1930_v18, %v1781_v62  ;;  %v5845_v49 = vadd.f32 %v1930_v18, %v1782_v59  ;;  %v2271_v45 = vpack.c.bf16 %v2127_v23, %v2125_v38  ;;  %v7345_v59 = vld [vmem:[#allocation11_spill] sm:$0xff]  ;;  %v4065_v18 = vld [vmem:[%s7268_s2 + $0x98] sm:$0xff] }
 0x241   :  { %v2140_v57 = vmax.f32 %v2060_v43, 0.0  ;;  %v1760_v54 = vmul.f32 %v4063_v37, %v7343_v19  ;;  %v2037_v44 = vadd.f32 %v5618_v5, %v1757_v2  ;;  %v2038_v62 = vadd.f32 %v5618_v5, %v1758_v16 }
 0x242   :  { %v2123_v60 = vmax.f32 %v2043_v20, 0.0  ;;  %3905 = vset.pattern.permute.xlu2 %v7321_v25  ;;  %2474 = vmatpush.bf16.msrb.mxu2 %v2271_v45  ;;  %v1755_v38 = vmul.f32 %v4064_v58, %v7345_v59  ;;  %v7346_v5 = vsub.f32 %v5760_v6, %v5198_v0  ;;  %v2033_v45 = vadd.f32 %v5579_v4, %v1753_v52 }
 0x243   :  { %v5865_v23 = vpack.c.bf16 %v2140_v57, %v2138_v55  ;;  %v1875_v16 = vpop.permute.xlu0 %1874  ;;  %v5871_v19 = vadd.f32 1e-05, %v764_v13  ;;  %v1205_v43 = vmul.f32 0.5, %v1204_v51  ;;  %v1511_v55 = vsub.f32 %v4065_v18, %v5538_v9  ;;  %v4066_v9 = vld [vmem:[%s7267_s0 + $0x60] sm:$0xff] }
 0x244   :  { %1824 = vperm.xlu2 %3905, %v7346_v5   ;;  %v2039_v40 = vadd.f32 %v1875_v16, %v1759_v15  ;;  %v2040_v2 = vadd.f32 %v1875_v16, %v1760_v54  ;;  %v2269_v20 = vpack.c.bf16 %v2123_v60, %v2121_v46  ;;  %v2035_v57 = vadd.f32 %v5569_v39, %v1755_v38  ;;  %v7349_v46 = vld [vmem:[#allocation9_spill] sm:$0xff]  ;;  %v4068_v38 = vld [vmem:[%s7267_s0 + $0x70] sm:$0xff] }
 0x245   :  { %v2117_v6 = vmax.f32 %v2037_v44, 0.0  ;;  %v2118_v13 = vmax.f32 %v2038_v62, 0.0  ;;  %v1244_v15 = vmul.f32 %v5824_v24, %v1243_v41  ;;  %v1749_v51 = vmul.f32 %v4066_v9, %v7349_v46  ;;  %v4067_v62 = vld [vmem:[%s7267_s0 + $0x40] sm:$0xff]  ;;  %v7351_v5 = vld [vmem:[#allocation8_spill] sm:$0xff] }
 0x246   :  { %v2119_v52 = vmax.f32 %v2039_v40, 0.0  ;;  %v2120_v54 = vmax.f32 %v2040_v2, 0.0  ;;  %2475 = vmatpush.bf16.msrb.mxu2 %v2269_v20  ;;  %v2113_v60 = vmax.f32 %v2033_v45, 0.0  ;;  %v1330_v44 = vmul.f32 %v5857_v48, %v5637_v61  ;;  %v7350_v41 = vld [vmem:[#allocation6_spill] sm:$0xff] }
 0x247   :  { %3902 = vset.pattern.permute.xlu1 %v7321_v25  ;;  %v1745_v58 = vmul.f32 %v4067_v62, %v7350_v41  ;;  %v1751_v16 = vmul.f32 %v4068_v38, %v7351_v5  ;;  %v1221_v45 = vsel %vm5882_vm14, %v5689_v26, %v5765_v33  ;;  %4000 = vrsqrt.f32 %v5871_v19  ;;  %v5913_v20 = vld [vmem:[%s7268_s2 + $0x120] sm:$0xff] }
 0x248   :  { %v5892_v14 = vpack.c.bf16 %v2120_v54, %v2118_v13  ;;  %1914 = vperm.xlu1 %3902, %v1511_v55   ;;  %v2267_v37 = vpack.c.bf16 %v2119_v52, %v2117_v6  ;;  %v1206_v61 = vsub.f32 1.5, %v1205_v43  ;;  %v2029_v40 = vadd.f32 %v5567_v22, %v1749_v51  ;;  %v4069_v55 = vld [vmem:[%s7267_s0 + $0x50] sm:$0xff]  ;;  %v7352_v6 = vld [vmem:[#allocation7_spill] sm:$0xff]  ;;  %v4070_v13 = vld [vmem:[%s7268_s2] sm:$0xff] }
 0x249   :  { %v2115_v2 = vmax.f32 %v2035_v57, 0.0  ;;  %v1245_v18 = vmul.f32 0.5, %v1244_v15  ;;  %v1747_v0 = vmul.f32 %v4069_v55, %v7352_v6  ;;  %v2025_v26 = vadd.f32 %v5554_v32, %v1745_v58  ;;  %v7353_v52 = vld [vmem:[#allocation3_spill] sm:$0xff]  ;;  %v4071_v62 = vld [vmem:[%s7267_s0 + $0x20] sm:$0xff]  ;;  %v7354_v58 = vld [vmem:[#allocation5_spill] sm:$0xff] }
 0x24a   :  { %2476 = vmatpush.bf16.msrb.mxu2 %v2267_v37  ;;  %v1492_v54 = vsub.f32 %v4070_v13, %v7353_v52  ;;  %v5931_v9 = vmul.f32 %v1221_v45, %v5913_v20  ;;  %v1207_v51 = vmul.f32 %v5773_v21, %v1206_v61  ;;  %v1741_v38 = vmul.f32 %v4071_v62, %v7354_v58  ;;  %v4073_v13 = vld [vmem:[%s7267_s0 + $0x30] sm:$0xff] }
 0x24b   :  { %v5921_v33 = vpop.permute.xlu0 %1854  ;;  %v2265_v57 = vpack.c.bf16 %v2115_v2, %v2113_v60  ;;  %v2027_v15 = vadd.f32 %v5509_v17, %v1747_v0  ;;  %v2109_v60 = vmax.f32 %v2029_v40, 0.0  ;;  %v2105_v2 = vmax.f32 %v2025_v26, 0.0 }
 0x24c   :  { %1448 = vrot.lane.b32.xlu2 %v1330_v44, %s4131_s21  ;;  %v2031_v43 = vadd.f32 %v5921_v33, %v1751_v16  ;;  %v1246_v44 = vsub.f32 1.5, %v1245_v18  ;;  %v4072_v16 = vld [vmem:[%s7267_s0 + $0x28] sm:$0xff]  ;;  %v2021_v55 = vadd.f32 %v5679_v7, %v1741_v38  ;;  %v1328_v26 = vmul.f32 %v5931_v9, %v5643_v30 }
 0x24d   :  { %3906 = vset.pattern.permute.xlu2 %v7314_v34  ;;  %v1742_v45 = vmul.f32 %v4072_v16, %v7354_v58  ;;  %v5943_v61 = vpop.eup %4000  ;;  %v1743_v52 = vmul.f32 %v4073_v13, %v5681_v47  ;;  %v4077_v16 = vld [vmem:[%s7268_s2 + $0x80] sm:$0xff]  ;;  %vm1178_vm6 = vweird.f32 %v5871_v19 }
 0x24e   :  { %v2111_v37 = vmax.f32 %v2031_v43, 0.0  ;;  %2477 = vmatpush.bf16.msrb.mxu2 %v2265_v57  ;;  %v2107_v43 = vmax.f32 %v2027_v15, 0.0  ;;  %v1211_v57 = vsel %vm5950_vm3, %v5773_v21, %v1207_v51  ;;  %v1247_v51 = vmul.f32 %v5824_v24, %v1246_v44 }
 0x24f   :  { %v2022_v0 = vadd.f32 %v5679_v7, %v1742_v45  ;;  %v4074_v7 = vld [vmem:[%s7267_s0 + $0x38] sm:$0xff]  ;;  %v1508_v45 = vsub.f32 %v4077_v16, %v5491_v50  ;;  %vm1179_vm5 = vweird.f32 %v5943_v61 }
 0x250   :  { %1819 = vperm.xlu1 %3902, %v1492_v54   ;;  %v2263_v40 = vpack.c.bf16 %v2111_v37, %v2109_v60  ;;  %v1744_v30 = vmul.f32 %v4074_v7, %v5681_v47  ;;  %v1173_v54 = vmul.f32 %v5943_v61, %v5871_v19  ;;  %v2261_v21 = vpack.c.bf16 %v2107_v43, %v2105_v2  ;;  %v4075_v37 = vld [vmem:[%s7267_s0 + $0x180] sm:$0xff]  ;;  %v4076_v47 = vld [vmem:[%s7267_s0 + $0x188] sm:$0xff]  ;;  %v6005_v7 = vld [vmem:[%s7268_s2 + $0x138] sm:$0xff] }
 0x251   :  { %v1785_v60 = vmul.f32 %v4075_v37, %v5597_v27  ;;  %v1786_v62 = vmul.f32 %v4076_v47, %v5597_v27  ;;  %v5999_v2 = vmul.f32 %v1211_v57, %v5961_v42  ;;  %v2101_v27 = vmax.f32 %v2021_v55, 0.0  ;;  %vm1180_vm7 = vmor %vm1178_vm6, %vm1179_vm5  ;;  %v4080_v47 = vld [vmem:[%s7267_s0 + $0x1a8] sm:$0xff] }
 0x252   :  { %2478 = vmatpush.bf16.msrb.mxu2 %v2263_v40  ;;  %v2102_v40 = vmax.f32 %v2022_v0, 0.0  ;;  %v1251_v50 = vsel %vm5990_vm4, %v5824_v24, %v1247_v51  ;;  %v1329_v37 = vmul.f32 %v5616_v12, %v5540_v3 }
 0x253   :  { %v1835_v15 = vpop.permute.xlu0 %1834  ;;  %v1327_v0 = vmul.f32 %v5999_v2, %v5677_v53  ;;  %v4078_v53 = vld [vmem:[%s7267_s0 + $0x178] sm:$0xff] }
 0x254   :  { %1444 = vrot.lane.b32.xlu2 %v1328_v26, %s4131_s21  ;;  %v2023_v58 = vadd.f32 %v1835_v15, %v1743_v52  ;;  %v2024_v38 = vadd.f32 %v1835_v15, %v1744_v30  ;;  %v1174_v52 = vmul.f32 %v5943_v61, %v1173_v54  ;;  %v1291_v30 = vmul.f32 %v1251_v50, %v6005_v7 }
 0x255   :  { %v1940_v18 = vpop.permute.xlu2 %1939  ;;  %v1784_v51 = vmul.f32 %v4078_v53, %v5560_v35 }
 0x256   :  { %v2103_v26 = vmax.f32 %v2023_v58, 0.0  ;;  %v2104_v43 = vmax.f32 %v2024_v38, 0.0  ;;  %v2065_v13 = vadd.f32 %v1940_v18, %v1785_v60  ;;  %v2066_v8 = vadd.f32 %v1940_v18, %v1786_v62  ;;  %2479 = vmatpush.bf16.msrb.mxu2 %v2261_v21  ;;  %v4079_v60 = vld [vmem:[%s7267_s0 + $0x1a0] sm:$0xff]  ;;  %v4082_v18 = vld [vmem:[%s7267_s0 + $0x198] sm:$0xff] }
 0x257   :  { %v1175_v54 = vmul.f32 0.5, %v1174_v52  ;;  %v1331_v15 = vmul.f32 %v1291_v30, %v5687_v1  ;;  %v1790_v62 = vmul.f32 %v4080_v47, %v5621_v56  ;;  %v6043_v58 = vld [vmem:[%s7268_s2 + $0x100] sm:$0xff]  ;;  %v2142_v38 = vmax.f32 %v5845_v49, 0.0 }
 0x258   :  { %v6010_v57 = vpack.c.bf16 %v2104_v43, %v2102_v40  ;;  %1899 = vperm.xlu1 %3902, %v1508_v45   ;;  %v2259_v55 = vpack.c.bf16 %v2103_v26, %v2101_v27  ;;  %v1788_v26 = vmul.f32 %v4082_v18, %v5586_v11  ;;  %v4083_v43 = vld [vmem:[%s7267_s0 + $0x1c8] sm:$0xff] }
 0x259   :  { %v1176_v21 = vsub.f32 1.5, %v1175_v54  ;;  %v1794_v52 = vmul.f32 %v4083_v43, %v5655_v28 }
 0x25a   :  { %2480 = vmatpush.bf16.msrb.mxu2 %v2259_v55 }
 0x25b   :  { %v1177_v24 = vmul.f32 %v5943_v61, %v1176_v21  ;;  %v2146_v21 = vmax.f32 %v2066_v8, 0.0  ;;  %v4086_v8 = vld [vmem:[%s7267_s0 + $0x1e8] sm:$0xff] }
 0x25c   :  { %1442 = vrot.lane.b32.xlu2 %v1327_v0, %s4131_s21 }
 0x25d   :  { %v1181_v3 = vsel %vm1180_vm7, %v5943_v61, %v1177_v24  ;;  %v4081_v61 = vld [vmem:[%s7267_s0 + $0x190] sm:$0xff] }
 0x25e   :  { %v6049_v27 = vmul.f32 %v1181_v3, %v6043_v58  ;;  %v1787_v49 = vmul.f32 %v4081_v61, %v5586_v11 }
 0x260   :  { %1450 = vrot.lane.b32.xlu1 %v1331_v15, %s4131_s21  ;;  %v1324_v40 = vmul.f32 %v6049_v27, %v5721_v31  ;;  %v2145_v15 = vmax.f32 %v2065_v13, 0.0 }
 0x261   :  { %3907 = vset.pattern.permute.xlu1 %v7314_v34 }
 0x264   :  { %1729 = vperm.xlu2 %3906, %v5857_v48   ;;  %v1789_v48 = vmul.f32 %v4079_v60, %v5621_v56 }
 0x265   :  { %v6027_v1 = vpop.permute.xlu1 %1934 }
 0x266   :  { %v2064_v19 = vadd.f32 %v6027_v1, %v1784_v51 }
 0x267   :  { %v1950_v12 = vpop.permute.xlu2 %1949 }
 0x268   :  { %v2144_v44 = vmax.f32 %v2064_v19, 0.0  ;;  %v2069_v16 = vadd.f32 %v1950_v12, %v1789_v48  ;;  %v2070_v45 = vadd.f32 %v1950_v12, %v1790_v62  ;;  %1446 = vrot.lane.b32.xlu1 %v1329_v37, %s4131_s21  ;;  %v4084_v37 = vld [vmem:[%s7267_s0 + $0x1b0] sm:$0xff]  ;;  %v4085_v48 = vld [vmem:[%s7267_s0 + $0x1b8] sm:$0xff] }
 0x269   :  { %v1791_v60 = vmul.f32 %v4084_v37, %v5603_v29  ;;  %v1792_v47 = vmul.f32 %v4085_v48, %v5603_v29  ;;  %v7359_v62 = vld [vmem:[#allocation24_spill] sm:$0xff] }
 0x26a   :  { %v6051_v56 = vpack.c.bf16 %v2144_v44, %v2142_v38  ;;  %v1798_v19 = vmul.f32 %v4086_v8, %v7359_v62  ;;  %v2149_v38 = vmax.f32 %v2069_v16, 0.0  ;;  %v7360_v16 = vld [vmem:[#allocation23_spill] sm:$0xff] }
 0x26c   :  { %3908 = vset.pattern.permute.xlu2 %v7321_v25 }
 0x26f   :  { %v1960_v50 = vpop.permute.xlu2 %1959  ;;  %v1945_v31 = vpop.permute.xlu1 %1944 }
 0x270   :  { %v2074_v55 = vadd.f32 %v1960_v50, %v1794_v52  ;;  %v2067_v0 = vadd.f32 %v1945_v31, %v1787_v49  ;;  %v2068_v54 = vadd.f32 %v1945_v31, %v1788_v26  ;;  %1436 = vrot.lane.b32.xlu1 %v1324_v40, %s4131_s21  ;;  %v2150_v40 = vmax.f32 %v2070_v45, 0.0  ;;  %v4088_v31 = vld [vmem:[%s7267_s0 + $0x1c0] sm:$0xff] }
 0x272   :  { %v2147_v24 = vmax.f32 %v2067_v0, 0.0  ;;  %v2148_v53 = vmax.f32 %v2068_v54, 0.0  ;;  %v1793_v0 = vmul.f32 %v4088_v31, %v5655_v28  ;;  %v2154_v28 = vmax.f32 %v2074_v55, 0.0  ;;  %v4092_v55 = vld [vmem:[%s7267_s0 + $0x1e0] sm:$0xff] }
 0x274   :  { %v6069_v51 = vpack.c.bf16 %v2148_v53, %v2146_v21  ;;  %v6071_v11 = vpack.c.bf16 %v2147_v24, %v2145_v15  ;;  %v7361_v15 = vld [vmem:[#allocation20_spill] sm:$0xff]  ;;  %v4090_v24 = vld [vmem:[%s7267_s0 + $0x1d8] sm:$0xff]  ;;  %v2073_v37 = vadd.f32 %v1960_v50, %v1793_v0 }
 0x275   :  { %v1796_v53 = vmul.f32 %v4090_v24, %v7361_v15  ;;  %v4094_v24 = vld [vmem:[%s7267_s0 + $0x1f8] sm:$0xff] }
 0x277   :  { %v1955_v13 = vpop.permute.xlu1 %1954 }
 0x278   :  { %v2071_v3 = vadd.f32 %v1955_v13, %v1791_v60  ;;  %v2072_v12 = vadd.f32 %v1955_v13, %v1792_v47  ;;  %1734 = vperm.xlu1 %3907, %v1291_v30   ;;  %v4087_v30 = vld [vmem:[%s7267_s0 + $0x128] sm:$0xff]  ;;  %v2153_v13 = vmax.f32 %v2073_v37, 0.0 }
 0x279   :  { %v1970_v44 = vpop.permute.xlu2 %1969  ;;  %v1774_v52 = vmul.f32 %v4087_v30, %v7360_v16 }
 0x27a   :  { %v2151_v61 = vmax.f32 %v2071_v3, 0.0  ;;  %v2152_v49 = vmax.f32 %v2072_v12, 0.0  ;;  %v2078_v18 = vadd.f32 %v1970_v44, %v1798_v19 }
 0x27c   :  { %v6085_v26 = vpack.c.bf16 %v2152_v49, %v2150_v40  ;;  %v6087_v43 = vpack.c.bf16 %v2151_v61, %v2149_v38  ;;  %v4091_v40 = vld [vmem:[%s7267_s0 + $0x118] sm:$0xff]  ;;  %v6119_v49 = vpop.permute.xlu0 %1904 }
 0x280   :  { %1719 = vperm.xlu1 %3907, %v5931_v9   ;;  %v4089_v9 = vld [vmem:[%s7267_s0 + $0x1d0] sm:$0xff] }
 0x281   :  { %v1795_v21 = vmul.f32 %v4089_v9, %v7361_v15  ;;  %v4093_v9 = vld [vmem:[%s7267_s0 + $0x1f0] sm:$0xff]  ;;  %v7362_v15 = vld [vmem:[#allocation25_spill] sm:$0xff] }
 0x282   :  { %v6090_v29 = vpop.permute.xlu2 %1539 }
 0x288   :  { %3911 = vset.pattern.permute.xlu1 %v7321_v25 }
 0x28b   :  { %v1910_v45 = vpop.permute.xlu2 %1909 }
 0x28c   :  { %v6101_v54 = vadd.f32 %v1910_v45, %v1774_v52  ;;  %v1797_v52 = vmul.f32 %v4092_v55, %v7359_v62 }
 0x28e   :  { %v2077_v37 = vadd.f32 %v1970_v44, %v1797_v52  ;;  %v4095_v44 = vld [vmem:[%s7267_s0 + $0x170] sm:$0xff] }
 0x28f   :  { %v1965_v60 = vpop.permute.xlu1 %1964  ;;  %v1783_v52 = vmul.f32 %v4095_v44, %v5560_v35  ;;  %v7366_v35 = vld [vmem:[#allocation4_spill] sm:$0xff] }
 0x290   :  { %v2075_v48 = vadd.f32 %v1965_v60, %v1795_v21  ;;  %v2076_v47 = vadd.f32 %v1965_v60, %v1796_v53  ;;  %v1799_v21 = vmul.f32 %v4093_v9, %v7362_v15  ;;  %v1800_v53 = vmul.f32 %v4094_v24, %v7362_v15  ;;  %v4096_v9 = vld [vmem:[%s7267_s0 + $0x150] sm:$0xff]  ;;  %v7364_v15 = vld [vmem:[#allocation14_spill] sm:$0xff] }
 0x291   :  { %v4097_v24 = vld [vmem:[%s7267_s0 + $0x120] sm:$0xff] }
 0x292   :  { %v2155_v8 = vmax.f32 %v2075_v48, 0.0  ;;  %v2156_v19 = vmax.f32 %v2076_v47, 0.0  ;;  %v1441_v48 = vpop.permute.xlu0 %1440 }
 0x294   :  { %v6111_v3 = vpack.c.bf16 %v2156_v19, %v2154_v28  ;;  %v6113_v12 = vpop.permute.xlu2 %1624  ;;  %v2285_v38 = vpack.c.bf16 %v2155_v8, %v2153_v13  ;;  %v2157_v13 = vmax.f32 %v2077_v37, 0.0  ;;  %v7365_v37 = vld [vmem:[#allocation17_spill] sm:$0xff] }
 0x295   :  { %v1772_v61 = vmul.f32 %v4091_v40, %v6113_v12 }
 0x297   :  { %v6122_v50 = vadd.f32 %v6119_v49, %v1772_v61  ;;  %v7363_v61 = vld [vmem:[#allocation15_spill] sm:$0xff] }
 0x298   :  { %v1526_v55 = vsub.f32 %v7363_v61, %v1441_v48 }
 0x29e   :  { %v6124_v30 = vpop.permute.xlu2 %1824 }
 0x2a6   :  { %v1449_v31 = vpop.permute.xlu2 %1448 }
 0x2a7   :  { %v1530_v0 = vsub.f32 %v5839_v10, %v1449_v31  ;;  %v2158_v10 = vmax.f32 %v2078_v18, 0.0  ;;  %v2063_v18 = vadd.f32 %v6027_v1, %v1783_v52  ;;  %v4100_v52 = vld [vmem:[%s7267_s0 + $0x10] sm:$0xff] }
 0x2a8   :  { %v1975_v60 = vpop.permute.xlu1 %1974 }
 0x2a9   :  { %2009 = vperm.xlu0 %3910, %v1530_v0   ;;  %v2079_v62 = vadd.f32 %v1975_v60, %v1799_v21  ;;  %v2080_v47 = vadd.f32 %v1975_v60, %v1800_v53  ;;  %v1439_v0 = vpop.permute.xlu0 %1438  ;;  %v1779_v21 = vmul.f32 %v4096_v9, %v7364_v15  ;;  %v1773_v53 = vmul.f32 %v4097_v24, %v7360_v16 }
 0x2aa   :  { %v1525_v60 = vsub.f32 %v7365_v37, %v1439_v0  ;;  %v2143_v48 = vmax.f32 %v2063_v18, 0.0  ;;  %v4101_v18 = vld [vmem:[%s7267_s0 + $0x18] sm:$0xff]  ;;  %v1532_v37 = vlaneseq }
 0x2ab   :  { %v2159_v28 = vmax.f32 %v2079_v62, 0.0  ;;  %v2160_v8 = vmax.f32 %v2080_v47, 0.0  ;;  %v2053_v1 = vadd.f32 %v1910_v45, %v1773_v53  ;;  %v4098_v62 = vld [vmem:[%s7267_s0 + $0x130] sm:$0xff]  ;;  %v7367_v47 = vld [vmem:[#allocation22_spill] sm:$0xff] }
 0x2ad   :  { %v6139_v19 = vpack.c.bf16 %v2160_v8, %v2158_v10  ;;  %v2287_v40 = vpack.c.bf16 %v2159_v28, %v2157_v13  ;;  %v1775_v13 = vmul.f32 %v4098_v62, %v7367_v47  ;;  %v4099_v10 = vld [vmem:[%s7267_s0 + $0x138] sm:$0xff]  ;;  %v2141_v28 = vmax.f32 %v5843_v36, 0.0 }
 0x2ae   :  { %v1776_v16 = vmul.f32 %v4099_v10, %v7367_v47  ;;  %v2133_v61 = vmax.f32 %v2053_v1, 0.0  ;;  %v4104_v10 = vld [vmem:[%s7267_s0 + $0x110] sm:$0xff] }
 0x2af   :  { %2523 = vmatpush.bf16.msrb.mxu3 %v2287_v40  ;;  %v2279_v44 = vpack.c.bf16 %v2143_v48, %v2141_v28  ;;  %v1533_v28 = vand.u32 127, %v1532_v37 }
 0x2b1   :  { %1989 = vperm.xlu0 %3910, %v1526_v55   ;;  %v1545_v31 = vpop.permute.xlu1 %1544  ;;  %v2134_v55 = vmax.f32 %v6101_v54, 0.0 }
 0x2b2   :  { %v1739_v0 = vmul.f32 %v4100_v52, %v1545_v31  ;;  %v1740_v36 = vmul.f32 %v4101_v18, %v1545_v31  ;;  %v4103_v31 = vld [vmem:[%s7267_s0 + $0x8] sm:$0xff]  ;;  %v7369_v52 = vld [vmem:[#allocation26_spill] sm:$0xff] }
 0x2b3   :  { %2524 = vmatpush.bf16.msrb.mxu3 %v2285_v38  ;;  %v2059_v38 = vadd.f32 %v7366_v35, %v1779_v21  ;;  %v7368_v21 = vld [vmem:[#allocation27_spill] sm:$0xff] }
 0x2b4   :  { %v2137_v24 = vmax.f32 %v7368_v21, 0.0  ;;  %v2019_v48 = vadd.f32 %v6124_v30, %v1739_v0  ;;  %v2020_v1 = vadd.f32 %v6124_v30, %v1740_v36 }
 0x2b5   :  { %v2139_v45 = vmax.f32 %v2059_v38, 0.0  ;;  %v1738_v38 = vmul.f32 %v4103_v31, %v6090_v29  ;;  %v3658_v31 = vld [vmem:[%s7269_s1 + $0xc] sm:$0xf0] }
 0x2b7   :  { %2525 = vmatpush.bf16.msrb.mxu3 %v6087_v43  ;;  %v2277_v54 = vpack.c.bf16 %v2139_v45, %v2137_v24  ;;  %v2099_v45 = vmax.f32 %v2019_v48, 0.0 }
 0x2b9   :  { %1984 = vperm.xlu0 %3910, %v1525_v60   ;;  %v4102_v60 = vld [vmem:[%s7267_s0] sm:$0xff] }
 0x2ba   :  { %v1915_v43 = vpop.permute.xlu1 %1914  ;;  %v1737_v35 = vmul.f32 %v4102_v60, %v6090_v29 }
 0x2bb   :  { %v2055_v8 = vadd.f32 %v1915_v43, %v1775_v13  ;;  %v2056_v40 = vadd.f32 %v1915_v43, %v1776_v16  ;;  %2526 = vmatpush.bf16.msrb.mxu3 %v6071_v11  ;;  %v1771_v16 = vmul.f32 %v4104_v10, %v6113_v12  ;;  %v2100_v43 = vmax.f32 %v2020_v1, 0.0  ;;  %v4106_v12 = vld [vmem:[%s7267_s0 + $0x108] sm:$0xff] }
 0x2bc   :  { %v1770_v18 = vmul.f32 %v4106_v12, %v7369_v52 }
 0x2bd   :  { %v2135_v9 = vmax.f32 %v2055_v8, 0.0  ;;  %v2136_v15 = vmax.f32 %v2056_v40, 0.0  ;;  %v2051_v30 = vadd.f32 %v6119_v49, %v1771_v16  ;;  %v3827_v49 = vld [vmem:[%s7269_s1 + $0x8] sm:$0xf0] }
 0x2bf   :  { %v6176_v11 = vpack.c.bf16 %v2136_v15, %v2134_v55  ;;  %2527 = vmatpush.bf16.msrb.mxu3 %v2279_v44  ;;  %v2275_v53 = vpack.c.bf16 %v2135_v9, %v2133_v61  ;;  %v1534_v55 = vadd.s32 128, %v1533_v28  ;;  %v4105_v44 = vld [vmem:[%s7267_s0 + $0x100] sm:$0xff]  ;;  %v4108_v28 = vld [vmem:[%s7267_s0 + $0x98] sm:$0xff] }
 0x2c0   :  { %v1769_v0 = vmul.f32 %v4105_v44, %v7369_v52  ;;  %v3656_v9 = vld [vmem:[%s7269_s1] sm:$0xf]  ;;  %v4111_v44 = vld [vmem:[%s7267_s0 + $0x48] sm:$0xff] }
 0x2c1   :  { %3918 = vset.pattern.permute.xlu0 %v7314_v34  ;;  %v6210_v24 = vor.u32 %v3827_v49, %v3656_v9  ;;  %vm1536_vm8 = vcmp.lt.s32.totalorder %v1534_v55, 196  ;;  %v1445_v55 = vpop.permute.xlu2 %1444  ;;  %v1746_v52 = vmul.f32 %v4111_v44, %v7350_v41  ;;  %v4112_v49 = vld [vmem:[%s7267_s0 + $0x58] sm:$0xff] }
 0x2c2   :  { %v1820_v62 = vpop.permute.xlu1 %1819  ;;  %vm6222_vm9 = vmpackc.low %vm1536_vm8, %vm1536_vm8  ;;  %v1748_v41 = vmul.f32 %v4112_v49, %v7352_v6  ;;  %v4113_v49 = vld [vmem:[%s7267_s0 + $0x260] sm:$0xff] }
 0x2c3   :  { %v2017_v47 = vadd.f32 %v1820_v62, %v1737_v35  ;;  %v2018_v13 = vadd.f32 %v1820_v62, %v1738_v38  ;;  %2528 = vmatpush.bf16.msrb.mxu3 %v2277_v54  ;;  %v2131_v54 = vmax.f32 %v2051_v30, 0.0  ;;  %v3826_v35 = vld [vmem:[%s7269_s1 + $0x4] sm:$0xf]  ;;  %v4107_v62 = vld [vmem:[%s7267_s0 + $0x88] sm:$0xff] }
 0x2c5   :  { %v2097_v8 = vmax.f32 %v2017_v47, 0.0  ;;  %v2098_v40 = vmax.f32 %v2018_v13, 0.0  ;;  %v7372_v47 = vld [vmem:[#allocation10_spill] sm:$0xff] }
 0x2c6   :  { %v1754_v13 = vmul.f32 %v4107_v62, %v7372_v47 }
 0x2c7   :  { %v6193_v29 = vpack.c.bf16 %v2100_v43, %v2098_v40  ;;  %2529 = vmatpush.bf16.msrb.mxu3 %v2275_v53  ;;  %v2257_v61 = vpack.c.bf16 %v2099_v45, %v2097_v8  ;;  %v2132_v53 = vmax.f32 %v6122_v50, 0.0  ;;  %v6226_v50 = vor.u32 %v3826_v35, %v3658_v31  ;;  %v4109_v40 = vld [vmem:[%s7267_s0 + $0x78] sm:$0xff]  ;;  %v3680_v31 = vld [vmem:[%s7269_s1 + $0x30] sm:$0xf] }
 0x2c8   :  { %v1756_v43 = vmul.f32 %v4108_v28, %v7345_v59  ;;  %v2034_v8 = vadd.f32 %v5579_v4, %v1754_v13  ;;  %v4110_v59 = vld [vmem:[%s7267_s0 + $0x68] sm:$0xff]  ;;  %v3682_v13 = vld [vmem:[%s7269_s1 + $0x3c] sm:$0xf0] }
 0x2c9   :  { %2481 = vmatpush.bf16.msrb.mxu2 %v2257_v61  ;;  %v1750_v4 = vmul.f32 %v4110_v59, %v7349_v46  ;;  %v1443_v62 = vpop.permute.xlu2 %1442  ;;  %v3838_v59 = vld [vmem:[%s7269_s1 + $0x64] sm:$0xf] }
 0x2ca   :  { %v1900_v36 = vpop.permute.xlu1 %1899  ;;  %v2036_v45 = vadd.f32 %v5569_v39, %v1756_v43  ;;  %v2114_v61 = vmax.f32 %v2034_v8, 0.0  ;;  %v3830_v39 = vld [vmem:[%s7269_s1 + $0x20] sm:$0xf0]  ;;  %v3694_v8 = vld [vmem:[%s7269_s1 + $0x54] sm:$0xf0] }
 0x2cb   :  { %v2049_v15 = vadd.f32 %v1900_v36, %v1769_v0  ;;  %v2050_v21 = vadd.f32 %v1900_v36, %v1770_v18  ;;  %v2030_v46 = vadd.f32 %v5567_v22, %v1750_v4  ;;  %v1528_v18 = vsub.f32 %v5913_v20, %v1445_v55  ;;  %v7374_v36 = vld [vmem:[#allocation19_spill] sm:$0xff] }
 0x2cc   :  { %2482 = vmatmul.bf16.vlgmr.msrb.gmra.mxu2 %v6210_v24  ;;  %v2116_v0 = vmax.f32 %v2036_v45, 0.0  ;;  %v2026_v22 = vadd.f32 %v5554_v32, %v1746_v52  ;;  %v3670_v20 = vld [vmem:[%s7269_s1 + $0x24] sm:$0xf0]  ;;  %v3839_v45 = vld [vmem:[%s7269_s1 + $0x68] sm:$0xf0]  ;;  %v1725_v52 = vpop.permute.xlu0 %1724 }
 0x2cd   :  { %v2129_v37 = vmax.f32 %v2049_v15, 0.0  ;;  %v2130_v60 = vmax.f32 %v2050_v21, 0.0 }
 0x2ce   :  { %v3768_v15 = vpack.c.bf16 %v2116_v0, %v2114_v61  ;;  %v2106_v32 = vmax.f32 %v2026_v22, 0.0  ;;  %v3716_v61 = vld [vmem:[%s7269_s1 + $0x78] sm:$0xf]  ;;  %v3728_v0 = vld [vmem:[%s7269_s1 + $0x90] sm:$0xf]  ;;  %v4114_v22 = vld [vmem:[%s7267_s0 + $0x268] sm:$0xff] }
 0x2cf   :  { %v6220_v38 = vpack.c.bf16 %v2132_v53, %v2130_v60  ;;  %v2273_v48 = vpack.c.bf16 %v2131_v54, %v2129_v37  ;;  %v2028_v53 = vadd.f32 %v5509_v17, %v1748_v41  ;;  %v2110_v54 = vmax.f32 %v2030_v46, 0.0  ;;  %v7375_v17 = vld [vmem:[#allocation16_spill] sm:$0xff] }
 0x2d1   :  { %2530 = vmatpush.bf16.msrb.mxu3 %v2273_v48  ;;  %v2108_v60 = vmax.f32 %v2028_v53, 0.0  ;;  %v3833_v48 = vld [vmem:[%s7269_s1 + $0x38] sm:$0xf0]  ;;  %v1730_v46 = vpop.permute.xlu2 %1729 }
 0x2d2   :  { %v1451_v10 = vpop.permute.xlu1 %1450  ;;  %v6308_v47 = vor.u32 %v3833_v48, %v3680_v31  ;;  %v1813_v41 = vmul.f32 %v4113_v49, %v1730_v46 }
 0x2d3   :  { %v1531_v16 = vsub.f32 %v6005_v7, %v1451_v10  ;;  %v7373_v7 = vld [vmem:[#allocation21_spill] sm:$0xff]  ;;  %v3774_v35 = vpack.c.bf16 %v2108_v60, %v2106_v32  ;;  %v1527_v10 = vsub.f32 %v5961_v42, %v1443_v62  ;;  %v7376_v42 = vld [vmem:[#allocation18_spill] sm:$0xff] }
 0x2d4   :  { %2531 = vmatmul.bf16.vlgmr.msrb.gmra.mxu3 %v6226_v50 }
 0x2d5   :  { %3760 = vmatpush.bf16.msk.msra.mxu3 %vm6222_vm9, %v5841_v63  ;;  %2014 = vperm.xlu2 %3908, %v1531_v16   ;;  %v1752_v63 = vmul.f32 %v4109_v40, %v7351_v5  ;;  %v3668_v5 = vld [vmem:[%s7269_s1 + $0x18] sm:$0xf] }
 0x2d6   :  { %v6269_v12 = vor.u32 %v3830_v39, %v3668_v5  ;;  %v3841_v5 = vld [vmem:[%s7269_s1 + $0x7c] sm:$0xf]  ;;  %v3718_v39 = vld [vmem:[%s7269_s1 + $0x84] sm:$0xf0] }
 0x2d7   :  { %v2032_v30 = vadd.f32 %v5921_v33, %v1752_v63  ;;  %v3704_v63 = vld [vmem:[%s7269_s1 + $0x60] sm:$0xf]  ;;  %v6382_v44 = vor.u32 %v3841_v5, %v3718_v39 }
 0x2d9   :  { %3763 = vmatpush.bf16.msk.msra.mxu3 %vm6222_vm9, %v7373_v7  ;;  %v2112_v21 = vmax.f32 %v2032_v30, 0.0  ;;  %v6355_v7 = vor.u32 %v3839_v45, %v3704_v63  ;;  %v3842_v30 = vld [vmem:[%s7269_s1 + $0x80] sm:$0xf0] }
 0x2da   :  { %v1447_v33 = vpop.permute.xlu1 %1446  ;;  %v6373_v55 = vor.u32 %v3842_v30, %v3716_v61  ;;  %v4118_v30 = vld [vmem:[%s7267_s0 + $0x248] sm:$0xff] }
 0x2db   :  { %v1529_v9 = vsub.f32 %v7374_v36, %v1447_v33  ;;  %v3771_v6 = vpack.c.bf16 %v2112_v21, %v2110_v54  ;;  %v3845_v33 = vld [vmem:[%s7269_s1 + $0x98] sm:$0xf0]  ;;  %v3844_v21 = vld [vmem:[%s7269_s1 + $0x94] sm:$0xf] }
 0x2dc   :  { %2487 = vmatmul.bf16.gmra.mxu2 %v6269_v12  ;;  %v4116_v54 = vld [vmem:[%s7267_s0 + $0x278] sm:$0xff] }
 0x2dd   :  { %3766 = vmatpush.bf16.msk.msra.mxu3 %vm6222_vm9, %v5892_v14  ;;  %2004 = vperm.xlu1 %3911, %v1529_v9   ;;  %v3829_v14 = vld [vmem:[%s7269_s1 + $0x1c] sm:$0xf]  ;;  %v6391_v9 = vor.u32 %v3845_v33, %v3728_v0 }
 0x2de   :  { %1999 = vperm.xlu2 %3908, %v1528_v18   ;;  %v6288_v37 = vor.u32 %v3829_v14, %v3670_v20  ;;  %v3730_v14 = vld [vmem:[%s7269_s1 + $0x9c] sm:$0xf0]  ;;  %v4115_v20 = vld [vmem:[%s7267_s0 + $0x270] sm:$0xff]  ;;  %v4120_v33 = vld [vmem:[%s7267_s0 + $0x258] sm:$0xff] }
 0x2df   :  { %v6412_v48 = vor.u32 %v3844_v21, %v3730_v14 }
 0x2e1   :  { %3769 = vmatpush.bf16.msk.msra.mxu3 %vm6222_vm9, %v3768_v15  ;;  %v1814_v15 = vmul.f32 %v4114_v22, %v1730_v46  ;;  %v4119_v46 = vld [vmem:[%s7267_s0 + $0x250] sm:$0xff] }
 0x2e2   :  { %v1437_v16 = vpop.permute.xlu1 %1436  ;;  %v1811_v0 = vmul.f32 %v4119_v46, %v1725_v52 }
 0x2e3   :  { %v1524_v28 = vsub.f32 %v6043_v58, %v1437_v16  ;;  %v3835_v58 = vld [vmem:[%s7269_s1 + $0x4c] sm:$0xf] }
 0x2e4   :  { %2536 = vmatmul.bf16.gmra.mxu3 %v6288_v37  ;;  %v6346_v40 = vor.u32 %v3835_v58, %v3694_v8  ;;  %v3847_v58 = vld [vmem:[%s7269_s1 + $0xac] sm:$0xf]  ;;  %v3742_v8 = vld [vmem:[%s7269_s1 + $0xb4] sm:$0xf0] }
 0x2e5   :  { %3772 = vmatpush.bf16.msk.msra.mxu3 %vm6222_vm9, %v3771_v6  ;;  %3913 = vset.pattern.permute.xlu1 %v7314_v34  ;;  %v6432_v63 = vor.u32 %v3847_v58, %v3742_v8  ;;  %v4124_v58 = vld [vmem:[%s7267_s0 + $0x238] sm:$0xff] }
 0x2e6   :  { %3912 = vset.pattern.permute.xlu2 %v7314_v34  ;;  %1714 = vperm.xlu1 %3913, %v5999_v2   ;;  %v3832_v2 = vld [vmem:[%s7269_s1 + $0x34] sm:$0xf] }
 0x2e7   :  { %1709 = vperm.xlu2 %3912, %v7375_v17  }
 0x2e9   :  { %3775 = vmatpush.bf16.msk.msra.mxu3 %vm6222_vm9, %v3774_v35 }
 0x2ea   :  { %v1735_v18 = vpop.permute.xlu1 %1734 }
 0x2eb   :  { %v1815_v53 = vmul.f32 %v4115_v20, %v1735_v18  ;;  %v1816_v32 = vmul.f32 %v4116_v54, %v1735_v18  ;;  %v1812_v18 = vmul.f32 %v4120_v33, %v1725_v52  ;;  %v4122_v52 = vld [vmem:[%s7267_s0 + $0x228] sm:$0xff] }
 0x2ec   :  { %2492 = vmatmul.bf16.gmra.mxu2 %v6308_v47 }
 0x2ed   :  { %3778 = vmatpush.bf16.msk.msra.mxu3 %vm6222_vm9, %v6010_v57  ;;  %v6323_v57 = vor.u32 %v3832_v2, %v3682_v13 }
 0x2ee   :  { %1699 = vperm.xlu1 %3913, %v6049_v27   ;;  %v3692_v27 = vld [vmem:[%s7269_s1 + $0x48] sm:$0xf] }
 0x2ef   :  { %3914 = vset.pattern.permute.xlu2 %v7321_v25 }
 0x2f0   :  { %1994 = vperm.xlu2 %3914, %v1527_v10  }
 0x2f1   :  { %3781 = vmatpush.bf16.msk.msra.mxu3 %vm6222_vm9, %v6193_v29  ;;  %v3836_v29 = vld [vmem:[%s7269_s1 + $0x50] sm:$0xf0] }
 0x2f2   :  { %v6336_v43 = vor.u32 %v3836_v29, %v3692_v27  ;;  %v3848_v27 = vld [vmem:[%s7269_s1 + $0xb0] sm:$0xf0] }
 0x2f4   :  { %2541 = vmatmul.bf16.gmra.mxu3 %v6323_v57 }
 0x2f6   :  { %3916 = vset.pattern.permute.xlu1 %v7321_v25 }
 0x2f7   :  { %1979 = vperm.xlu1 %3916, %v1524_v28  }
 0x2f8   :  { %3915 = vset.pattern.permute.xlu2 %v7314_v34 }
 0x2f9   :  { %1704 = vperm.xlu2 %3915, %v7376_v42   ;;  %v3740_v42 = vld [vmem:[%s7269_s1 + $0xa8] sm:$0xf] }
 0x2fa   :  { %v6423_v29 = vor.u32 %v3848_v27, %v3740_v42  ;;  %v4123_v42 = vld [vmem:[%s7267_s0 + $0x230] sm:$0xff] }
 0x2fc   :  { %2497 = vmatmul.bf16.gmra.mxu2 %v6336_v43 }
 0x2ff   :  { %3917 = vset.pattern.permute.xlu1 %v7314_v34  ;;  %v3706_v34 = vld [vmem:[%s7269_s1 + $0x6c] sm:$0xf0] }
 0x300   :  { %v6364_v4 = vor.u32 %v3838_v59, %v3706_v34  ;;  %v1720_v59 = vpop.permute.xlu1 %1719  ;;  %v4117_v34 = vld [vmem:[%s7267_s0 + $0x240] sm:$0xff] }
 0x301   :  { %v1809_v61 = vmul.f32 %v4117_v34, %v1720_v59  ;;  %v1810_v5 = vmul.f32 %v4118_v30, %v1720_v59 }
 0x304   :  { %2546 = vmatmul.bf16.gmra.mxu3 %v6346_v40 }
 0x30c   :  { %2502 = vmatmul.bf16.gmra.mxu2 %v6355_v7 }
 0x314   :  { %2551 = vmatmul.bf16.gmra.mxu3 %v6364_v4 }
 0x31b   :  { %v2010_v36 = vpop.permute.xlu0 %2009 }
 0x31c   :  { %2507 = vmatmul.bf16.gmra.mxu2 %v6373_v55  ;;  %v2093_v6 = vadd.f32 %v2010_v36, %v1813_v41  ;;  %v2094_v60 = vadd.f32 %v2010_v36, %v1814_v15 }
 0x31e   :  { %v2173_v62 = vmax.f32 %v2093_v6, 0.0  ;;  %v2174_v2 = vmax.f32 %v2094_v60, 0.0  ;;  %v4121_v60 = vld [vmem:[%s7267_s0 + $0x220] sm:$0xff] }
 0x324   :  { %2556 = vmatmul.bf16.gmra.mxu3 %v6382_v44 }
 0x32c   :  { %2512 = vmatmul.bf16.gmra.mxu2 %v6391_v9 }
 0x32f   :  { %v2015_v35 = vpop.permute.xlu2 %2014 }
 0x330   :  { %v2095_v17 = vadd.f32 %v2015_v35, %v1815_v53  ;;  %v2096_v31 = vadd.f32 %v2015_v35, %v1816_v32 }
 0x332   :  { %v2175_v13 = vmax.f32 %v2095_v17, 0.0  ;;  %v2176_v10 = vmax.f32 %v2096_v31, 0.0 }
 0x334   :  { %v2295_v16 = vpack.c.bf16 %v2175_v13, %v2173_v62  ;;  %v3807_v28 = vpack.c.bf16 %v2176_v10, %v2174_v2  ;;  %2561 = vmatmul.bf16.gmra.mxu3 %v6412_v48  ;;  %v1990_v62 = vpop.permute.xlu0 %1989 }
 0x336   :  { %2576 = vmatpush.bf16.msra.mxu2 %v2295_v16  ;;  %3808 = vmatpush.bf16.msk.msrb.mxu3 %vm6222_vm9, %v3807_v28 }
 0x338   :  { %v2000_v45 = vpop.permute.xlu2 %1999 }
 0x339   :  { %v2089_v36 = vadd.f32 %v2000_v45, %v1809_v61  ;;  %v2090_v49 = vadd.f32 %v2000_v45, %v1810_v5 }
 0x33b   :  { %v2169_v14 = vmax.f32 %v2089_v36, 0.0  ;;  %v2170_v20 = vmax.f32 %v2090_v49, 0.0  ;;  %v4125_v49 = vld [vmem:[%s7267_s0 + $0x210] sm:$0xff] }
 0x33c   :  { %2517 = vmatmul.bf16.gmra.mxu2 %v6423_v29 }
 0x341   :  { %v1710_v39 = vpop.permute.xlu2 %1709 }
 0x342   :  { %v1805_v35 = vmul.f32 %v4121_v60, %v1710_v39  ;;  %v1806_v17 = vmul.f32 %v4122_v52, %v1710_v39 }
 0x344   :  { %2566 = vmatmul.bf16.gmra.mxu3 %v6432_v63  ;;  %v2085_v16 = vadd.f32 %v1990_v62, %v1805_v35  ;;  %v2086_v28 = vadd.f32 %v1990_v62, %v1806_v17  ;;  %v3664_v62 = vld [vmem:[%s7269_s1 + $0x8] sm:$0xf] }
 0x346   :  { %v2165_v34 = vmax.f32 %v2085_v16, 0.0  ;;  %v2166_v61 = vmax.f32 %v2086_v28, 0.0 }
 0x34a   :  { %v1995_v31 = vpop.permute.xlu2 %1994 }
 0x34f   :  { %v2005_v41 = vpop.permute.xlu1 %2004  ;;  %v2483_v21 = vpop.f32.mrf.mxu2 }
 0x350   :  { %v2091_v22 = vadd.f32 %v2005_v41, %v1811_v0  ;;  %v2092_v15 = vadd.f32 %v2005_v41, %v1812_v18 }
 0x352   :  { %v2171_v53 = vmax.f32 %v2091_v22, 0.0  ;;  %v2172_v54 = vmax.f32 %v2092_v15, 0.0  ;;  %v4126_v22 = vld [vmem:[%s7267_s0 + $0x218] sm:$0xff] }
 0x353   :  { %v1705_v33 = vpop.permute.xlu2 %1704 }
 0x354   :  { %v3810_v32 = vpack.c.bf16 %v2172_v54, %v2170_v20  ;;  %v2293_v6 = vpack.c.bf16 %v2171_v53, %v2169_v14  ;;  %2629 = vmatmul.bf16.vlgmr.msra.gmra.mxu3 %v6210_v24  ;;  %v1803_v41 = vmul.f32 %v4125_v49, %v1705_v33  ;;  %v1804_v15 = vmul.f32 %v4126_v22, %v1705_v33  ;;  %v4127_v54 = vld [vmem:[%s7267_s0 + $0x200] sm:$0xff] }
 0x356   :  { %2577 = vmatpush.bf16.msra.mxu2 %v2293_v6  ;;  %3811 = vmatpush.bf16.msk.msrb.mxu3 %vm6222_vm9, %v3810_v32  ;;  %v4128_v6 = vld [vmem:[%s7267_s0 + $0x208] sm:$0xff] }
 0x357   :  { %v2532_v2 = vpop.f32.mrf.mxu3  ;;  %v6458_v24 = vpop.f32.mrf.mxu2 }
 0x358   :  { %v1715_v13 = vpop.permute.xlu1 %1714  ;;  %v6456_v10 = vadd.f32 %v2532_v2, %v2483_v21  ;;  %v1985_v21 = vpop.permute.xlu0 %1984 }
 0x359   :  { %v1807_v27 = vmul.f32 %v4123_v42, %v1715_v13  ;;  %v1808_v8 = vmul.f32 %v4124_v58, %v1715_v13  ;;  %v2083_v14 = vadd.f32 %v1985_v21, %v1803_v41  ;;  %v2084_v53 = vadd.f32 %v1985_v21, %v1804_v15  ;;  %v3828_v42 = vld [vmem:[%s7269_s1 + $0x10] sm:$0xf0]  ;;  %v3700_v41 = vld [vmem:[%s7269_s1 + $0x50] sm:$0xf] }
 0x35b   :  { %v2087_v45 = vadd.f32 %v1995_v31, %v1807_v27  ;;  %v2088_v59 = vadd.f32 %v1995_v31, %v1808_v8  ;;  %v2163_v2 = vmax.f32 %v2083_v14, 0.0  ;;  %v2164_v13 = vmax.f32 %v2084_v53, 0.0  ;;  %v3840_v53 = vld [vmem:[%s7269_s1 + $0x70] sm:$0xf0] }
 0x35c   :  { %v6493_v8 = vor.u32 %v3828_v42, %v3664_v62  ;;  %v3846_v42 = vld [vmem:[%s7269_s1 + $0xa0] sm:$0xf0] }
 0x35d   :  { %v2167_v30 = vmax.f32 %v2087_v45, 0.0  ;;  %v2168_v5 = vmax.f32 %v2088_v59, 0.0 }
 0x35f   :  { %v3813_v39 = vpack.c.bf16 %v2168_v5, %v2166_v61  ;;  %v2291_v46 = vpack.c.bf16 %v2167_v30, %v2165_v34  ;;  %v6466_v0 = vpop.f32.mrf.mxu3  ;;  %v2488_v36 = vpop.f32.mrf.mxu2 }
 0x360   :  { %v1700_v18 = vpop.permute.xlu1 %1699 }
 0x361   :  { %2578 = vmatpush.bf16.msra.mxu2 %v2291_v46  ;;  %3814 = vmatpush.bf16.msk.msrb.mxu3 %vm6222_vm9, %v3813_v39  ;;  %v1801_v32 = vmul.f32 %v4127_v54, %v1700_v18  ;;  %v1802_v60 = vmul.f32 %v4128_v6, %v1700_v18 }
 0x364   :  { %2634 = vmatmul.bf16.gmra.mxu3 %v6269_v12 }
 0x367   :  { %v2537_v20 = vpop.f32.mrf.mxu3  ;;  %v6485_v17 = vpop.f32.mrf.mxu2 }
 0x368   :  { %v6483_v35 = vadd.f32 %v2537_v20, %v2488_v36  ;;  %v3712_v20 = vld [vmem:[%s7269_s1 + $0x68] sm:$0xf] }
 0x369   :  { %v1980_v52 = vpop.permute.xlu1 %1979  ;;  %v3713_v54 = vor.u32 %v3840_v53, %v3712_v20 }
 0x36a   :  { %v2081_v12 = vadd.f32 %v1980_v52, %v1801_v32  ;;  %v2082_v31 = vadd.f32 %v1980_v52, %v1802_v60  ;;  %v3724_v52 = vld [vmem:[%s7269_s1 + $0x80] sm:$0xf] }
 0x36c   :  { %v2161_v16 = vmax.f32 %v2081_v12, 0.0  ;;  %v2162_v28 = vmax.f32 %v2082_v31, 0.0  ;;  %v3843_v12 = vld [vmem:[%s7269_s1 + $0x88] sm:$0xf0] }
 0x36d   :  { %v3725_v62 = vor.u32 %v3843_v12, %v3724_v52 }
 0x36e   :  { %v3816_v27 = vpack.c.bf16 %v2164_v13, %v2162_v28  ;;  %v2289_v58 = vpack.c.bf16 %v2163_v2, %v2161_v16  ;;  %v3736_v28 = vld [vmem:[%s7269_s1 + $0x98] sm:$0xf] }
 0x36f   :  { %v6495_v45 = vpop.f32.mrf.mxu3  ;;  %v2493_v59 = vpop.f32.mrf.mxu2 }
 0x370   :  { %2579 = vmatpush.bf16.msra.mxu2 %v2289_v58  ;;  %3817 = vmatpush.bf16.msk.msrb.mxu3 %vm6222_vm9, %v3816_v27  ;;  %v3737_v27 = vor.u32 %v3846_v42, %v3736_v28 }
 0x373   :  { %3750 = vmatmul.msk.bf16.vlgmr.msra.gmra.mxu2 %vm2449_vm10, %v6493_v8 }
 0x374   :  { %3784 = vmatpush.bf16.msk.msrb.mxu2 %vm6222_vm9, %v6139_v19  ;;  %2639 = vmatmul.bf16.gmra.mxu3 %v6308_v47  ;;  %v3676_v19 = vld [vmem:[%s7269_s1 + $0x20] sm:$0xf]  ;;  %v3831_v47 = vld [vmem:[%s7269_s1 + $0x28] sm:$0xf0] }
 0x377   :  { %v2542_v34 = vpop.f32.mrf.mxu3  ;;  %v6513_v30 = vpop.f32.mrf.mxu2 }
 0x378   :  { %3787 = vmatpush.bf16.msk.msrb.mxu2 %vm6222_vm9, %v6111_v3  ;;  %v6508_v61 = vadd.f32 %v2542_v34, %v2493_v59  ;;  %v6524_v3 = vor.u32 %v3831_v47, %v3676_v19  ;;  %v3748_v59 = vld [vmem:[%s7269_s1 + $0xb0] sm:$0xf]  ;;  %v3849_v34 = vld [vmem:[%s7269_s1 + $0xb8] sm:$0xf0] }
 0x379   :  { %v6620_v19 = vor.u32 %v3849_v34, %v3748_v59 }
 0x37c   :  { %3790 = vmatpush.bf16.msk.msrb.mxu2 %vm6222_vm9, %v6085_v26 }
 0x37f   :  { %v6526_v5 = vpop.f32.mrf.mxu3  ;;  %v2498_v26 = vpop.f32.mrf.mxu2 }
 0x380   :  { %3793 = vmatpush.bf16.msk.msrb.mxu2 %vm6222_vm9, %v6069_v51 }
 0x383   :  { %3751 = vmatmul.msk.bf16.gmra.mxu2 %vm2449_vm10, %v6524_v3 }
 0x384   :  { %3796 = vmatpush.bf16.msk.msrb.mxu2 %vm6222_vm9, %v6051_v56  ;;  %2644 = vmatmul.bf16.gmra.mxu3 %v6336_v43  ;;  %v3688_v56 = vld [vmem:[%s7269_s1 + $0x38] sm:$0xf]  ;;  %v3834_v43 = vld [vmem:[%s7269_s1 + $0x40] sm:$0xf0] }
 0x387   :  { %v2547_v39 = vpop.f32.mrf.mxu3  ;;  %v6542_v46 = vpop.f32.mrf.mxu2 }
 0x388   :  { %3799 = vmatpush.bf16.msk.msrb.mxu2 %vm6222_vm9, %v5865_v23  ;;  %v6537_v51 = vadd.f32 %v2547_v39, %v2498_v26  ;;  %v3689_v23 = vor.u32 %v3834_v43, %v3688_v56 }
 0x38c   :  { %3802 = vmatpush.bf16.msk.msrb.mxu2 %vm6222_vm9, %v6176_v11 }
 0x38f   :  { %v6553_v33 = vpop.f32.mrf.mxu3  ;;  %v2503_v18 = vpop.f32.mrf.mxu2 }
 0x390   :  { %3805 = vmatpush.bf16.msk.msrb.mxu2 %vm6222_vm9, %v6220_v38  ;;  %v3837_v38 = vld [vmem:[%s7269_s1 + $0x58] sm:$0xf0] }
 0x391   :  { %v3701_v1 = vor.u32 %v3837_v38, %v3700_v41 }
 0x393   :  { %3752 = vmatmul.msk.bf16.gmra.mxu2 %vm2449_vm10, %v3689_v23 }
 0x394   :  { %2649 = vmatmul.bf16.gmra.mxu3 %v6355_v7 }
 0x397   :  { %v2552_v11 = vpop.f32.mrf.mxu3  ;;  %v6559_v49 = vpop.f32.mrf.mxu2 }
 0x398   :  { %v6557_v36 = vadd.f32 %v2552_v11, %v2503_v18 }
 0x39f   :  { %v6567_v22 = vpop.f32.mrf.mxu3  ;;  %v2508_v15 = vpop.f32.mrf.mxu2 }
 0x3a3   :  { %3753 = vmatmul.msk.bf16.gmra.mxu2 %vm2449_vm10, %v3701_v1 }
 0x3a4   :  { %2654 = vmatmul.bf16.gmra.mxu3 %v6373_v55 }
 0x3a7   :  { %v2557_v7 = vpop.f32.mrf.mxu3  ;;  %v6573_v14 = vpop.f32.mrf.mxu2 }
 0x3a8   :  { %v6571_v21 = vadd.f32 %v2557_v7, %v2508_v15 }
 0x3af   :  { %v6581_v32 = vpop.f32.mrf.mxu3  ;;  %v2513_v6 = vpop.f32.mrf.mxu2 }
 0x3b3   :  { %3754 = vmatmul.msk.bf16.gmra.mxu2 %vm2449_vm10, %v3713_v54 }
 0x3b4   :  { %2659 = vmatmul.bf16.gmra.mxu3 %v6391_v9 }
 0x3b7   :  { %v2562_v55 = vpop.f32.mrf.mxu3  ;;  %v6593_v31 = vpop.f32.mrf.mxu2 }
 0x3b8   :  { %v6585_v60 = vadd.f32 %v2562_v55, %v2513_v6 }
 0x3bf   :  { %v6595_v2 = vpop.f32.mrf.mxu3  ;;  %v2518_v9 = vpop.f32.mrf.mxu2 }
 0x3c3   :  { %3755 = vmatmul.msk.bf16.gmra.mxu2 %vm2449_vm10, %v3725_v62 }
 0x3c4   :  { %2664 = vmatmul.bf16.gmra.mxu3 %v6423_v29 }
 0x3c7   :  { %v2567_v13 = vpop.f32.mrf.mxu3  ;;  %v6630_v26 = vpop.f32.mrf.mxu2 }
 0x3c8   :  { %v6599_v16 = vadd.f32 %v2567_v13, %v2518_v9 }
 0x3cf   :  { %v6607_v58 = vpop.f32.mrf.mxu3 }
 0x3d3   :  { %3756 = vmatmul.msk.bf16.gmra.mxu2 %vm2449_vm10, %v3737_v27 }
 0x3d4   :  { %3818 = vmatmul.msk.bf16.vlgmr.msrb.gmra.mxu3 %vm2449_vm10, %v6493_v8 }
 0x3d7   :  { %v6612_v29 = vpop.f32.mrf.mxu3 }
 0x3df   :  { %v6622_v47 = vpop.f32.mrf.mxu3 }
 0x3e3   :  { %3757 = vmatmul.msk.bf16.gmra.mxu2 %vm2449_vm10, %v6620_v19 }
 0x3e4   :  { %3819 = vmatmul.msk.bf16.gmra.mxu3 %vm2449_vm10, %v6524_v3  ;;  %v2535_v3 = vadd.f32 %v6466_v0, %v6458_v24  ;;  %v2540_v24 = vadd.f32 %v6495_v45, %v6485_v17  ;;  %v2545_v17 = vadd.f32 %v6526_v5, %v6513_v30  ;;  %v2550_v30 = vadd.f32 %v6553_v33, %v6542_v46 }
 0x3e5   :  { %v2555_v46 = vadd.f32 %v6567_v22, %v6559_v49  ;;  %v2560_v49 = vadd.f32 %v6581_v32, %v6573_v14 }
 0x3e7   :  { %v6628_v8 = vpop.f32.mrf.mxu3 }
 0x3ef   :  { %v6632_v39 = vpop.f32.mrf.mxu3 }
 0x3f3   :  { %2678 = vmatmul.bf16.vlgmr.msrb.gmra.mxu2 %v6226_v50 }
 0x3f4   :  { %3820 = vmatmul.msk.bf16.gmra.mxu3 %vm2449_vm10, %v3689_v23 }
 0x3f6   :  { %v2581_v56 = vpop.f32.mrf.mxu2 }
 0x3f7   :  { %v6637_v43 = vadd.f32 %v2581_v56, %v6456_v10  ;;  %v6639_v18 = vpop.f32.mrf.mxu3 }
 0x3f9   :  { %2784 = vmatmul.f32.vlgmr.msrb.gmra.mxu0 %v6637_v43 }
 0x3fe   :  { %v2583_v11 = vpop.f32.mrf.mxu2 }
 0x3ff   :  { %v6644_v41 = vadd.f32 %v2583_v11, %v2535_v3  ;;  %v6646_v38 = vpop.f32.mrf.mxu3 }
 0x401   :  { %2787 = vmatmul.f32.gmra.mxu0 %v6644_v41 }
 0x403   :  { %2683 = vmatmul.bf16.gmra.mxu2 %v6288_v37 }
 0x404   :  { %3821 = vmatmul.msk.bf16.gmra.mxu3 %vm2449_vm10, %v3701_v1 }
 0x406   :  { %v2586_v50 = vpop.f32.mrf.mxu2 }
 0x407   :  { %v6652_v10 = vadd.f32 %v2586_v50, %v6483_v35  ;;  %v6654_v23 = vpop.f32.mrf.mxu3 }
 0x409   :  { %2790 = vmatmul.f32.gmra.mxu0 %v6652_v10 }
 0x40e   :  { %v2588_v0 = vpop.f32.mrf.mxu2 }
 0x40f   :  { %v6659_v15 = vadd.f32 %v2588_v0, %v2540_v24  ;;  %v6661_v7 = vpop.f32.mrf.mxu3 }
 0x411   :  { %2793 = vmatmul.f32.gmra.mxu0 %v6659_v15 }
 0x413   :  { %2688 = vmatmul.bf16.gmra.mxu2 %v6323_v57 }
 0x414   :  { %3822 = vmatmul.msk.bf16.gmra.mxu3 %vm2449_vm10, %v3713_v54 }
 0x416   :  { %v2591_v37 = vpop.f32.mrf.mxu2 }
 0x417   :  { %v6667_v35 = vadd.f32 %v2591_v37, %v6508_v61  ;;  %v6669_v1 = vpop.f32.mrf.mxu3 }
 0x419   :  { %2796 = vmatmul.f32.gmra.mxu0 %v6667_v35 }
 0x41e   :  { %v2593_v45 = vpop.f32.mrf.mxu2 }
 0x41f   :  { %v6674_v20 = vadd.f32 %v2593_v45, %v2545_v17  ;;  %v6676_v53 = vpop.f32.mrf.mxu3  ;;  %v2900_v17 = vmul.f32 %v6644_v41, %v6644_v41 }
 0x421   :  { %2799 = vmatmul.f32.gmra.mxu0 %v6674_v20 }
 0x423   :  { %2693 = vmatmul.bf16.gmra.mxu2 %v6346_v40 }
 0x424   :  { %3823 = vmatmul.msk.bf16.gmra.mxu3 %vm2449_vm10, %v3725_v62 }
 0x426   :  { %v2596_v57 = vpop.f32.mrf.mxu2 }
 0x427   :  { %v6682_v61 = vadd.f32 %v2596_v57, %v6537_v51  ;;  %v6684_v54 = vpop.f32.mrf.mxu3 }
 0x429   :  { %2802 = vmatmul.f32.gmra.mxu0 %v6682_v61 }
 0x42e   :  { %v2598_v5 = vpop.f32.mrf.mxu2 }
 0x42f   :  { %v6689_v6 = vadd.f32 %v2598_v5, %v2550_v30  ;;  %v6691_v55 = vpop.f32.mrf.mxu3 }
 0x431   :  { %2805 = vmatmul.f32.gmra.mxu0 %v6689_v6 }
 0x433   :  { %2698 = vmatmul.bf16.gmra.mxu2 %v6364_v4 }
 0x434   :  { %3824 = vmatmul.msk.bf16.gmra.mxu3 %vm2449_vm10, %v3737_v27  ;;  %v2565_v27 = vadd.f32 %v6595_v2, %v6593_v31 }
 0x436   :  { %v2601_v40 = vpop.f32.mrf.mxu2 }
 0x437   :  { %v6697_v51 = vadd.f32 %v2601_v40, %v6557_v36  ;;  %v6699_v52 = vpop.f32.mrf.mxu3 }
 0x439   :  { %2808 = vmatmul.f32.gmra.mxu0 %v6697_v51 }
 0x43e   :  { %v2603_v33 = vpop.f32.mrf.mxu2 }
 0x43f   :  { %v6704_v12 = vadd.f32 %v2603_v33, %v2555_v46  ;;  %v6706_v62 = vpop.f32.mrf.mxu3 }
 0x441   :  { %2811 = vmatmul.f32.gmra.mxu0 %v6704_v12 }
 0x443   :  { %2703 = vmatmul.bf16.gmra.mxu2 %v6382_v44 }
 0x444   :  { %3825 = vmatmul.msk.bf16.gmra.mxu3 %vm2449_vm10, %v6620_v19 }
 0x446   :  { %v2606_v4 = vpop.f32.mrf.mxu2 }
 0x447   :  { %v6713_v36 = vadd.f32 %v2606_v4, %v6571_v21  ;;  %v6715_v9 = vpop.f32.mrf.mxu3 }
 0x449   :  { %2814 = vmatmul.f32.gmra.mxu0 %v6713_v36 }
 0x44e   :  { %v2608_v22 = vpop.f32.mrf.mxu2 }
 0x44f   :  { %v6720_v13 = vadd.f32 %v2608_v22, %v2560_v49  ;;  %v6722_v28 = vpop.f32.mrf.mxu3 }
 0x451   :  { %2817 = vmatmul.f32.gmra.mxu0 %v6720_v13 }
 0x453   :  { %2708 = vmatmul.bf16.gmra.mxu2 %v6412_v48 }
 0x456   :  { %v2611_v44 = vpop.f32.mrf.mxu2 }
 0x457   :  { %v6727_v21 = vadd.f32 %v2611_v44, %v6585_v60  ;;  %v2728_v42 = vpop.f32.mrf.mxu3  ;;  %v2570_v60 = vadd.f32 %v6607_v58, %v6630_v26  ;;  %v2904_v44 = vmul.f32 %v6659_v15, %v6659_v15 }
 0x459   :  { %7377 = vst [vmem:[#allocation12_spill] sm:$0xff] %v6727_v21  ;;  %2820 = vmatmul.f32.gmra.mxu0 %v6727_v21 }
 0x45e   :  { %v2613_v14 = vpop.f32.mrf.mxu2 }
 0x45f   :  { %v6732_v32 = vadd.f32 %v2613_v14, %v2565_v27  ;;  %v2730_v59 = vpop.f32.mrf.mxu3 }
 0x461   :  { %7378 = vst [vmem:[#allocation13_spill] sm:$0xff] %v6732_v32  ;;  %2823 = vmatmul.f32.gmra.mxu0 %v6732_v32 }
 0x463   :  { %2713 = vmatmul.bf16.gmra.mxu2 %v6432_v63 }
 0x466   :  { %v2616_v34 = vpop.f32.mrf.mxu2 }
 0x467   :  { %v6737_v48 = vadd.f32 %v2616_v34, %v6599_v16  ;;  %v2733_v56 = vpop.f32.mrf.mxu3  ;;  %v2898_v16 = vmul.f32 %v6637_v43, %v6637_v43 }
 0x469   :  { %7379 = vst [vmem:[#allocation2_spill] sm:$0xff] %v6737_v48  ;;  %2826 = vmatmul.f32.gmra.mxu0 %v6737_v48 }
 0x46e   :  { %v2618_v19 = vpop.f32.mrf.mxu2 }
 0x46f   :  { %v6742_v31 = vadd.f32 %v2618_v19, %v2570_v60  ;;  %v2735_v63 = vpop.f32.mrf.mxu3 }
 0x471   :  { %7380 = vst [vmem:[#allocation11_spill] sm:$0xff] %v6742_v31  ;;  %2829 = vmatmul.f32.gmra.mxu0 %v6742_v31 }
 0x476   :  { %v2679_v2 = vpop.f32.mrf.mxu2 }
 0x477   :  { %v2680_v3 = vadd.f32 %v2679_v2, %v6612_v29  ;;  %v2738_v37 = vpop.f32.mrf.mxu3 }
 0x479   :  { %v6746_v11 = vadd.f32 %v2728_v42, %v2680_v3 }
 0x47b   :  { %v2899_v50 = vmul.f32 %v6746_v11, %v6746_v11  ;;  %2849 = vmatmul.f32.vlgmr.msrb.gmra.mxu1 %v6746_v11 }
 0x47d   :  { %v2930_v58 = vadd.f32 %v2899_v50, %v2898_v16 }
 0x47e   :  { %v2681_v26 = vpop.f32.mrf.mxu2 }
 0x47f   :  { %v2682_v24 = vadd.f32 %v2681_v26, %v6622_v47  ;;  %2931 = vadd.xlane.f32.xlu2 %v2930_v58  ;;  %v2902_v47 = vmul.f32 %v6652_v10, %v6652_v10  ;;  %v2740_v46 = vpop.f32.mrf.mxu3 }
 0x481   :  { %v6754_v0 = vadd.f32 %v2730_v59, %v2682_v24 }
 0x483   :  { %v2901_v29 = vmul.f32 %v6754_v0, %v6754_v0  ;;  %2852 = vmatmul.f32.gmra.mxu1 %v6754_v0 }
 0x485   :  { %v2933_v45 = vadd.f32 %v2901_v29, %v2900_v17 }
 0x486   :  { %v2684_v57 = vpop.f32.mrf.mxu2 }
 0x487   :  { %v2685_v30 = vadd.f32 %v2684_v57, %v6628_v8  ;;  %2934 = vadd.xlane.f32.xlu1 %v2933_v45  ;;  %v2743_v14 = vpop.f32.mrf.mxu3 }
 0x489   :  { %v6762_v5 = vadd.f32 %v2733_v56, %v2685_v30 }
 0x48b   :  { %2855 = vmatmul.f32.gmra.mxu1 %v6762_v5  ;;  %v2903_v40 = vmul.f32 %v6762_v5, %v6762_v5 }
 0x48d   :  { %v2936_v33 = vadd.f32 %v2903_v40, %v2902_v47  ;;  %v2912_v47 = vmul.f32 %v6689_v6, %v6689_v6 }
 0x48e   :  { %v2686_v4 = vpop.f32.mrf.mxu2 }
 0x48f   :  { %v2687_v49 = vadd.f32 %v2686_v4, %v6632_v39  ;;  %2937 = vadd.xlane.f32.xlu0 %v2936_v33  ;;  %v2906_v39 = vmul.f32 %v6667_v35, %v6667_v35  ;;  %v2745_v3 = vpop.f32.mrf.mxu3 }
 0x491   :  { %v6770_v22 = vadd.f32 %v2735_v63, %v2687_v49 }
 0x493   :  { %v2905_v8 = vmul.f32 %v6770_v22, %v6770_v22  ;;  %2858 = vmatmul.f32.gmra.mxu1 %v6770_v22 }
 0x495   :  { %v2939_v42 = vadd.f32 %v2905_v8, %v2904_v44 }
 0x496   :  { %v2689_v27 = vpop.f32.mrf.mxu2 }
 0x497   :  { %v2690_v59 = vadd.f32 %v2689_v27, %v6639_v18  ;;  %2940 = vadd.xlane.f32.xlu2 %v2939_v42  ;;  %v2908_v18 = vmul.f32 %v6674_v20, %v6674_v20 }
 0x499   :  { %v6778_v34 = vadd.f32 %v2738_v37, %v2690_v59  ;;  %v2910_v37 = vmul.f32 %v6682_v61, %v6682_v61 }
 0x49b   :  { %v2907_v60 = vmul.f32 %v6778_v34, %v6778_v34  ;;  %2861 = vmatmul.f32.gmra.mxu1 %v6778_v34 }
 0x49d   :  { %v2942_v19 = vadd.f32 %v2907_v60, %v2906_v39 }
 0x49e   :  { %v2691_v56 = vpop.f32.mrf.mxu2 }
 0x49f   :  { %v2692_v2 = vadd.f32 %v2691_v56, %v6646_v38  ;;  %2943 = vadd.xlane.f32.xlu1 %v2942_v19  ;;  %v2748_v38 = vpop.f32.mrf.mxu3 }
 0x4a1   :  { %v6786_v63 = vadd.f32 %v2740_v46, %v2692_v2 }
 0x4a3   :  { %2864 = vmatmul.f32.gmra.mxu1 %v6786_v63  ;;  %v2909_v16 = vmul.f32 %v6786_v63, %v6786_v63 }
 0x4a5   :  { %v2945_v50 = vadd.f32 %v2909_v16, %v2908_v18 }
 0x4a6   :  { %v2694_v58 = vpop.f32.mrf.mxu2 }
 0x4a7   :  { %v2695_v26 = vadd.f32 %v2694_v58, %v6654_v23  ;;  %2946 = vadd.xlane.f32.xlu0 %v2945_v50  ;;  %v2750_v40 = vpop.f32.mrf.mxu3 }
 0x4a9   :  { %v6794_v24 = vadd.f32 %v2743_v14, %v2695_v26 }
 0x4ab   :  { %v2911_v29 = vmul.f32 %v6794_v24, %v6794_v24  ;;  %2867 = vmatmul.f32.gmra.mxu1 %v6794_v24 }
 0x4ad   :  { %v2948_v17 = vadd.f32 %v2911_v29, %v2910_v37 }
 0x4ae   :  { %v2696_v45 = vpop.f32.mrf.mxu2 }
 0x4af   :  { %v2697_v57 = vadd.f32 %v2696_v45, %v6661_v7  ;;  %2949 = vadd.xlane.f32.xlu2 %v2948_v17  ;;  %v2914_v7 = vmul.f32 %v6697_v51, %v6697_v51  ;;  %v2753_v27 = vpop.f32.mrf.mxu3 }
 0x4b1   :  { %v6802_v30 = vadd.f32 %v2745_v3, %v2697_v57 }
 0x4b3   :  { %v2913_v23 = vmul.f32 %v6802_v30, %v6802_v30  ;;  %2870 = vmatmul.f32.gmra.mxu1 %v6802_v30 }
 0x4b5   :  { %v2951_v46 = vadd.f32 %v2913_v23, %v2912_v47  ;;  %v2922_v23 = vmul.f32 %v6727_v21, %v6727_v21 }
 0x4b6   :  { %v2699_v33 = vpop.f32.mrf.mxu2 }
 0x4b7   :  { %v2700_v4 = vadd.f32 %v2699_v33, %v6669_v1  ;;  %2952 = vadd.xlane.f32.xlu1 %v2951_v46  ;;  %v2916_v1 = vmul.f32 %v6704_v12, %v6704_v12  ;;  %v2755_v2 = vpop.f32.mrf.mxu3 }
 0x4b9   :  { %v6810_v49 = vadd.f32 %v2748_v38, %v2700_v4  ;;  %v2920_v38 = vmul.f32 %v6720_v13, %v6720_v13 }
 0x4bb   :  { %2873 = vmatmul.f32.gmra.mxu1 %v6810_v49  ;;  %v2915_v8 = vmul.f32 %v6810_v49, %v6810_v49 }
 0x4bd   :  { %v2954_v44 = vadd.f32 %v2915_v8, %v2914_v7 }
 0x4be   :  { %v2701_v42 = vpop.f32.mrf.mxu2 }
 0x4bf   :  { %v2702_v14 = vadd.f32 %v2701_v42, %v6676_v53  ;;  %2955 = vadd.xlane.f32.xlu0 %v2954_v44  ;;  %v2918_v53 = vmul.f32 %v6713_v36, %v6713_v36 }
 0x4c1   :  { %v6818_v59 = vadd.f32 %v2750_v40, %v2702_v14 }
 0x4c3   :  { %v2917_v39 = vmul.f32 %v6818_v59, %v6818_v59  ;;  %2876 = vmatmul.f32.gmra.mxu1 %v6818_v59 }
 0x4c5   :  { %v2957_v60 = vadd.f32 %v2917_v39, %v2916_v1 }
 0x4c6   :  { %v2704_v19 = vpop.f32.mrf.mxu2 }
 0x4c7   :  { %v2705_v56 = vadd.f32 %v2704_v19, %v6684_v54  ;;  %2958 = vadd.xlane.f32.xlu2 %v2957_v60  ;;  %v2758_v54 = vpop.f32.mrf.mxu3 }
 0x4c9   :  { %v6826_v3 = vadd.f32 %v2753_v27, %v2705_v56 }
 0x4cb   :  { %v2919_v18 = vmul.f32 %v6826_v3, %v6826_v3  ;;  %2879 = vmatmul.f32.gmra.mxu1 %v6826_v3 }
 0x4cd   :  { %v2960_v16 = vadd.f32 %v2919_v18, %v2918_v53 }
 0x4ce   :  { %v2706_v50 = vpop.f32.mrf.mxu2 }
 0x4cf   :  { %v2707_v58 = vadd.f32 %v2706_v50, %v6691_v55  ;;  %2961 = vadd.xlane.f32.xlu1 %v2960_v16  ;;  %v2785_v55 = vpop.f32.mrf.mxu0  ;;  %v2760_v40 = vpop.f32.mrf.mxu3 }
 0x4d1   :  { %v6834_v26 = vadd.f32 %v2755_v2, %v2707_v58 }
 0x4d3   :  { %v2921_v37 = vmul.f32 %v6834_v26, %v6834_v26  ;;  %2882 = vmatmul.f32.gmra.mxu1 %v6834_v26 }
 0x4d5   :  { %v2963_v29 = vadd.f32 %v2921_v37, %v2920_v38 }
 0x4d6   :  { %v2709_v17 = vpop.f32.mrf.mxu2 }
 0x4d7   :  { %v2710_v45 = vadd.f32 %v2709_v17, %v6699_v52  ;;  %2964 = vadd.xlane.f32.xlu0 %v2963_v29  ;;  %v2924_v52 = vmul.f32 %v6732_v32, %v6732_v32  ;;  %v2788_v44 = vpop.f32.mrf.mxu0  ;;  %v2763_v14 = vpop.f32.mrf.mxu3 }
 0x4d9   :  { %v6842_v57 = vadd.f32 %v2758_v54, %v2710_v45 }
 0x4db   :  { %7381 = vst [vmem:[#allocation9_spill] sm:$0xff] %v6842_v57  ;;  %v2923_v47 = vmul.f32 %v6842_v57, %v6842_v57  ;;  %2885 = vmatmul.f32.gmra.mxu1 %v6842_v57 }
 0x4dd   :  { %v2966_v46 = vadd.f32 %v2923_v47, %v2922_v23 }
 0x4de   :  { %v2711_v33 = vpop.f32.mrf.mxu2 }
 0x4df   :  { %v2712_v4 = vadd.f32 %v2711_v33, %v6706_v62  ;;  %2967 = vadd.xlane.f32.xlu2 %v2966_v46  ;;  %v2926_v62 = vmul.f32 %v6737_v48, %v6737_v48  ;;  %v2791_v56 = vpop.f32.mrf.mxu0  ;;  %v2765_v18 = vpop.f32.mrf.mxu3 }
 0x4e1   :  { %v6850_v7 = vadd.f32 %v2760_v40, %v2712_v4 }
 0x4e3   :  { %7382 = vst [vmem:[#allocation6_spill] sm:$0xff] %v6850_v7  ;;  %v2925_v8 = vmul.f32 %v6850_v7, %v6850_v7  ;;  %2888 = vmatmul.f32.gmra.mxu1 %v6850_v7 }
 0x4e5   :  { %v2969_v42 = vadd.f32 %v2925_v8, %v2924_v52 }
 0x4e6   :  { %v2714_v27 = vpop.f32.mrf.mxu2 }
 0x4e7   :  { %v2715_v1 = vadd.f32 %v2714_v27, %v6715_v9  ;;  %2970 = vadd.xlane.f32.xlu1 %v2969_v42  ;;  %v2928_v9 = vmul.f32 %v6742_v31, %v6742_v31  ;;  %v2794_v54 = vpop.f32.mrf.mxu0 }
 0x4e9   :  { %v6858_v39 = vadd.f32 %v2763_v14, %v2715_v1 }
 0x4eb   :  { %7383 = vst [vmem:[#allocation8_spill] sm:$0xff] %v6858_v39  ;;  %v2927_v60 = vmul.f32 %v6858_v39, %v6858_v39  ;;  %2891 = vmatmul.f32.gmra.mxu1 %v6858_v39 }
 0x4ed   :  { %v2972_v19 = vadd.f32 %v2927_v60, %v2926_v62 }
 0x4ee   :  { %v2716_v2 = vpop.f32.mrf.mxu2 }
 0x4ef   :  { %v2717_v53 = vadd.f32 %v2716_v2, %v6722_v28  ;;  %2973 = vadd.xlane.f32.xlu0 %v2972_v19  ;;  %v2797_v33 = vpop.f32.mrf.mxu0 }
 0x4f1   :  { %v6866_v16 = vadd.f32 %v2765_v18, %v2717_v53 }
 0x4f2   :  { %v2932_v29 = vpop.xlane.xlu2 %2931 }
 0x4f3   :  { %7384 = vst [vmem:[#allocation7_spill] sm:$0xff] %v6866_v16  ;;  %v2929_v50 = vmul.f32 %v6866_v16, %v6866_v16  ;;  %2894 = vmatmul.f32.gmra.mxu1 %v6866_v16  ;;  %v2994_v28 = vmul.f32 0.0051020407, %v2932_v29 }
 0x4f5   :  { %v2975_v58 = vadd.f32 %v2929_v50, %v2928_v9 }
 0x4f7   :  { %2976 = vadd.xlane.f32.xlu2 %v2975_v58 }
 0x4f8   :  { %v2850_v38 = vpop.f32.mrf.mxu1 }
 0x4f9   :  { %v2851_v37 = vadd.f32 %v2850_v38, %v2785_v55 }
 0x4fa   :  { %v2935_v4 = vpop.xlane.xlu1 %2934 }
 0x4fb   :  { %v6873_v17 = vmul.f32 0.0051020407, %v2851_v37  ;;  %v2995_v42 = vmul.f32 0.0051020407, %v2935_v4  ;;  %v6890_v4 = vld [vmem:[%s7270_s3] sm:$0xff] }
 0x4fd   :  { %v3010_v45 = vmul.f32 %v6873_v17, %v6873_v17 }
 0x4ff   :  { %v3026_v23 = vsub.f32 %v2994_v28, %v3010_v45 }
 0x500   :  { %v2853_v47 = vpop.f32.mrf.mxu1 }
 0x501   :  { %v3042_v40 = vmax.f32 %v3026_v23, 0.0  ;;  %v2854_v46 = vadd.f32 %v2853_v47, %v2788_v44  ;;  %v2800_v44 = vpop.f32.mrf.mxu0 }
 0x502   :  { %v2938_v60 = vpop.xlane.xlu0 %2937 }
 0x503   :  { %v3074_v52 = vadd.f32 1e-05, %v3042_v40  ;;  %v6877_v8 = vmul.f32 0.0051020407, %v2854_v46  ;;  %v2996_v9 = vmul.f32 0.0051020407, %v2938_v60 }
 0x505   :  { %4002 = vrsqrt.f32 %v3074_v52  ;;  %v3011_v55 = vmul.f32 %v6877_v8, %v6877_v8  ;;  %vm3096_vm12 = vweird.f32 %v3074_v52 }
 0x507   :  { %v3027_v27 = vsub.f32 %v2995_v42, %v3011_v55 }
 0x508   :  { %v2856_v14 = vpop.f32.mrf.mxu1 }
 0x509   :  { %v3043_v1 = vmax.f32 %v3027_v27, 0.0  ;;  %v2857_v62 = vadd.f32 %v2856_v14, %v2791_v56  ;;  %v2803_v14 = vpop.f32.mrf.mxu0 }
 0x50a   :  { %v2941_v56 = vpop.xlane.xlu2 %2940 }
 0x50b   :  { %v4003_v19 = vpop.eup %4002  ;;  %v3075_v2 = vadd.f32 1e-05, %v3043_v1  ;;  %v6881_v53 = vmul.f32 0.0051020407, %v2857_v62  ;;  %v2997_v27 = vmul.f32 0.0051020407, %v2941_v56 }
 0x50c   :  { %v3091_v18 = vmul.f32 %v4003_v19, %v3074_v52  ;;  %vm3097_vm11 = vweird.f32 %v4003_v19 }
 0x50d   :  { %4004 = vrsqrt.f32 %v3075_v2  ;;  %v3012_v50 = vmul.f32 %v6881_v53, %v6881_v53  ;;  %vm3098_vm13 = vmor %vm3096_vm12, %vm3097_vm11  ;;  %vm3106_vm15 = vweird.f32 %v3075_v2 }
 0x50e   :  { %v3092_v58 = vmul.f32 %v4003_v19, %v3091_v18 }
 0x50f   :  { %v3028_v38 = vsub.f32 %v2996_v9, %v3012_v50 }
 0x510   :  { %v3093_v37 = vmul.f32 0.5, %v3092_v58  ;;  %v2859_v29 = vpop.f32.mrf.mxu1 }
 0x511   :  { %v3044_v28 = vmax.f32 %v3028_v38, 0.0  ;;  %v2860_v45 = vadd.f32 %v2859_v29, %v2794_v54 }
 0x512   :  { %v3094_v23 = vsub.f32 1.5, %v3093_v37  ;;  %v2944_v52 = vpop.xlane.xlu1 %2943 }
 0x513   :  { %v4005_v47 = vpop.eup %4004  ;;  %v3076_v40 = vadd.f32 1e-05, %v3044_v28  ;;  %v6885_v46 = vmul.f32 0.0051020407, %v2860_v45 }
 0x514   :  { %v3095_v42 = vmul.f32 %v4003_v19, %v3094_v23  ;;  %v3101_v55 = vmul.f32 %v4005_v47, %v3075_v2  ;;  %vm3107_vm14 = vweird.f32 %v4005_v47 }
 0x515   :  { %4006 = vrsqrt.f32 %v3076_v40  ;;  %v3013_v54 = vmul.f32 %v6885_v46, %v6885_v46  ;;  %vm3108_vm0 = vmor %vm3106_vm15, %vm3107_vm14  ;;  %vm3116_vm2 = vweird.f32 %v3076_v40 }
 0x516   :  { %v3099_v1 = vsel %vm3098_vm13, %v4003_v19, %v3095_v42  ;;  %v3102_v62 = vmul.f32 %v4005_v47, %v3101_v55  ;;  %v6900_v19 = vld [vmem:[%s7270_s3 + $0x8] sm:$0xff]  ;;  %v2998_v42 = vmul.f32 0.0051020407, %v2944_v52 }
 0x517   :  { %v3250_v60 = vmul.f32 %v3099_v1, %v6890_v4  ;;  %v3029_v18 = vsub.f32 %v2997_v27, %v3013_v54 }
 0x518   :  { %v3103_v9 = vmul.f32 0.5, %v3102_v62  ;;  %v2862_v50 = vpop.f32.mrf.mxu1 }
 0x519   :  { %v3045_v58 = vmax.f32 %v3029_v18, 0.0  ;;  %v2863_v38 = vadd.f32 %v2862_v50, %v2797_v33  ;;  %3364 = vperm.xlu1 %3917, %v3250_v60   ;;  %v3266_v54 = vmul.f32 %v3250_v60, %v6873_v17  ;;  %v2806_v18 = vpop.f32.mrf.mxu0  ;;  %v6914_v17 = vld [vmem:[%s7270_s3 + $0x10] sm:$0xff] }
 0x51a   :  { %v3104_v37 = vsub.f32 1.5, %v3103_v9  ;;  %v2947_v52 = vpop.xlane.xlu0 %2946 }
 0x51b   :  { %v4007_v29 = vpop.eup %4006  ;;  %v3077_v28 = vadd.f32 1e-05, %v3045_v58  ;;  %v6895_v45 = vmul.f32 0.0051020407, %v2863_v38  ;;  %v2999_v60 = vmul.f32 0.0051020407, %v2947_v52 }
 0x51c   :  { %v3105_v23 = vmul.f32 %v4005_v47, %v3104_v37  ;;  %v3111_v56 = vmul.f32 %v4007_v29, %v3076_v40  ;;  %vm3117_vm1 = vweird.f32 %v4007_v29 }
 0x51d   :  { %4008 = vrsqrt.f32 %v3077_v28  ;;  %v3014_v33 = vmul.f32 %v6895_v45, %v6895_v45  ;;  %vm3118_vm3 = vmor %vm3116_vm2, %vm3117_vm1  ;;  %vm3126_vm5 = vweird.f32 %v3077_v28 }
 0x51e   :  { %v3109_v55 = vsel %vm3108_vm0, %v4005_v47, %v3105_v23  ;;  %v3112_v27 = vmul.f32 %v4007_v29, %v3111_v56 }
 0x51f   :  { %v3251_v1 = vmul.f32 %v3109_v55, %v6900_v19  ;;  %v3030_v62 = vsub.f32 %v2998_v42, %v3014_v33 }
 0x520   :  { %v3113_v9 = vmul.f32 0.5, %v3112_v27  ;;  %v2865_v50 = vpop.f32.mrf.mxu1 }
 0x521   :  { %v3267_v58 = vmul.f32 %v3251_v1, %v6877_v8  ;;  %v3046_v2 = vmax.f32 %v3030_v62, 0.0  ;;  %v2866_v38 = vadd.f32 %v2865_v50, %v2800_v44  ;;  %3298 = vrot.lane.b32.xlu1 %v3266_v54, %s4131_s21  ;;  %3369 = vperm.xlu2 %3915, %v3251_v1  }
 0x522   :  { %v3114_v37 = vsub.f32 1.5, %v3113_v9 }
 0x523   :  { %v4009_v47 = vpop.eup %4008  ;;  %v3078_v23 = vadd.f32 1e-05, %v3046_v2  ;;  %v6908_v56 = vmul.f32 0.0051020407, %v2866_v38  ;;  %3300 = vrot.lane.b32.xlu0 %v3267_v58, %s4131_s21  ;;  %v2809_v2 = vpop.f32.mrf.mxu0 }
 0x524   :  { %v3115_v8 = vmul.f32 %v4007_v29, %v3114_v37  ;;  %v3121_v44 = vmul.f32 %v4009_v47, %v3077_v28  ;;  %vm3127_vm4 = vweird.f32 %v4009_v47  ;;  %v2950_v38 = vpop.xlane.xlu2 %2949 }
 0x525   :  { %4010 = vrsqrt.f32 %v3078_v23  ;;  %v3015_v42 = vmul.f32 %v6908_v56, %v6908_v56  ;;  %vm3128_vm6 = vmor %vm3126_vm5, %vm3127_vm4  ;;  %vm3136_vm8 = vweird.f32 %v3078_v23 }
 0x526   :  { %v3119_v33 = vsel %vm3118_vm3, %v4007_v29, %v3115_v8  ;;  %v3122_v55 = vmul.f32 %v4009_v47, %v3121_v44  ;;  %v6926_v29 = vld [vmem:[%s7270_s3 + $0x18] sm:$0xff] }
 0x527   :  { %v3252_v27 = vmul.f32 %v3119_v33, %v6914_v17  ;;  %v3031_v54 = vsub.f32 %v2999_v60, %v3015_v42 }
 0x528   :  { %v3123_v1 = vmul.f32 0.5, %v3122_v55  ;;  %v2868_v62 = vpop.f32.mrf.mxu1 }
 0x529   :  { %v3268_v9 = vmul.f32 %v3252_v27, %v6881_v53  ;;  %v3047_v50 = vmax.f32 %v3031_v54, 0.0  ;;  %v2869_v58 = vadd.f32 %v2868_v62, %v2803_v14  ;;  %v3000_v14 = vmul.f32 0.0051020407, %v2950_v38 }
 0x52a   :  { %v3124_v40 = vsub.f32 1.5, %v3123_v1 }
 0x52b   :  { %v4011_v37 = vpop.eup %4010  ;;  %v3079_v52 = vadd.f32 1e-05, %v3047_v50  ;;  %v6920_v16 = vmul.f32 0.0051020407, %v2869_v58  ;;  %3374 = vperm.xlu0 %3918, %v3252_v27   ;;  %3302 = vrot.lane.b32.xlu2 %v3268_v9, %s4131_s21  ;;  %v2953_v50 = vpop.xlane.xlu1 %2952 }
 0x52c   :  { %v3125_v8 = vmul.f32 %v4009_v47, %v3124_v40  ;;  %v3131_v53 = vmul.f32 %v4011_v37, %v3078_v23  ;;  %vm3137_vm7 = vweird.f32 %v4011_v37 }
 0x52d   :  { %4012 = vrsqrt.f32 %v3079_v52  ;;  %v3016_v44 = vmul.f32 %v6920_v16, %v6920_v16  ;;  %vm3138_vm9 = vmor %vm3136_vm8, %vm3137_vm7  ;;  %vm3146_vm11 = vweird.f32 %v3079_v52 }
 0x52e   :  { %v3129_v60 = vsel %vm3128_vm6, %v4009_v47, %v3125_v8  ;;  %v3132_v42 = vmul.f32 %v4011_v37, %v3131_v53  ;;  %v2812_v47 = vpop.f32.mrf.mxu0  ;;  %v6938_v8 = vld [vmem:[%s7270_s3 + $0x20] sm:$0xff] }
 0x52f   :  { %v3253_v33 = vmul.f32 %v3129_v60, %v6926_v29  ;;  %v3032_v55 = vsub.f32 %v3000_v14, %v3016_v44 }
 0x530   :  { %v3133_v27 = vmul.f32 0.5, %v3132_v42  ;;  %v2871_v54 = vpop.f32.mrf.mxu1 }
 0x531   :  { %v3269_v1 = vmul.f32 %v3253_v33, %v6885_v46  ;;  %v3048_v62 = vmax.f32 %v3032_v55, 0.0  ;;  %v2872_v9 = vadd.f32 %v2871_v54, %v2806_v18  ;;  %3379 = vperm.xlu1 %3917, %v3253_v33   ;;  %v3001_v18 = vmul.f32 0.0051020407, %v2953_v50 }
 0x532   :  { %v3134_v28 = vsub.f32 1.5, %v3133_v27 }
 0x533   :  { %v4013_v58 = vpop.eup %4012  ;;  %v3080_v40 = vadd.f32 1e-05, %v3048_v62  ;;  %v6932_v38 = vmul.f32 0.0051020407, %v2872_v9  ;;  %3304 = vrot.lane.b32.xlu0 %v3269_v1, %s4131_s21  ;;  %v2956_v9 = vpop.xlane.xlu0 %2955 }
 0x534   :  { %v3135_v53 = vmul.f32 %v4011_v37, %v3134_v28  ;;  %v3141_v46 = vmul.f32 %v4013_v58, %v3079_v52  ;;  %vm3147_vm10 = vweird.f32 %v4013_v58 }
 0x535   :  { %4014 = vrsqrt.f32 %v3080_v40  ;;  %v3017_v14 = vmul.f32 %v6932_v38, %v6932_v38  ;;  %vm3148_vm12 = vmor %vm3146_vm11, %vm3147_vm10  ;;  %vm3156_vm14 = vweird.f32 %v3080_v40 }
 0x536   :  { %v3139_v44 = vsel %vm3138_vm9, %v4011_v37, %v3135_v53  ;;  %v3142_v60 = vmul.f32 %v4013_v58, %v3141_v46  ;;  %v6950_v37 = vld [vmem:[%s7270_s3 + $0x28] sm:$0xff] }
 0x537   :  { %v3254_v42 = vmul.f32 %v3139_v44, %v6938_v8  ;;  %v3033_v33 = vsub.f32 %v3001_v18, %v3017_v14  ;;  %v2815_v18 = vpop.f32.mrf.mxu0 }
 0x538   :  { %v3143_v55 = vmul.f32 0.5, %v3142_v60  ;;  %v2874_v27 = vpop.f32.mrf.mxu1 }
 0x539   :  { %v3270_v54 = vmul.f32 %v3254_v42, %v6895_v45  ;;  %v3049_v1 = vmax.f32 %v3033_v33, 0.0  ;;  %v2875_v62 = vadd.f32 %v2874_v27, %v2809_v2  ;;  %3384 = vperm.xlu2 %3915, %v3254_v42   ;;  %v3002_v2 = vmul.f32 0.0051020407, %v2956_v9 }
 0x53a   :  { %v3144_v23 = vsub.f32 1.5, %v3143_v55 }
 0x53b   :  { %v4015_v28 = vpop.eup %4014  ;;  %v3081_v50 = vadd.f32 1e-05, %v3049_v1  ;;  %v6944_v31 = vmul.f32 0.0051020407, %v2875_v62  ;;  %3306 = vrot.lane.b32.xlu1 %v3270_v54, %s4131_s21  ;;  %v2959_v62 = vpop.xlane.xlu2 %2958 }
 0x53c   :  { %v3145_v53 = vmul.f32 %v4013_v58, %v3144_v23  ;;  %v3151_v45 = vmul.f32 %v4015_v28, %v3080_v40  ;;  %vm3157_vm13 = vweird.f32 %v4015_v28 }
 0x53d   :  { %4016 = vrsqrt.f32 %v3081_v50  ;;  %v3018_v46 = vmul.f32 %v6944_v31, %v6944_v31  ;;  %vm3158_vm15 = vmor %vm3156_vm14, %vm3157_vm13  ;;  %vm3166_vm1 = vweird.f32 %v3081_v50 }
 0x53e   :  { %v3149_v14 = vsel %vm3148_vm12, %v4013_v58, %v3145_v53  ;;  %v3152_v44 = vmul.f32 %v4015_v28, %v3151_v45  ;;  %v6962_v58 = vld [vmem:[%s7270_s3 + $0x30] sm:$0xff] }
 0x53f   :  { %v3255_v60 = vmul.f32 %v3149_v14, %v6950_v37  ;;  %v3034_v42 = vsub.f32 %v3002_v2, %v3018_v46 }
 0x540   :  { %v3153_v33 = vmul.f32 0.5, %v3152_v44  ;;  %v2877_v55 = vpop.f32.mrf.mxu1 }
 0x541   :  { %v3271_v27 = vmul.f32 %v3255_v60, %v6908_v56  ;;  %v3050_v54 = vmax.f32 %v3034_v42, 0.0  ;;  %v2878_v1 = vadd.f32 %v2877_v55, %v2812_v47  ;;  %v3003_v47 = vmul.f32 0.0051020407, %v2959_v62 }
 0x542   :  { %v3154_v52 = vsub.f32 1.5, %v3153_v33 }
 0x543   :  { %v4017_v23 = vpop.eup %4016  ;;  %v3082_v9 = vadd.f32 1e-05, %v3050_v54  ;;  %v6956_v57 = vmul.f32 0.0051020407, %v2878_v1  ;;  %3389 = vperm.xlu1 %3917, %v3255_v60   ;;  %3308 = vrot.lane.b32.xlu2 %v3271_v27, %s4131_s21  ;;  %v2818_v60 = vpop.f32.mrf.mxu0 }
 0x544   :  { %v3155_v53 = vmul.f32 %v4015_v28, %v3154_v52  ;;  %v3161_v56 = vmul.f32 %v4017_v23, %v3081_v50  ;;  %vm3167_vm0 = vweird.f32 %v4017_v23  ;;  %v2962_v1 = vpop.xlane.xlu1 %2961 }
 0x545   :  { %4018 = vrsqrt.f32 %v3082_v9  ;;  %v3019_v45 = vmul.f32 %v6956_v57, %v6956_v57  ;;  %vm3168_vm2 = vmor %vm3166_vm1, %vm3167_vm0  ;;  %vm3176_vm4 = vweird.f32 %v3082_v9 }
 0x546   :  { %v3159_v2 = vsel %vm3158_vm15, %v4015_v28, %v3155_v53  ;;  %v3162_v46 = vmul.f32 %v4017_v23, %v3161_v56  ;;  %v6974_v28 = vld [vmem:[%s7270_s3 + $0x38] sm:$0xff] }
 0x547   :  { %v3256_v14 = vmul.f32 %v3159_v2, %v6962_v58  ;;  %v3035_v44 = vsub.f32 %v3003_v47, %v3019_v45 }
 0x548   :  { %v3163_v42 = vmul.f32 0.5, %v3162_v46  ;;  %v2880_v33 = vpop.f32.mrf.mxu1 }
 0x549   :  { %v3272_v55 = vmul.f32 %v3256_v14, %v6920_v16  ;;  %v3051_v27 = vmax.f32 %v3035_v44, 0.0  ;;  %v2881_v54 = vadd.f32 %v2880_v33, %v2815_v18  ;;  %v3004_v18 = vmul.f32 0.0051020407, %v2962_v1 }
 0x54a   :  { %v3164_v40 = vsub.f32 1.5, %v3163_v42 }
 0x54b   :  { %v4019_v52 = vpop.eup %4018  ;;  %v3083_v62 = vadd.f32 1e-05, %v3051_v27  ;;  %v6968_v21 = vmul.f32 0.0051020407, %v2881_v54  ;;  %3394 = vperm.xlu2 %3915, %v3256_v14   ;;  %3310 = vrot.lane.b32.xlu0 %v3272_v55, %s4131_s21  ;;  %v2821_v27 = vpop.f32.mrf.mxu0 }
 0x54c   :  { %v3165_v53 = vmul.f32 %v4017_v23, %v3164_v40  ;;  %v3171_v16 = vmul.f32 %v4019_v52, %v3082_v9  ;;  %vm3177_vm3 = vweird.f32 %v4019_v52  ;;  %v2965_v54 = vpop.xlane.xlu0 %2964 }
 0x54d   :  { %4020 = vrsqrt.f32 %v3083_v62  ;;  %v3020_v56 = vmul.f32 %v6968_v21, %v6968_v21  ;;  %vm3178_vm5 = vmor %vm3176_vm4, %vm3177_vm3  ;;  %vm3186_vm7 = vweird.f32 %v3083_v62 }
 0x54e   :  { %v3169_v47 = vsel %vm3168_vm2, %v4017_v23, %v3165_v53  ;;  %v3172_v45 = vmul.f32 %v4019_v52, %v3171_v16  ;;  %v6986_v23 = vld [vmem:[%s7270_s3 + $0x40] sm:$0xff] }
 0x54f   :  { %v3257_v2 = vmul.f32 %v3169_v47, %v6974_v28  ;;  %v3036_v46 = vsub.f32 %v3004_v18, %v3020_v56 }
 0x550   :  { %v3173_v14 = vmul.f32 0.5, %v3172_v45  ;;  %v2883_v44 = vpop.f32.mrf.mxu1 }
 0x551   :  { %v3273_v42 = vmul.f32 %v3257_v2, %v6932_v38  ;;  %v3052_v33 = vmax.f32 %v3036_v46, 0.0  ;;  %v2884_v55 = vadd.f32 %v2883_v44, %v2818_v60  ;;  %v3005_v60 = vmul.f32 0.0051020407, %v2965_v54 }
 0x552   :  { %v3174_v50 = vsub.f32 1.5, %v3173_v14  ;;  %v2968_v9 = vpop.xlane.xlu2 %2967 }
 0x553   :  { %v4021_v40 = vpop.eup %4020  ;;  %v3084_v1 = vadd.f32 1e-05, %v3052_v33  ;;  %v6980_v39 = vmul.f32 0.0051020407, %v2884_v55  ;;  %3399 = vperm.xlu0 %3918, %v3257_v2   ;;  %3312 = vrot.lane.b32.xlu1 %v3273_v42, %s4131_s21 }
 0x554   :  { %v3175_v53 = vmul.f32 %v4019_v52, %v3174_v50  ;;  %v3181_v38 = vmul.f32 %v4021_v40, %v3083_v62  ;;  %vm3187_vm6 = vweird.f32 %v4021_v40 }
 0x555   :  { %4022 = vrsqrt.f32 %v3084_v1  ;;  %v3021_v16 = vmul.f32 %v6980_v39, %v6980_v39  ;;  %vm3188_vm8 = vmor %vm3186_vm7, %vm3187_vm6  ;;  %vm3196_vm10 = vweird.f32 %v3084_v1 }
 0x556   :  { %v3179_v18 = vsel %vm3178_vm5, %v4019_v52, %v3175_v53  ;;  %v3182_v56 = vmul.f32 %v4021_v40, %v3181_v38  ;;  %v2824_v52 = vpop.f32.mrf.mxu0  ;;  %v6998_v53 = vld [vmem:[%s7270_s3 + $0x48] sm:$0xff] }
 0x557   :  { %v3258_v47 = vmul.f32 %v3179_v18, %v6986_v23  ;;  %v3037_v45 = vsub.f32 %v3005_v60, %v3021_v16 }
 0x558   :  { %v3183_v2 = vmul.f32 0.5, %v3182_v56  ;;  %v2886_v46 = vpop.f32.mrf.mxu1 }
 0x559   :  { %v3274_v14 = vmul.f32 %v3258_v47, %v6944_v31  ;;  %v3053_v44 = vmax.f32 %v3037_v45, 0.0  ;;  %v2887_v42 = vadd.f32 %v2886_v46, %v2821_v27  ;;  %v3006_v27 = vmul.f32 0.0051020407, %v2968_v9 }
 0x55a   :  { %v3184_v33 = vsub.f32 1.5, %v3183_v2  ;;  %v2971_v62 = vpop.xlane.xlu1 %2970 }
 0x55b   :  { %v4023_v55 = vpop.eup %4022  ;;  %v3085_v50 = vadd.f32 1e-05, %v3053_v44  ;;  %v6992_v54 = vmul.f32 0.0051020407, %v2887_v42  ;;  %3404 = vperm.xlu1 %3917, %v3258_v47   ;;  %3314 = vrot.lane.b32.xlu2 %v3274_v14, %s4131_s21 }
 0x55c   :  { %v3185_v38 = vmul.f32 %v4021_v40, %v3184_v33  ;;  %v3191_v31 = vmul.f32 %v4023_v55, %v3084_v1  ;;  %vm3197_vm9 = vweird.f32 %v4023_v55 }
 0x55d   :  { %4024 = vrsqrt.f32 %v3085_v50  ;;  %v3022_v60 = vmul.f32 %v6992_v54, %v6992_v54  ;;  %vm3198_vm11 = vmor %vm3196_vm10, %vm3197_vm9  ;;  %vm3206_vm13 = vweird.f32 %v3085_v50 }
 0x55e   :  { %v3189_v16 = vsel %vm3188_vm8, %v4021_v40, %v3185_v38  ;;  %v3192_v18 = vmul.f32 %v4023_v55, %v3191_v31  ;;  %v7010_v40 = vld [vmem:[%s7270_s3 + $0x50] sm:$0xff] }
 0x55f   :  { %v3259_v56 = vmul.f32 %v3189_v16, %v6998_v53  ;;  %v3038_v47 = vsub.f32 %v3006_v27, %v3022_v60  ;;  %v2827_v27 = vpop.f32.mrf.mxu0 }
 0x560   :  { %v3193_v45 = vmul.f32 0.5, %v3192_v18  ;;  %v2889_v2 = vpop.f32.mrf.mxu1 }
 0x561   :  { %v3275_v46 = vmul.f32 %v3259_v56, %v6956_v57  ;;  %v3054_v14 = vmax.f32 %v3038_v47, 0.0  ;;  %v2890_v44 = vadd.f32 %v2889_v2, %v2824_v52  ;;  %v3007_v52 = vmul.f32 0.0051020407, %v2971_v62 }
 0x562   :  { %v3194_v42 = vsub.f32 1.5, %v3193_v45 }
 0x563   :  { %v4025_v33 = vpop.eup %4024  ;;  %v3086_v48 = vadd.f32 1e-05, %v3054_v14  ;;  %v7004_v9 = vmul.f32 0.0051020407, %v2890_v44  ;;  %3409 = vperm.xlu2 %3915, %v3259_v56   ;;  %3316 = vrot.lane.b32.xlu0 %v3275_v46, %s4131_s21  ;;  %v2974_v44 = vpop.xlane.xlu0 %2973 }
 0x564   :  { %v3195_v38 = vmul.f32 %v4023_v55, %v3194_v42  ;;  %v3201_v57 = vmul.f32 %v4025_v33, %v3085_v50  ;;  %vm3207_vm12 = vweird.f32 %v4025_v33 }
 0x565   :  { %4026 = vrsqrt.f32 %v3086_v48  ;;  %v3023_v31 = vmul.f32 %v7004_v9, %v7004_v9  ;;  %vm3208_vm14 = vmor %vm3206_vm13, %vm3207_vm12  ;;  %vm3216_vm0 = vweird.f32 %v3086_v48 }
 0x566   :  { %v3199_v60 = vsel %vm3198_vm11, %v4023_v55, %v3195_v38  ;;  %v3202_v16 = vmul.f32 %v4025_v33, %v3201_v57  ;;  %v7022_v55 = vld [vmem:[%s7270_s3 + $0x58] sm:$0xff]  ;;  %v3008_v57 = vmul.f32 0.0051020407, %v2974_v44 }
 0x567   :  { %v3260_v18 = vmul.f32 %v3199_v60, %v7010_v40  ;;  %v3039_v56 = vsub.f32 %v3007_v52, %v3023_v31 }
 0x568   :  { %v3203_v47 = vmul.f32 0.5, %v3202_v16  ;;  %v2892_v45 = vpop.f32.mrf.mxu1 }
 0x569   :  { %v3276_v2 = vmul.f32 %v3260_v18, %v6968_v21  ;;  %v3055_v46 = vmax.f32 %v3039_v56, 0.0  ;;  %v2893_v14 = vadd.f32 %v2892_v45, %v2827_v27 }
 0x56a   :  { %v3204_v1 = vsub.f32 1.5, %v3203_v47 }
 0x56b   :  { %v4027_v42 = vpop.eup %4026  ;;  %v3087_v62 = vadd.f32 1e-05, %v3055_v46  ;;  %v7016_v7 = vmul.f32 0.0051020407, %v2893_v14  ;;  %3414 = vperm.xlu0 %3918, %v3260_v18   ;;  %3318 = vrot.lane.b32.xlu1 %v3276_v2, %s4131_s21  ;;  %v2830_v18 = vpop.f32.mrf.mxu0 }
 0x56c   :  { %v3205_v38 = vmul.f32 %v4025_v33, %v3204_v1  ;;  %v3211_v21 = vmul.f32 %v4027_v42, %v3086_v48  ;;  %vm3217_vm15 = vweird.f32 %v4027_v42  ;;  %v2977_v14 = vpop.xlane.xlu2 %2976  ;;  %v7040_v48 = vld [vmem:[%s7270_s3 + $0x68] sm:$0xff] }
 0x56d   :  { %4028 = vrsqrt.f32 %v3087_v62  ;;  %v3024_v52 = vmul.f32 %v7016_v7, %v7016_v7  ;;  %vm3218_vm1 = vmor %vm3216_vm0, %vm3217_vm15  ;;  %vm3226_vm3 = vweird.f32 %v3087_v62 }
 0x56e   :  { %v3209_v31 = vsel %vm3208_vm14, %v4025_v33, %v3205_v38  ;;  %v3212_v27 = vmul.f32 %v4027_v42, %v3211_v21  ;;  %v7032_v33 = vld [vmem:[%s7270_s3 + $0x60] sm:$0xff] }
 0x56f   :  { %v3261_v60 = vmul.f32 %v3209_v31, %v7022_v55  ;;  %v3040_v16 = vsub.f32 %v3008_v57, %v3024_v52 }
 0x570   :  { %v3213_v56 = vmul.f32 0.5, %v3212_v27  ;;  %v2895_v47 = vpop.f32.mrf.mxu1 }
 0x571   :  { %v3277_v45 = vmul.f32 %v3261_v60, %v6980_v39  ;;  %v3056_v2 = vmax.f32 %v3040_v16, 0.0  ;;  %v2896_v46 = vadd.f32 %v2895_v47, %v2830_v18  ;;  %v3009_v39 = vmul.f32 0.0051020407, %v2977_v14 }
 0x572   :  { %v3214_v50 = vsub.f32 1.5, %v3213_v56 }
 0x573   :  { %v4029_v1 = vpop.eup %4028  ;;  %v3088_v44 = vadd.f32 1e-05, %v3056_v2  ;;  %v2993_v32 = vmul.f32 0.0051020407, %v2896_v46  ;;  %3419 = vperm.xlu1 %3917, %v3261_v60   ;;  %3320 = vrot.lane.b32.xlu2 %v3277_v45, %s4131_s21 }
 0x574   :  { %v3215_v38 = vmul.f32 %v4027_v42, %v3214_v50  ;;  %v3221_v21 = vmul.f32 %v4029_v1, %v3087_v62  ;;  %vm3227_vm2 = vweird.f32 %v4029_v1 }
 0x575   :  { %4030 = vrsqrt.f32 %v3088_v44  ;;  %v3025_v57 = vmul.f32 %v2993_v32, %v2993_v32  ;;  %vm3228_vm4 = vmor %vm3226_vm3, %vm3227_vm2  ;;  %vm3236_vm6 = vweird.f32 %v3088_v44 }
 0x576   :  { %v3219_v52 = vsel %vm3218_vm1, %v4027_v42, %v3215_v38  ;;  %v3222_v31 = vmul.f32 %v4029_v1, %v3221_v21 }
 0x577   :  { %v3262_v27 = vmul.f32 %v3219_v52, %v7032_v33  ;;  %v3041_v16 = vsub.f32 %v3009_v39, %v3025_v57  ;;  %v7048_v52 = vld [vmem:[%s7270_s3 + $0x70] sm:$0xff] }
 0x578   :  { %v3223_v60 = vmul.f32 0.5, %v3222_v31 }
 0x579   :  { %v3278_v18 = vmul.f32 %v3262_v27, %v6992_v54  ;;  %v3057_v56 = vmax.f32 %v3041_v16, 0.0 }
 0x57a   :  { %v3224_v47 = vsub.f32 1.5, %v3223_v60 }
 0x57b   :  { %v4031_v45 = vpop.eup %4030  ;;  %v3089_v2 = vadd.f32 1e-05, %v3057_v56  ;;  %3424 = vperm.xlu2 %3915, %v3262_v27   ;;  %3322 = vrot.lane.b32.xlu0 %v3278_v18, %s4131_s21  ;;  %v7052_v56 = vpop.permute.xlu2 %3369 }
 0x57c   :  { %v3225_v42 = vmul.f32 %v4029_v1, %v3224_v47  ;;  %v3231_v46 = vmul.f32 %v4031_v45, %v3088_v44  ;;  %vm3237_vm5 = vweird.f32 %v4031_v45  ;;  %v7058_v44 = vld [vmem:[%s7270_s3 + $0x78] sm:$0xff] }
 0x57d   :  { %4032 = vrsqrt.f32 %v3089_v2  ;;  %vm3238_vm7 = vmor %vm3236_vm6, %vm3237_vm5  ;;  %vm3246_vm9 = vweird.f32 %v3089_v2 }
 0x57e   :  { %v3229_v50 = vsel %vm3228_vm4, %v4029_v1, %v3225_v42  ;;  %v3232_v54 = vmul.f32 %v4031_v45, %v3231_v46 }
 0x57f   :  { %v3263_v14 = vmul.f32 %v3229_v50, %v7040_v48 }
 0x580   :  { %v3233_v38 = vmul.f32 0.5, %v3232_v54 }
 0x581   :  { %v3279_v21 = vmul.f32 %v3263_v14, %v7004_v9 }
 0x582   :  { %v3234_v39 = vsub.f32 1.5, %v3233_v38 }
 0x583   :  { %v4033_v57 = vpop.eup %4032  ;;  %3324 = vrot.lane.b32.xlu1 %v3279_v21, %s4131_s21 }
 0x584   :  { %v3235_v62 = vmul.f32 %v4031_v45, %v3234_v39  ;;  %v3241_v31 = vmul.f32 %v4033_v57, %v3089_v2  ;;  %vm3247_vm8 = vweird.f32 %v4033_v57 }
 0x585   :  { %vm3248_vm10 = vmor %vm3246_vm9, %vm3247_vm8 }
 0x586   :  { %v3239_v1 = vsel %vm3238_vm7, %v4031_v45, %v3235_v62  ;;  %v3242_v27 = vmul.f32 %v4033_v57, %v3241_v31 }
 0x587   :  { %v3264_v16 = vmul.f32 %v3239_v1, %v7048_v52 }
 0x588   :  { %v3243_v60 = vmul.f32 0.5, %v3242_v27 }
 0x589   :  { %v3280_v9 = vmul.f32 %v3264_v16, %v7016_v7  ;;  %v3303_v7 = vpop.permute.xlu2 %3302 }
 0x58a   :  { %v3244_v18 = vsub.f32 1.5, %v3243_v60  ;;  %v3348_v21 = vsub.f32 %v6914_v17, %v3303_v7 }
 0x58b   :  { %3434 = vperm.xlu1 %3917, %v3264_v16   ;;  %3326 = vrot.lane.b32.xlu2 %v3280_v9, %s4131_s21  ;;  %v7061_v50 = vpop.permute.xlu1 %3364 }
 0x58c   :  { %v3245_v47 = vmul.f32 %v4033_v57, %v3244_v18 }
 0x58e   :  { %v3249_v45 = vsel %vm3248_vm10, %v4033_v57, %v3245_v47 }
 0x58f   :  { %v3265_v42 = vmul.f32 %v3249_v45, %v7058_v44 }
 0x591   :  { %v3281_v46 = vmul.f32 %v3265_v42, %v2993_v32 }
 0x593   :  { %3439 = vperm.xlu2 %3915, %v3265_v42   ;;  %3328 = vrot.lane.b32.xlu0 %v3281_v46, %s4131_s21  ;;  %v7067_v2 = vpop.permute.xlu2 %3384  ;;  %v3299_v32 = vpop.permute.xlu1 %3298 }
 0x594   :  { %3920 = vset.pattern.permute.xlu1 %v7321_v25  ;;  %v3346_v57 = vsub.f32 %v6890_v4, %v3299_v32 }
 0x595   :  { %v3301_v54 = vpop.permute.xlu0 %3300 }
 0x596   :  { %v3347_v38 = vsub.f32 %v6900_v19, %v3301_v54 }
 0x598   :  { %3481 = vperm.xlu1 %3920, %v3347_v38  }
 0x59b   :  { %3921 = vset.pattern.permute.xlu2 %v7321_v25  ;;  %3429 = vperm.xlu0 %3918, %v3263_v14  }
 0x59c   :  { %3486 = vperm.xlu2 %3921, %v3348_v21  }
 0x59d   :  { %v3375_v39 = vpop.permute.xlu0 %3374  ;;  %v3309_v62 = vpop.permute.xlu2 %3308 }
 0x59e   :  { %v3351_v17 = vsub.f32 %v6950_v37, %v3309_v62 }
 0x5a3   :  { %3919 = vset.pattern.permute.xlu0 %v7321_v25  ;;  %v7072_v31 = vpop.permute.xlu1 %3379 }
 0x5a4   :  { %3476 = vperm.xlu0 %3919, %v3346_v57  }
 0x5a5   :  { %v3305_v19 = vpop.permute.xlu0 %3304  ;;  %v7076_v27 = vpop.permute.xlu2 %3394 }
 0x5a6   :  { %v3349_v1 = vsub.f32 %v6926_v29, %v3305_v19  ;;  %v3446_v19 = vmul.f32 %v3375_v39, %v6652_v10 }
 0x5a8   :  { %3491 = vperm.xlu1 %3920, %v3349_v1   ;;  %v3447_v1 = vmul.f32 %v3375_v39, %v6762_v5  ;;  %v3445_v39 = vmul.f32 %v7052_v56, %v6754_v0  ;;  %v3443_v0 = vmul.f32 %v7061_v50, %v6746_v11 }
 0x5ac   :  { %3501 = vperm.xlu0 %3919, %v3351_v17  }
 0x5ad   :  { %v3307_v14 = vpop.permute.xlu1 %3306 }
 0x5ae   :  { %v3350_v16 = vsub.f32 %v6938_v8, %v3307_v14 }
 0x5b0   :  { %3496 = vperm.xlu2 %3921, %v3350_v16  }
 0x5b5   :  { %v3315_v4 = vpop.permute.xlu2 %3314  ;;  %v7080_v25 = vpop.permute.xlu1 %3389 }
 0x5b6   :  { %v3354_v60 = vsub.f32 %v6986_v23, %v3315_v4  ;;  %v3452_v11 = vmul.f32 %v7080_v25, %v6674_v20 }
 0x5b8   :  { %3516 = vperm.xlu0 %3919, %v3354_v60  }
 0x5bd   :  { %v3311_v9 = vpop.permute.xlu0 %3310  ;;  %v7083_v29 = vpop.permute.xlu2 %3409 }
 0x5be   :  { %v3352_v18 = vsub.f32 %v6962_v58, %v3311_v9  ;;  %v3450_v9 = vmul.f32 %v7067_v2, %v6667_v35  ;;  %v3442_v35 = vmul.f32 %v7061_v50, %v6637_v43 }
 0x5c0   :  { %3506 = vperm.xlu1 %3920, %v3352_v18   ;;  %v3451_v18 = vmul.f32 %v7067_v2, %v6778_v34 }
 0x5c5   :  { %v3313_v37 = vpop.permute.xlu1 %3312  ;;  %v7086_v45 = vpop.permute.xlu0 %3399 }
 0x5c6   :  { %v3353_v47 = vsub.f32 %v6974_v28, %v3313_v37  ;;  %v3457_v20 = vmul.f32 %v7086_v45, %v6802_v30 }
 0x5c8   :  { %3511 = vperm.xlu2 %3921, %v3353_v47  }
 0x5cd   :  { %v3321_v8 = vpop.permute.xlu2 %3320  ;;  %v7089_v23 = vpop.permute.xlu1 %3404 }
 0x5ce   :  { %v3357_v42 = vsub.f32 %v7022_v55, %v3321_v8  ;;  %v3459_v30 = vmul.f32 %v7089_v23, %v6810_v49 }
 0x5d0   :  { %3531 = vperm.xlu0 %3919, %v3357_v42  }
 0x5d5   :  { %v3317_v46 = vpop.permute.xlu0 %3316  ;;  %v7092_v58 = vpop.permute.xlu2 %3424 }
 0x5d6   :  { %v3355_v7 = vsub.f32 %v6998_v53, %v3317_v46 }
 0x5d8   :  { %3521 = vperm.xlu1 %3920, %v3355_v7  }
 0x5dd   :  { %v3319_v54 = vpop.permute.xlu1 %3318  ;;  %v7095_v28 = vpop.permute.xlu0 %3414 }
 0x5de   :  { %v3356_v38 = vsub.f32 %v7010_v40, %v3319_v54 }
 0x5e0   :  { %3526 = vperm.xlu2 %3921, %v3356_v38  }
 0x5e5   :  { %v3327_v21 = vpop.permute.xlu2 %3326  ;;  %v7098_v55 = vpop.permute.xlu1 %3419 }
 0x5e6   :  { %v3360_v32 = vsub.f32 %v7048_v52, %v3327_v21 }
 0x5e8   :  { %3546 = vperm.xlu0 %3919, %v3360_v32   ;;  %v3448_v32 = vmul.f32 %v7072_v31, %v6659_v15  ;;  %v3453_v15 = vmul.f32 %v7080_v25, %v6786_v63 }
 0x5ed   :  { %v3323_v57 = vpop.permute.xlu0 %3322  ;;  %v7100_v62 = vpop.permute.xlu2 %3439 }
 0x5ee   :  { %v3358_v53 = vsub.f32 %v7032_v33, %v3323_v57  ;;  %v3449_v57 = vmul.f32 %v7072_v31, %v6770_v22 }
 0x5f0   :  { %3536 = vperm.xlu1 %3920, %v3358_v53  }
 0x5f5   :  { %v3325_v40 = vpop.permute.xlu1 %3324 }
 0x5f6   :  { %v3359_v17 = vsub.f32 %v7040_v48, %v3325_v40  ;;  %v3487_v14 = vpop.permute.xlu2 %3486  ;;  %v3444_v48 = vmul.f32 %v7052_v56, %v6644_v41 }
 0x5f7   :  { %v3558_v16 = vadd.f32 %v3487_v14, %v3446_v19  ;;  %v3559_v4 = vadd.f32 %v3487_v14, %v3447_v1 }
 0x5f8   :  { %3541 = vperm.xlu2 %3921, %v3359_v17  }
 0x5f9   :  { %v3590_v52 = vmax.f32 %v3558_v16, 0.0  ;;  %v3591_v60 = vmax.f32 %v3559_v4, 0.0  ;;  %v3456_v16 = vmul.f32 %v7086_v45, %v6689_v6  ;;  %v3458_v6 = vmul.f32 %v7089_v23, %v6697_v51 }
 0x5fa   :  { %v3455_v51 = vmul.f32 %v7076_v27, %v6794_v24 }
 0x5fb   :  { %3622 = vst [vmem:[%s7271_s4 + $0x20] sm:$0xff] %v3590_v52 }
 0x5fc   :  { %3623 = vst [vmem:[%s7271_s4 + $0x28] sm:$0xff] %v3591_v60 }
 0x5fd   :  { %v7112_v10 = vpop.permute.xlu1 %3434 }
 0x605   :  { %v3329_v5 = vpop.permute.xlu0 %3328 }
 0x606   :  { %v3361_v33 = vsub.f32 %v7058_v44, %v3329_v5 }
 0x608   :  { %3551 = vperm.xlu1 %3920, %v3361_v33  }
 0x60a   :  { %v3482_v37 = vpop.permute.xlu1 %3481  ;;  %v3497_v47 = vpop.permute.xlu2 %3496 }
 0x60b   :  { %v3556_v8 = vadd.f32 %v3482_v37, %v3444_v48  ;;  %v3557_v42 = vadd.f32 %v3482_v37, %v3445_v39  ;;  %v3562_v46 = vadd.f32 %v3497_v47, %v3450_v9  ;;  %v3563_v7 = vadd.f32 %v3497_v47, %v3451_v18 }
 0x60c   :  { %v3454_v37 = vmul.f32 %v7076_v27, %v6682_v61  ;;  %v3463_v61 = vmul.f32 %v7095_v28, %v6826_v3 }
 0x60d   :  { %v3588_v44 = vmax.f32 %v3556_v8, 0.0  ;;  %v3589_v54 = vmax.f32 %v3557_v42, 0.0  ;;  %v3594_v38 = vmax.f32 %v3562_v46, 0.0  ;;  %v7123_v21 = vpop.permute.xlu0 %3429  ;;  %v3595_v41 = vmax.f32 %v3563_v7, 0.0 }
 0x60e   :  { %v3462_v46 = vmul.f32 %v7095_v28, %v6713_v36  ;;  %v3465_v36 = vmul.f32 %v7098_v55, %v6834_v26 }
 0x60f   :  { %3620 = vst [vmem:[%s7271_s4 + $0x10] sm:$0xff] %v3588_v44 }
 0x610   :  { %3621 = vst [vmem:[%s7271_s4 + $0x18] sm:$0xff] %v3589_v54 }
 0x611   :  { %3626 = vst [vmem:[%s7271_s4 + $0x40] sm:$0xff] %v3594_v38  ;;  %v3464_v38 = vmul.f32 %v7098_v55, %v6720_v13  ;;  %v3461_v13 = vmul.f32 %v7083_v29, %v6818_v59 }
 0x612   :  { %3627 = vst [vmem:[%s7271_s4 + $0x48] sm:$0xff] %v3595_v41 }
 0x616   :  { %v3477_v34 = vpop.permute.xlu0 %3476 }
 0x617   :  { %v3554_v56 = vadd.f32 %v3477_v34, %v3442_v35  ;;  %v3555_v2 = vadd.f32 %v3477_v34, %v3443_v0  ;;  %v3460_v34 = vmul.f32 %v7083_v29, %v6704_v12  ;;  %v7386_v12 = vld [vmem:[#allocation6_spill] sm:$0xff] }
 0x619   :  { %v3586_v53 = vmax.f32 %v3554_v56, 0.0  ;;  %v3587_v19 = vmax.f32 %v3555_v2, 0.0 }
 0x61a   :  { %v3492_v1 = vpop.permute.xlu1 %3491 }
 0x61b   :  { %3618 = vst [vmem:[%s7271_s4] sm:$0xff] %v3586_v53  ;;  %v3560_v43 = vadd.f32 %v3492_v1, %v3448_v32  ;;  %v3561_v40 = vadd.f32 %v3492_v1, %v3449_v57  ;;  %v7385_v57 = vld [vmem:[#allocation13_spill] sm:$0xff] }
 0x61c   :  { %3619 = vst [vmem:[%s7271_s4 + $0x8] sm:$0xff] %v3587_v19  ;;  %v3468_v53 = vmul.f32 %v7123_v21, %v7385_v57  ;;  %v3469_v19 = vmul.f32 %v7123_v21, %v7386_v12 }
 0x61d   :  { %v3592_v22 = vmax.f32 %v3560_v43, 0.0  ;;  %v3593_v50 = vmax.f32 %v3561_v40, 0.0 }
 0x61e   :  { %v3502_v31 = vpop.permute.xlu0 %3501 }
 0x61f   :  { %3624 = vst [vmem:[%s7271_s4 + $0x30] sm:$0xff] %v3592_v22  ;;  %v3564_v17 = vadd.f32 %v3502_v31, %v3452_v11  ;;  %v3565_v14 = vadd.f32 %v3502_v31, %v3453_v15  ;;  %v7387_v11 = vld [vmem:[#allocation2_spill] sm:$0xff]  ;;  %v7388_v22 = vld [vmem:[#allocation8_spill] sm:$0xff] }
 0x620   :  { %3625 = vst [vmem:[%s7271_s4 + $0x38] sm:$0xff] %v3593_v50  ;;  %v3470_v15 = vmul.f32 %v7112_v10, %v7387_v11  ;;  %v3471_v50 = vmul.f32 %v7112_v10, %v7388_v22 }
 0x621   :  { %v3596_v63 = vmax.f32 %v3564_v17, 0.0  ;;  %v3597_v25 = vmax.f32 %v3565_v14, 0.0 }
 0x622   :  { %v3512_v4 = vpop.permute.xlu2 %3511 }
 0x623   :  { %3628 = vst [vmem:[%s7271_s4 + $0x50] sm:$0xff] %v3596_v63  ;;  %v3568_v52 = vadd.f32 %v3512_v4, %v3456_v16  ;;  %v3569_v60 = vadd.f32 %v3512_v4, %v3457_v20  ;;  %v7389_v20 = vld [vmem:[#allocation12_spill] sm:$0xff] }
 0x624   :  { %3629 = vst [vmem:[%s7271_s4 + $0x58] sm:$0xff] %v3597_v25  ;;  %v3466_v63 = vmul.f32 %v7092_v58, %v7389_v20  ;;  %v7390_v25 = vld [vmem:[#allocation9_spill] sm:$0xff] }
 0x625   :  { %v3600_v5 = vmax.f32 %v3568_v52, 0.0  ;;  %v3601_v33 = vmax.f32 %v3569_v60, 0.0  ;;  %v3467_v4 = vmul.f32 %v7092_v58, %v7390_v25 }
 0x627   :  { %3632 = vst [vmem:[%s7271_s4 + $0x70] sm:$0xff] %v3600_v5 }
 0x628   :  { %3633 = vst [vmem:[%s7271_s4 + $0x78] sm:$0xff] %v3601_v33 }
 0x62a   :  { %v3517_v45 = vpop.permute.xlu0 %3516 }
 0x62b   :  { %v3570_v48 = vadd.f32 %v3517_v45, %v3458_v6  ;;  %v3571_v39 = vadd.f32 %v3517_v45, %v3459_v30  ;;  %v7391_v6 = vld [vmem:[#allocation11_spill] sm:$0xff] }
 0x62c   :  { %v3472_v30 = vmul.f32 %v7100_v62, %v7391_v6  ;;  %v7392_v45 = vld [vmem:[#allocation7_spill] sm:$0xff] }
 0x62d   :  { %v3602_v9 = vmax.f32 %v3570_v48, 0.0  ;;  %v3603_v18 = vmax.f32 %v3571_v39, 0.0  ;;  %v3473_v48 = vmul.f32 %v7100_v62, %v7392_v45 }
 0x62f   :  { %3634 = vst [vmem:[%s7271_s4 + $0x80] sm:$0xff] %v3602_v9 }
 0x630   :  { %3635 = vst [vmem:[%s7271_s4 + $0x88] sm:$0xff] %v3603_v18 }
 0x632   :  { %v3507_v49 = vpop.permute.xlu1 %3506 }
 0x633   :  { %v3566_v23 = vadd.f32 %v3507_v49, %v3454_v37  ;;  %v3567_v47 = vadd.f32 %v3507_v49, %v3455_v51 }
 0x635   :  { %v3598_v8 = vmax.f32 %v3566_v23, 0.0  ;;  %v3599_v42 = vmax.f32 %v3567_v47, 0.0 }
 0x637   :  { %3630 = vst [vmem:[%s7271_s4 + $0x60] sm:$0xff] %v3598_v8 }
 0x638   :  { %3631 = vst [vmem:[%s7271_s4 + $0x68] sm:$0xff] %v3599_v42 }
 0x63a   :  { %v3527_v24 = vpop.permute.xlu2 %3526 }
 0x63b   :  { %v3574_v27 = vadd.f32 %v3527_v24, %v3462_v46  ;;  %v3575_v7 = vadd.f32 %v3527_v24, %v3463_v61 }
 0x63d   :  { %v3606_v44 = vmax.f32 %v3574_v27, 0.0  ;;  %v3607_v54 = vmax.f32 %v3575_v7, 0.0 }
 0x63f   :  { %3638 = vst [vmem:[%s7271_s4 + $0xa0] sm:$0xff] %v3606_v44 }
 0x640   :  { %3639 = vst [vmem:[%s7271_s4 + $0xa8] sm:$0xff] %v3607_v54 }
 0x642   :  { %v3532_v3 = vpop.permute.xlu0 %3531 }
 0x643   :  { %v3576_v28 = vadd.f32 %v3532_v3, %v3464_v38  ;;  %v3577_v41 = vadd.f32 %v3532_v3, %v3465_v36 }
 0x645   :  { %v3608_v35 = vmax.f32 %v3576_v28, 0.0  ;;  %v3609_v0 = vmax.f32 %v3577_v41, 0.0 }
 0x647   :  { %3640 = vst [vmem:[%s7271_s4 + $0xb0] sm:$0xff] %v3608_v35 }
 0x648   :  { %3641 = vst [vmem:[%s7271_s4 + $0xb8] sm:$0xff] %v3609_v0 }
 0x64a   :  { %v3522_v26 = vpop.permute.xlu1 %3521 }
 0x64b   :  { %v3572_v55 = vadd.f32 %v3522_v26, %v3460_v34  ;;  %v3573_v56 = vadd.f32 %v3522_v26, %v3461_v13 }
 0x64d   :  { %v3604_v2 = vmax.f32 %v3572_v55, 0.0  ;;  %v3605_v32 = vmax.f32 %v3573_v56, 0.0 }
 0x64f   :  { %3636 = vst [vmem:[%s7271_s4 + $0x90] sm:$0xff] %v3604_v2 }
 0x650   :  { %3637 = vst [vmem:[%s7271_s4 + $0x98] sm:$0xff] %v3605_v32 }
 0x652   :  { %v3542_v59 = vpop.permute.xlu2 %3541 }
 0x653   :  { %v3580_v29 = vadd.f32 %v3542_v59, %v3468_v53  ;;  %v3581_v1 = vadd.f32 %v3542_v59, %v3469_v19 }
 0x655   :  { %v3612_v43 = vmax.f32 %v3580_v29, 0.0  ;;  %v3613_v40 = vmax.f32 %v3581_v1, 0.0 }
 0x657   :  { %3644 = vst [vmem:[%s7271_s4 + $0xd0] sm:$0xff] %v3612_v43 }
 0x658   :  { %3645 = vst [vmem:[%s7271_s4 + $0xd8] sm:$0xff] %v3613_v40 }
 0x65a   :  { %v3547_v21 = vpop.permute.xlu0 %3546 }
 0x65b   :  { %v3582_v31 = vadd.f32 %v3547_v21, %v3470_v15  ;;  %v3583_v17 = vadd.f32 %v3547_v21, %v3471_v50 }
 0x65d   :  { %v3614_v14 = vmax.f32 %v3582_v31, 0.0  ;;  %v3615_v16 = vmax.f32 %v3583_v17, 0.0 }
 0x65f   :  { %3646 = vst [vmem:[%s7271_s4 + $0xe0] sm:$0xff] %v3614_v14 }
 0x660   :  { %3647 = vst [vmem:[%s7271_s4 + $0xe8] sm:$0xff] %v3615_v16 }
 0x662   :  { %v3537_v10 = vpop.permute.xlu1 %3536 }
 0x663   :  { %v3578_v52 = vadd.f32 %v3537_v10, %v3466_v63  ;;  %v3579_v60 = vadd.f32 %v3537_v10, %v3467_v4 }
 0x665   :  { %v3610_v5 = vmax.f32 %v3578_v52, 0.0  ;;  %v3611_v33 = vmax.f32 %v3579_v60, 0.0 }
 0x667   :  { %3642 = vst [vmem:[%s7271_s4 + $0xc0] sm:$0xff] %v3610_v5 }
 0x668   :  { %3643 = vst [vmem:[%s7271_s4 + $0xc8] sm:$0xff] %v3611_v33 }
 0x67a   :  { %v3552_v58 = vpop.permute.xlu1 %3551 }
 0x67b   :  { %v3584_v39 = vadd.f32 %v3552_v58, %v3472_v30  ;;  %v3585_v9 = vadd.f32 %v3552_v58, %v3473_v48 }
 0x67d   :  { %v3616_v18 = vmax.f32 %v3584_v39, 0.0  ;;  %v3617_v37 = vmax.f32 %v3585_v9, 0.0 }
 0x67f   :  { %3648 = vst [vmem:[%s7271_s4 + $0xf0] sm:$0xff] %v3616_v18 }
 0x680   :  { %3649 = vst [vmem:[%s7271_s4 + $0xf8] sm:$0xff] %v3617_v37 }

</bundles_post_ra>
